<compile_context>
chip_gen: v7x
topology: tpu7x:2x2x1
jax: 0.10.0
libtpu: 0.0.40
codegen_flags: <defaults>
</compile_context>

<pallas_src>
import functools

import jax
import jax.numpy as jnp
from jax import lax
from jax.experimental import pallas as pl
from jax.experimental.pallas import tpu as pltpu

BN_EPS = 1e-5
_LANE = 128
_VMEM_LIMIT_BYTES = 32 * 1024 * 1024  # safe on v5e/v6e/v7x; tiles stay well below


def _round_up(x, m):
    return (x + m - 1) // m * m


# --------------------------------------------------------------------------
# Implicit-GEMM conv of one halo'd slab: 9 shifted matmuls, f32 accumulation.
#   slab : (R+2, W+2, C_in) bf16 value (1-pixel halo on both spatial dims)
#   w_ref: (3, 3, C_in, Cp) ref (bf16, C_out zero-padded to lane-dense Cp)
# returns (R*W, Cp) f32
# --------------------------------------------------------------------------
def _conv_tile(slab, w_ref):
    rp2, wp2, cin = slab.shape
    r, w = rp2 - 2, wp2 - 2
    acc = None
    for kh in range(3):
        for kw in range(3):
            win = slab[kh:kh + r, kw:kw + w, :].reshape(r * w, cin)
            part = jnp.dot(win, w_ref[kh, kw],
                           preferred_element_type=jnp.float32)
            acc = part if acc is None else acc + part
    return acc


# --------------------------------------------------------------------------
# Pass 1: per-tile partial BN statistics only (no conv writeback).
# Grid axes are both "parallel" (no cross-iteration carry) so v7x shards the
# dominant pass across its two TensorCores.
# --------------------------------------------------------------------------
def _stats_kernel(slab_ref, w_ref, stats_ref, *, H, R, W, mask_rows):
    acc = _conv_tile(slab_ref[0, 0], w_ref)
    if mask_rows:
        # Rows beyond the real image (H padded up to a multiple of R) must not
        # contribute to the batch statistics.
        row_start = pl.program_id(1) * R
        rows = lax.broadcasted_iota(jnp.int32, (R * W, 1), 0) // W
        acc = jnp.where(row_start + rows < H, acc, 0.0)
    s = jnp.sum(acc, axis=0, keepdims=True)          # XLU sublane reduce
    sq = jnp.sum(acc * acc, axis=0, keepdims=True)
    stats_ref[...] = jnp.concatenate([s, sq], axis=0)[None, None]


# --------------------------------------------------------------------------
# Pass 2: recompute the conv tile and apply fused BN affine + ReLU.
# scale/shift arrive packed as one (2, Cp) operand.
# --------------------------------------------------------------------------
def _conv_bn_relu_kernel(slab_ref, w_ref, ss_ref, out_ref, *, R, W):
    acc = _conv_tile(slab_ref[0, 0], w_ref)
    y = jnp.maximum(acc * ss_ref[0:1, :] + ss_ref[1:2, :], 0.0)
    out_ref[...] = y.reshape(1, R, W, y.shape[-1]).astype(out_ref.dtype)


# --------------------------------------------------------------------------
# NHWC core (no layout transposes).
# --------------------------------------------------------------------------
def cnn_block_forward_nhwc(x_nhwc, conv_w, conv_b, bn_gamma, bn_beta, *,
                           target_tile_m=1024, compute_dtype=jnp.bfloat16):
    # Conv bias is mathematically cancelled by training-mode BN mean
    # subtraction (per-channel constant shift), so it never enters the kernel.
    del conv_b

    N, H, W, C_in = x_nhwc.shape
    C_out = conv_w.shape[0]
    Cp = _round_up(C_out, _LANE)          # lane-dense output channels

    # Row-tile size: target ~target_tile_m output pixels (GEMM M rows) / step.
    R = max(1, min(H, (target_tile_m + W - 1) // W))
    HT = -(-H // R)                        # cdiv
    H_pad = HT * R
    mask_rows = (H_pad != H)

    # ---- staging: bf16 halo'd row slabs (~1.1x input; replaces 9x im2col) ----
    xq = x_nhwc.astype(compute_dtype)                       # cast BEFORE pad
    xp = jnp.pad(xq, ((0, 0), (1, 1 + H_pad - H), (1, 1), (0, 0)))
    slabs = jnp.stack([xp[:, i * R:i * R + R + 2] for i in range(HT)], axis=1)
    # slabs: (N, HT, R+2, W+2, C_in)

    # Weights: (C_out, C_in, 3, 3) -> (kh, kw, C_in, Cp), bf16, lane-padded.
    w_mat = jnp.pad(conv_w.astype(compute_dtype).transpose(2, 3, 1, 0),
                    ((0, 0), (0, 0), (0, 0), (0, Cp - C_out)))

    grid = (N, HT)
    slab_spec = pl.BlockSpec((1, 1, R + 2, W + 2, C_in),
                             lambda n, i: (n, i, 0, 0, 0))
    w_spec = pl.BlockSpec((3, 3, C_in, Cp), lambda n, i: (0, 0, 0, 0))

    # ---- pass 1: per-tile partial sum / sum-of-squares ----
    stats_parts = pl.pallas_call(
        functools.partial(_stats_kernel, H=H, R=R, W=W, mask_rows=mask_rows),
        grid=grid,
        in_specs=[slab_spec, w_spec],
        out_specs=pl.BlockSpec((1, 1, 2, Cp), lambda n, i: (n, i, 0, 0)),
        out_shape=jax.ShapeDtypeStruct((N, HT, 2, Cp), jnp.float32),
        compiler_params=pltpu.CompilerParams(
            dimension_semantics=("parallel", "parallel"),
            vmem_limit_bytes=_VMEM_LIMIT_BYTES),
    )(slabs, w_mat)

    # ---- tiny per-channel work in plain JAX: mean/var -> scale/shift ----
    totals = jnp.sum(stats_parts, axis=(0, 1))              # (2, Cp) f32
    inv_m = 1.0 / (N * H * W)                               # real pixel count
    mean = totals[0] * inv_m
    var = jnp.maximum(totals[1] * inv_m - mean * mean, 0.0)  # biased (PyTorch)
    inv_std = lax.rsqrt(var + BN_EPS)
    gamma_p = jnp.pad(bn_gamma.astype(jnp.float32), (0, Cp - C_out))
    beta_p = jnp.pad(bn_beta.astype(jnp.float32), (0, Cp - C_out))
    scale = gamma_p * inv_std
    shift = beta_p - mean * scale
    ss = jnp.stack([scale, shift], axis=0)                  # packed (2, Cp)

    # ---- pass 2: recompute conv, apply BN affine + ReLU, write output once ----
    out_full = pl.pallas_call(
        functools.partial(_conv_bn_relu_kernel, R=R, W=W),
        grid=grid,
        in_specs=[slab_spec, w_spec,
                  pl.BlockSpec((2, Cp), lambda n, i: (0, 0))],
        out_specs=pl.BlockSpec((1, R, W, Cp), lambda n, i: (n, i, 0, 0)),
        out_shape=jax.ShapeDtypeStruct((N, H_pad, W, Cp), jnp.float32),
        compiler_params=pltpu.CompilerParams(
            dimension_semantics=("parallel", "parallel"),
            vmem_limit_bytes=_VMEM_LIMIT_BYTES),
    )(slabs, w_mat, ss)

    # Tail slice only when actually needed (C_out % 128 == 0 and H % R == 0
    # write the final array directly, no extra HBM pass).
    if H_pad != H or Cp != C_out:
        out_full = out_full[:, :H, :, :C_out]
    return out_full


# --------------------------------------------------------------------------
# PyTorch-layout entry point (NCHW in / NCHW out), matching CNN_block.forward.
# Prefer cnn_block_forward_nhwc directly to avoid the two layout transposes.
# --------------------------------------------------------------------------
@functools.partial(jax.jit, static_argnames=("target_tile_m",))
def cnn_block_forward(x, conv_w, conv_b, bn_gamma, bn_beta, *,
                      target_tile_m=1024):
    x_nhwc = jnp.transpose(x, (0, 2, 3, 1))
    y_nhwc = cnn_block_forward_nhwc(x_nhwc, conv_w, conv_b, bn_gamma, bn_beta,
                                    target_tile_m=target_tile_m)
    return jnp.transpose(y_nhwc, (0, 3, 1, 2))


# --------------------------------------------------------------------------
# Pure-JAX reference mirroring the PyTorch module (conv+bias, training-mode
# BN, ReLU). Inputs pre-rounded to bf16 so it validates at the kernel's
# declared compute precision (bf16 MXU multiplies, f32 accumulation).
# --------------------------------------------------------------------------
def _reference_forward(x, conv_w, conv_b, bn_gamma, bn_beta,
                       compute_dtype=jnp.bfloat16):
    xq = x.astype(compute_dtype).astype(jnp.float32)
    wq = conv_w.astype(compute_dtype).astype(jnp.float32)
    y = jax.lax.conv_general_dilated(
        xq, wq, window_strides=(1, 1), padding=((1, 1), (1, 1)),
        dimension_numbers=("NCHW", "OIHW", "NCHW"))
    y = y + conv_b.reshape(1, -1, 1, 1).astype(jnp.float32)
    mean = jnp.mean(y, axis=(0, 2, 3), keepdims=True)
    var = jnp.mean((y - mean) ** 2, axis=(0, 2, 3), keepdims=True)
    y = (y - mean) * jax.lax.rsqrt(var + BN_EPS)
    y = y * bn_gamma.reshape(1, -1, 1, 1) + bn_beta.reshape(1, -1, 1, 1)
    return jnp.maximum(y, 0.0)


if __name__ == "__main__":
    key = jax.random.PRNGKey(0)
    k_x, k_w, k_b = jax.random.split(key, 3)

    N, C_in, C_out, H, W = 2, 4, 8, 16, 16

    x = jax.random.normal(k_x, (N, C_in, H, W), dtype=jnp.float32)
    # Deterministic parameter init (synthetic; shapes match nn.Conv2d / BN2d).
    fan_in = C_in * 3 * 3
    bound = 1.0 / (fan_in ** 0.5)
    conv_w = jax.random.uniform(k_w, (C_out, C_in, 3, 3),
                                minval=-bound, maxval=bound, dtype=jnp.float32)
    conv_b = jax.random.uniform(k_b, (C_out,),
                                minval=-bound, maxval=bound, dtype=jnp.float32)
    bn_gamma = jnp.ones((C_out,), dtype=jnp.float32)   # PyTorch BN default
    bn_beta = jnp.zeros((C_out,), dtype=jnp.float32)   # PyTorch BN default

    out = jax.block_until_ready(
        cnn_block_forward(x, conv_w, conv_b, bn_gamma, bn_beta))
    ref = jax.block_until_ready(
        _reference_forward(x, conv_w, conv_b, bn_gamma, bn_beta))

    assert out.shape == (N, C_out, H, W)
    assert out.dtype == jnp.float32
    max_err = float(jnp.max(jnp.abs(out - ref)))
    assert jnp.allclose(out, ref, atol=2e-3, rtol=2e-3), \
        f"mismatch vs reference (max abs err {max_err})"
    print("KERNEL_OK")
</pallas_src>

<mosaic_0001>
module attributes {stable_mosaic.version = 11 : i64} {
  func.func @_stats_kernel(%arg0: i32, %arg1: i32, %arg2: memref<1x1x18x18x4xbf16, #tpu.memory_space<vmem>>, %arg3: memref<3x3x4x128xbf16, #tpu.memory_space<vmem>>, %arg4: memref<1x1x2x128xf32, #tpu.memory_space<vmem>>) attributes {dimension_semantics = [#tpu.dimension_semantics<parallel>, #tpu.dimension_semantics<parallel>], iteration_bounds = array<i64: 2, 1>, scalar_prefetch = 0 : i64, scratch_operands = 0 : i64, tpu.core_type = #tpu.core_type<tc>, window_params = [{transform_indices = @transform_0, window_bounds = array<i64: 1, 1, 18, 18, 4>}, {pipeline_mode = #tpu.pipeline_mode<synchronous>, transform_indices = @transform_1, window_bounds = array<i64: 3, 3, 4, 128>}, {transform_indices = @transform_2, window_bounds = array<i64: 1, 1, 2, 128>}]} {
    %c0 = arith.constant 0 : index
    %c0_0 = arith.constant 0 : index
    %c0_1 = arith.constant 0 : index
    %c0_2 = arith.constant 0 : index
    %c0_3 = arith.constant 0 : index
    %0 = vector.load %arg2[%c0, %c0_0, %c0_1, %c0_2, %c0_3] : memref<1x1x18x18x4xbf16, #tpu.memory_space<vmem>>, vector<1x1x18x18x4xbf16>
    %1 = vector.shape_cast %0 : vector<1x1x18x18x4xbf16> to vector<18x18x4xbf16>
    %2 = vector.extract_strided_slice %1 {offsets = [0, 0, 0], sizes = [16, 16, 4], strides = [1, 1, 1]} : vector<18x18x4xbf16> to vector<16x16x4xbf16>
    %3 = vector.shape_cast %2 : vector<16x16x4xbf16> to vector<256x4xbf16>
    %c0_4 = arith.constant 0 : index
    %c0_5 = arith.constant 0 : index
    %c0_6 = arith.constant 0 : index
    %c0_7 = arith.constant 0 : index
    %4 = vector.load %arg3[%c0_4, %c0_5, %c0_6, %c0_7] : memref<3x3x4x128xbf16, #tpu.memory_space<vmem>>, vector<1x1x4x128xbf16>
    %5 = vector.shape_cast %4 : vector<1x1x4x128xbf16> to vector<4x128xbf16>
    %cst = arith.constant dense<0.000000e+00> : vector<256x128xf32>
    %6 = tpu.matmul %3, %5, %cst {dimension_numbers = #tpu.dot_dimension_numbers<[1], [0], [0], [1], [0, 0, 1, 1], [], []>} : vector<256x4xbf16>, vector<4x128xbf16>, vector<256x128xf32> -> vector<256x128xf32>
    %7 = vector.extract_strided_slice %1 {offsets = [0, 1, 0], sizes = [16, 16, 4], strides = [1, 1, 1]} : vector<18x18x4xbf16> to vector<16x16x4xbf16>
    %8 = vector.shape_cast %7 : vector<16x16x4xbf16> to vector<256x4xbf16>
    %c0_8 = arith.constant 0 : index
    %c1 = arith.constant 1 : index
    %c0_9 = arith.constant 0 : index
    %c0_10 = arith.constant 0 : index
    %9 = vector.load %arg3[%c0_8, %c1, %c0_9, %c0_10] : memref<3x3x4x128xbf16, #tpu.memory_space<vmem>>, vector<1x1x4x128xbf16>
    %10 = vector.shape_cast %9 : vector<1x1x4x128xbf16> to vector<4x128xbf16>
    %cst_11 = arith.constant dense<0.000000e+00> : vector<256x128xf32>
    %11 = tpu.matmul %8, %10, %cst_11 {dimension_numbers = #tpu.dot_dimension_numbers<[1], [0], [0], [1], [0, 0, 1, 1], [], []>} : vector<256x4xbf16>, vector<4x128xbf16>, vector<256x128xf32> -> vector<256x128xf32>
    %12 = arith.addf %6, %11 : vector<256x128xf32>
    %13 = vector.extract_strided_slice %1 {offsets = [0, 2, 0], sizes = [16, 16, 4], strides = [1, 1, 1]} : vector<18x18x4xbf16> to vector<16x16x4xbf16>
    %14 = vector.shape_cast %13 : vector<16x16x4xbf16> to vector<256x4xbf16>
    %c0_12 = arith.constant 0 : index
    %c2 = arith.constant 2 : index
    %c0_13 = arith.constant 0 : index
    %c0_14 = arith.constant 0 : index
    %15 = vector.load %arg3[%c0_12, %c2, %c0_13, %c0_14] : memref<3x3x4x128xbf16, #tpu.memory_space<vmem>>, vector<1x1x4x128xbf16>
    %16 = vector.shape_cast %15 : vector<1x1x4x128xbf16> to vector<4x128xbf16>
    %cst_15 = arith.constant dense<0.000000e+00> : vector<256x128xf32>
    %17 = tpu.matmul %14, %16, %cst_15 {dimension_numbers = #tpu.dot_dimension_numbers<[1], [0], [0], [1], [0, 0, 1, 1], [], []>} : vector<256x4xbf16>, vector<4x128xbf16>, vector<256x128xf32> -> vector<256x128xf32>
    %18 = arith.addf %12, %17 : vector<256x128xf32>
    %19 = vector.extract_strided_slice %1 {offsets = [1, 0, 0], sizes = [16, 16, 4], strides = [1, 1, 1]} : vector<18x18x4xbf16> to vector<16x16x4xbf16>
    %20 = vector.shape_cast %19 : vector<16x16x4xbf16> to vector<256x4xbf16>
    %c1_16 = arith.constant 1 : index
    %c0_17 = arith.constant 0 : index
    %c0_18 = arith.constant 0 : index
    %c0_19 = arith.constant 0 : index
    %21 = vector.load %arg3[%c1_16, %c0_17, %c0_18, %c0_19] : memref<3x3x4x128xbf16, #tpu.memory_space<vmem>>, vector<1x1x4x128xbf16>
    %22 = vector.shape_cast %21 : vector<1x1x4x128xbf16> to vector<4x128xbf16>
    %cst_20 = arith.constant dense<0.000000e+00> : vector<256x128xf32>
    %23 = tpu.matmul %20, %22, %cst_20 {dimension_numbers = #tpu.dot_dimension_numbers<[1], [0], [0], [1], [0, 0, 1, 1], [], []>} : vector<256x4xbf16>, vector<4x128xbf16>, vector<256x128xf32> -> vector<256x128xf32>
    %24 = arith.addf %18, %23 : vector<256x128xf32>
    %25 = vector.extract_strided_slice %1 {offsets = [1, 1, 0], sizes = [16, 16, 4], strides = [1, 1, 1]} : vector<18x18x4xbf16> to vector<16x16x4xbf16>
    %26 = vector.shape_cast %25 : vector<16x16x4xbf16> to vector<256x4xbf16>
    %c1_21 = arith.constant 1 : index
    %c1_22 = arith.constant 1 : index
    %c0_23 = arith.constant 0 : index
    %c0_24 = arith.constant 0 : index
    %27 = vector.load %arg3[%c1_21, %c1_22, %c0_23, %c0_24] : memref<3x3x4x128xbf16, #tpu.memory_space<vmem>>, vector<1x1x4x128xbf16>
    %28 = vector.shape_cast %27 : vector<1x1x4x128xbf16> to vector<4x128xbf16>
    %cst_25 = arith.constant dense<0.000000e+00> : vector<256x128xf32>
    %29 = tpu.matmul %26, %28, %cst_25 {dimension_numbers = #tpu.dot_dimension_numbers<[1], [0], [0], [1], [0, 0, 1, 1], [], []>} : vector<256x4xbf16>, vector<4x128xbf16>, vector<256x128xf32> -> vector<256x128xf32>
    %30 = arith.addf %24, %29 : vector<256x128xf32>
    %31 = vector.extract_strided_slice %1 {offsets = [1, 2, 0], sizes = [16, 16, 4], strides = [1, 1, 1]} : vector<18x18x4xbf16> to vector<16x16x4xbf16>
    %32 = vector.shape_cast %31 : vector<16x16x4xbf16> to vector<256x4xbf16>
    %c1_26 = arith.constant 1 : index
    %c2_27 = arith.constant 2 : index
    %c0_28 = arith.constant 0 : index
    %c0_29 = arith.constant 0 : index
    %33 = vector.load %arg3[%c1_26, %c2_27, %c0_28, %c0_29] : memref<3x3x4x128xbf16, #tpu.memory_space<vmem>>, vector<1x1x4x128xbf16>
    %34 = vector.shape_cast %33 : vector<1x1x4x128xbf16> to vector<4x128xbf16>
    %cst_30 = arith.constant dense<0.000000e+00> : vector<256x128xf32>
    %35 = tpu.matmul %32, %34, %cst_30 {dimension_numbers = #tpu.dot_dimension_numbers<[1], [0], [0], [1], [0, 0, 1, 1], [], []>} : vector<256x4xbf16>, vector<4x128xbf16>, vector<256x128xf32> -> vector<256x128xf32>
    %36 = arith.addf %30, %35 : vector<256x128xf32>
    %37 = vector.extract_strided_slice %1 {offsets = [2, 0, 0], sizes = [16, 16, 4], strides = [1, 1, 1]} : vector<18x18x4xbf16> to vector<16x16x4xbf16>
    %38 = vector.shape_cast %37 : vector<16x16x4xbf16> to vector<256x4xbf16>
    %c2_31 = arith.constant 2 : index
    %c0_32 = arith.constant 0 : index
    %c0_33 = arith.constant 0 : index
    %c0_34 = arith.constant 0 : index
    %39 = vector.load %arg3[%c2_31, %c0_32, %c0_33, %c0_34] : memref<3x3x4x128xbf16, #tpu.memory_space<vmem>>, vector<1x1x4x128xbf16>
    %40 = vector.shape_cast %39 : vector<1x1x4x128xbf16> to vector<4x128xbf16>
    %cst_35 = arith.constant dense<0.000000e+00> : vector<256x128xf32>
    %41 = tpu.matmul %38, %40, %cst_35 {dimension_numbers = #tpu.dot_dimension_numbers<[1], [0], [0], [1], [0, 0, 1, 1], [], []>} : vector<256x4xbf16>, vector<4x128xbf16>, vector<256x128xf32> -> vector<256x128xf32>
    %42 = arith.addf %36, %41 : vector<256x128xf32>
    %43 = vector.extract_strided_slice %1 {offsets = [2, 1, 0], sizes = [16, 16, 4], strides = [1, 1, 1]} : vector<18x18x4xbf16> to vector<16x16x4xbf16>
    %44 = vector.shape_cast %43 : vector<16x16x4xbf16> to vector<256x4xbf16>
    %c2_36 = arith.constant 2 : index
    %c1_37 = arith.constant 1 : index
    %c0_38 = arith.constant 0 : index
    %c0_39 = arith.constant 0 : index
    %45 = vector.load %arg3[%c2_36, %c1_37, %c0_38, %c0_39] : memref<3x3x4x128xbf16, #tpu.memory_space<vmem>>, vector<1x1x4x128xbf16>
    %46 = vector.shape_cast %45 : vector<1x1x4x128xbf16> to vector<4x128xbf16>
    %cst_40 = arith.constant dense<0.000000e+00> : vector<256x128xf32>
    %47 = tpu.matmul %44, %46, %cst_40 {dimension_numbers = #tpu.dot_dimension_numbers<[1], [0], [0], [1], [0, 0, 1, 1], [], []>} : vector<256x4xbf16>, vector<4x128xbf16>, vector<256x128xf32> -> vector<256x128xf32>
    %48 = arith.addf %42, %47 : vector<256x128xf32>
    %49 = vector.extract_strided_slice %1 {offsets = [2, 2, 0], sizes = [16, 16, 4], strides = [1, 1, 1]} : vector<18x18x4xbf16> to vector<16x16x4xbf16>
    %50 = vector.shape_cast %49 : vector<16x16x4xbf16> to vector<256x4xbf16>
    %c2_41 = arith.constant 2 : index
    %c2_42 = arith.constant 2 : index
    %c0_43 = arith.constant 0 : index
    %c0_44 = arith.constant 0 : index
    %51 = vector.load %arg3[%c2_41, %c2_42, %c0_43, %c0_44] : memref<3x3x4x128xbf16, #tpu.memory_space<vmem>>, vector<1x1x4x128xbf16>
    %52 = vector.shape_cast %51 : vector<1x1x4x128xbf16> to vector<4x128xbf16>
    %cst_45 = arith.constant dense<0.000000e+00> : vector<256x128xf32>
    %53 = tpu.matmul %50, %52, %cst_45 {dimension_numbers = #tpu.dot_dimension_numbers<[1], [0], [0], [1], [0, 0, 1, 1], [], []>} : vector<256x4xbf16>, vector<4x128xbf16>, vector<256x128xf32> -> vector<256x128xf32>
    %54 = arith.addf %48, %53 : vector<256x128xf32>
    %cst_46 = arith.constant dense<0.000000e+00> : vector<128xf32>
    %55 = vector.multi_reduction <add>, %54, %cst_46 [0] : vector<256x128xf32> to vector<128xf32>
    %56 = vector.shape_cast %55 : vector<128xf32> to vector<1x128xf32>
    %57 = arith.mulf %54, %54 : vector<256x128xf32>
    %cst_47 = arith.constant dense<0.000000e+00> : vector<128xf32>
    %58 = vector.multi_reduction <add>, %57, %cst_47 [0] : vector<256x128xf32> to vector<128xf32>
    %59 = vector.shape_cast %58 : vector<128xf32> to vector<1x128xf32>
    %60 = tpu.concatenate %56, %59 in 0 : vector<1x128xf32>, vector<1x128xf32> -> vector<2x128xf32>
    %61 = vector.shape_cast %60 : vector<2x128xf32> to vector<1x1x2x128xf32>
    %c0_48 = arith.constant 0 : index
    %c0_49 = arith.constant 0 : index
    %c0_50 = arith.constant 0 : index
    %c0_51 = arith.constant 0 : index
    %62 = vector.load %arg4[%c0_48, %c0_49, %c0_50, %c0_51] : memref<1x1x2x128xf32, #tpu.memory_space<vmem>>, vector<1x1x2x128xf32>
    tpu.vector_store %arg4[%c0_48, %c0_49, %c0_50, %c0_51], %61 {strides = array<i32>} : memref<1x1x2x128xf32, #tpu.memory_space<vmem>>, vector<1x1x2x128xf32>,
    return
  }
  func.func @transform_0(%arg0: i32, %arg1: i32) -> (i32, i32, i32, i32, i32) {
    %c0_i32 = arith.constant 0 : i32
    %c0_i32_0 = arith.constant 0 : i32
    %c0_i32_1 = arith.constant 0 : i32
    %c0_i32_2 = arith.constant 0 : i32
    return %arg0, %arg1, %c0_i32, %c0_i32_0, %c0_i32_1 : i32, i32, i32, i32, i32
  }
  func.func @transform_1(%arg0: i32, %arg1: i32) -> (i32, i32, i32, i32) {
    %c0_i32 = arith.constant 0 : i32
    %c0_i32_0 = arith.constant 0 : i32
    %c0_i32_1 = arith.constant 0 : i32
    %c0_i32_2 = arith.constant 0 : i32
    %c0_i32_3 = arith.constant 0 : i32
    return %c0_i32, %c0_i32_0, %c0_i32_1, %c0_i32_2 : i32, i32, i32, i32
  }
  func.func @transform_2(%arg0: i32, %arg1: i32) -> (i32, i32, i32, i32) {
    %c0_i32 = arith.constant 0 : i32
    %c0_i32_0 = arith.constant 0 : i32
    %c0_i32_1 = arith.constant 0 : i32
    return %arg0, %arg1, %c0_i32, %c0_i32_0 : i32, i32, i32, i32
  }
}

module attributes {stable_mosaic.version = 11 : i64} {
  func.func @_conv_bn_relu_kernel(%arg0: i32, %arg1: i32, %arg2: memref<1x1x18x18x4xbf16, #tpu.memory_space<vmem>>, %arg3: memref<3x3x4x128xbf16, #tpu.memory_space<vmem>>, %arg4: memref<2x128xf32, #tpu.memory_space<vmem>>, %arg5: memref<1x16x16x128xf32, #tpu.memory_space<vmem>>) attributes {dimension_semantics = [#tpu.dimension_semantics<parallel>, #tpu.dimension_semantics<parallel>], iteration_bounds = array<i64: 2, 1>, scalar_prefetch = 0 : i64, scratch_operands = 0 : i64, tpu.core_type = #tpu.core_type<tc>, window_params = [{transform_indices = @transform_0, window_bounds = array<i64: 1, 1, 18, 18, 4>}, {pipeline_mode = #tpu.pipeline_mode<synchronous>, transform_indices = @transform_1, window_bounds = array<i64: 3, 3, 4, 128>}, {pipeline_mode = #tpu.pipeline_mode<synchronous>, transform_indices = @transform_2, window_bounds = array<i64: 2, 128>}, {transform_indices = @transform_3, window_bounds = array<i64: 1, 16, 16, 128>}]} {
    %c0 = arith.constant 0 : index
    %c0_0 = arith.constant 0 : index
    %c0_1 = arith.constant 0 : index
    %c0_2 = arith.constant 0 : index
    %c0_3 = arith.constant 0 : index
    %0 = vector.load %arg2[%c0, %c0_0, %c0_1, %c0_2, %c0_3] : memref<1x1x18x18x4xbf16, #tpu.memory_space<vmem>>, vector<1x1x18x18x4xbf16>
    %1 = vector.shape_cast %0 : vector<1x1x18x18x4xbf16> to vector<18x18x4xbf16>
    %2 = vector.extract_strided_slice %1 {offsets = [0, 0, 0], sizes = [16, 16, 4], strides = [1, 1, 1]} : vector<18x18x4xbf16> to vector<16x16x4xbf16>
    %3 = vector.shape_cast %2 : vector<16x16x4xbf16> to vector<256x4xbf16>
    %c0_4 = arith.constant 0 : index
    %c0_5 = arith.constant 0 : index
    %c0_6 = arith.constant 0 : index
    %c0_7 = arith.constant 0 : index
    %4 = vector.load %arg3[%c0_4, %c0_5, %c0_6, %c0_7] : memref<3x3x4x128xbf16, #tpu.memory_space<vmem>>, vector<1x1x4x128xbf16>
    %5 = vector.shape_cast %4 : vector<1x1x4x128xbf16> to vector<4x128xbf16>
    %cst = arith.constant dense<0.000000e+00> : vector<256x128xf32>
    %6 = tpu.matmul %3, %5, %cst {dimension_numbers = #tpu.dot_dimension_numbers<[1], [0], [0], [1], [0, 0, 1, 1], [], []>} : vector<256x4xbf16>, vector<4x128xbf16>, vector<256x128xf32> -> vector<256x128xf32>
    %7 = vector.extract_strided_slice %1 {offsets = [0, 1, 0], sizes = [16, 16, 4], strides = [1, 1, 1]} : vector<18x18x4xbf16> to vector<16x16x4xbf16>
    %8 = vector.shape_cast %7 : vector<16x16x4xbf16> to vector<256x4xbf16>
    %c0_8 = arith.constant 0 : index
    %c1 = arith.constant 1 : index
    %c0_9 = arith.constant 0 : index
    %c0_10 = arith.constant 0 : index
    %9 = vector.load %arg3[%c0_8, %c1, %c0_9, %c0_10] : memref<3x3x4x128xbf16, #tpu.memory_space<vmem>>, vector<1x1x4x128xbf16>
    %10 = vector.shape_cast %9 : vector<1x1x4x128xbf16> to vector<4x128xbf16>
    %cst_11 = arith.constant dense<0.000000e+00> : vector<256x128xf32>
    %11 = tpu.matmul %8, %10, %cst_11 {dimension_numbers = #tpu.dot_dimension_numbers<[1], [0], [0], [1], [0, 0, 1, 1], [], []>} : vector<256x4xbf16>, vector<4x128xbf16>, vector<256x128xf32> -> vector<256x128xf32>
    %12 = arith.addf %6, %11 : vector<256x128xf32>
    %13 = vector.extract_strided_slice %1 {offsets = [0, 2, 0], sizes = [16, 16, 4], strides = [1, 1, 1]} : vector<18x18x4xbf16> to vector<16x16x4xbf16>
    %14 = vector.shape_cast %13 : vector<16x16x4xbf16> to vector<256x4xbf16>
    %c0_12 = arith.constant 0 : index
    %c2 = arith.constant 2 : index
    %c0_13 = arith.constant 0 : index
    %c0_14 = arith.constant 0 : index
    %15 = vector.load %arg3[%c0_12, %c2, %c0_13, %c0_14] : memref<3x3x4x128xbf16, #tpu.memory_space<vmem>>, vector<1x1x4x128xbf16>
    %16 = vector.shape_cast %15 : vector<1x1x4x128xbf16> to vector<4x128xbf16>
    %cst_15 = arith.constant dense<0.000000e+00> : vector<256x128xf32>
    %17 = tpu.matmul %14, %16, %cst_15 {dimension_numbers = #tpu.dot_dimension_numbers<[1], [0], [0], [1], [0, 0, 1, 1], [], []>} : vector<256x4xbf16>, vector<4x128xbf16>, vector<256x128xf32> -> vector<256x128xf32>
    %18 = arith.addf %12, %17 : vector<256x128xf32>
    %19 = vector.extract_strided_slice %1 {offsets = [1, 0, 0], sizes = [16, 16, 4], strides = [1, 1, 1]} : vector<18x18x4xbf16> to vector<16x16x4xbf16>
    %20 = vector.shape_cast %19 : vector<16x16x4xbf16> to vector<256x4xbf16>
    %c1_16 = arith.constant 1 : index
    %c0_17 = arith.constant 0 : index
    %c0_18 = arith.constant 0 : index
    %c0_19 = arith.constant 0 : index
    %21 = vector.load %arg3[%c1_16, %c0_17, %c0_18, %c0_19] : memref<3x3x4x128xbf16, #tpu.memory_space<vmem>>, vector<1x1x4x128xbf16>
    %22 = vector.shape_cast %21 : vector<1x1x4x128xbf16> to vector<4x128xbf16>
    %cst_20 = arith.constant dense<0.000000e+00> : vector<256x128xf32>
    %23 = tpu.matmul %20, %22, %cst_20 {dimension_numbers = #tpu.dot_dimension_numbers<[1], [0], [0], [1], [0, 0, 1, 1], [], []>} : vector<256x4xbf16>, vector<4x128xbf16>, vector<256x128xf32> -> vector<256x128xf32>
    %24 = arith.addf %18, %23 : vector<256x128xf32>
    %25 = vector.extract_strided_slice %1 {offsets = [1, 1, 0], sizes = [16, 16, 4], strides = [1, 1, 1]} : vector<18x18x4xbf16> to vector<16x16x4xbf16>
    %26 = vector.shape_cast %25 : vector<16x16x4xbf16> to vector<256x4xbf16>
    %c1_21 = arith.constant 1 : index
    %c1_22 = arith.constant 1 : index
    %c0_23 = arith.constant 0 : index
    %c0_24 = arith.constant 0 : index
    %27 = vector.load %arg3[%c1_21, %c1_22, %c0_23, %c0_24] : memref<3x3x4x128xbf16, #tpu.memory_space<vmem>>, vector<1x1x4x128xbf16>
    %28 = vector.shape_cast %27 : vector<1x1x4x128xbf16> to vector<4x128xbf16>
    %cst_25 = arith.constant dense<0.000000e+00> : vector<256x128xf32>
    %29 = tpu.matmul %26, %28, %cst_25 {dimension_numbers = #tpu.dot_dimension_numbers<[1], [0], [0], [1], [0, 0, 1, 1], [], []>} : vector<256x4xbf16>, vector<4x128xbf16>, vector<256x128xf32> -> vector<256x128xf32>
    %30 = arith.addf %24, %29 : vector<256x128xf32>
    %31 = vector.extract_strided_slice %1 {offsets = [1, 2, 0], sizes = [16, 16, 4], strides = [1, 1, 1]} : vector<18x18x4xbf16> to vector<16x16x4xbf16>
    %32 = vector.shape_cast %31 : vector<16x16x4xbf16> to vector<256x4xbf16>
    %c1_26 = arith.constant 1 : index
    %c2_27 = arith.constant 2 : index
    %c0_28 = arith.constant 0 : index
    %c0_29 = arith.constant 0 : index
    %33 = vector.load %arg3[%c1_26, %c2_27, %c0_28, %c0_29] : memref<3x3x4x128xbf16, #tpu.memory_space<vmem>>, vector<1x1x4x128xbf16>
    %34 = vector.shape_cast %33 : vector<1x1x4x128xbf16> to vector<4x128xbf16>
    %cst_30 = arith.constant dense<0.000000e+00> : vector<256x128xf32>
    %35 = tpu.matmul %32, %34, %cst_30 {dimension_numbers = #tpu.dot_dimension_numbers<[1], [0], [0], [1], [0, 0, 1, 1], [], []>} : vector<256x4xbf16>, vector<4x128xbf16>, vector<256x128xf32> -> vector<256x128xf32>
    %36 = arith.addf %30, %35 : vector<256x128xf32>
    %37 = vector.extract_strided_slice %1 {offsets = [2, 0, 0], sizes = [16, 16, 4], strides = [1, 1, 1]} : vector<18x18x4xbf16> to vector<16x16x4xbf16>
    %38 = vector.shape_cast %37 : vector<16x16x4xbf16> to vector<256x4xbf16>
    %c2_31 = arith.constant 2 : index
    %c0_32 = arith.constant 0 : index
    %c0_33 = arith.constant 0 : index
    %c0_34 = arith.constant 0 : index
    %39 = vector.load %arg3[%c2_31, %c0_32, %c0_33, %c0_34] : memref<3x3x4x128xbf16, #tpu.memory_space<vmem>>, vector<1x1x4x128xbf16>
    %40 = vector.shape_cast %39 : vector<1x1x4x128xbf16> to vector<4x128xbf16>
    %cst_35 = arith.constant dense<0.000000e+00> : vector<256x128xf32>
    %41 = tpu.matmul %38, %40, %cst_35 {dimension_numbers = #tpu.dot_dimension_numbers<[1], [0], [0], [1], [0, 0, 1, 1], [], []>} : vector<256x4xbf16>, vector<4x128xbf16>, vector<256x128xf32> -> vector<256x128xf32>
    %42 = arith.addf %36, %41 : vector<256x128xf32>
    %43 = vector.extract_strided_slice %1 {offsets = [2, 1, 0], sizes = [16, 16, 4], strides = [1, 1, 1]} : vector<18x18x4xbf16> to vector<16x16x4xbf16>
    %44 = vector.shape_cast %43 : vector<16x16x4xbf16> to vector<256x4xbf16>
    %c2_36 = arith.constant 2 : index
    %c1_37 = arith.constant 1 : index
    %c0_38 = arith.constant 0 : index
    %c0_39 = arith.constant 0 : index
    %45 = vector.load %arg3[%c2_36, %c1_37, %c0_38, %c0_39] : memref<3x3x4x128xbf16, #tpu.memory_space<vmem>>, vector<1x1x4x128xbf16>
    %46 = vector.shape_cast %45 : vector<1x1x4x128xbf16> to vector<4x128xbf16>
    %cst_40 = arith.constant dense<0.000000e+00> : vector<256x128xf32>
    %47 = tpu.matmul %44, %46, %cst_40 {dimension_numbers = #tpu.dot_dimension_numbers<[1], [0], [0], [1], [0, 0, 1, 1], [], []>} : vector<256x4xbf16>, vector<4x128xbf16>, vector<256x128xf32> -> vector<256x128xf32>
    %48 = arith.addf %42, %47 : vector<256x128xf32>
    %49 = vector.extract_strided_slice %1 {offsets = [2, 2, 0], sizes = [16, 16, 4], strides = [1, 1, 1]} : vector<18x18x4xbf16> to vector<16x16x4xbf16>
    %50 = vector.shape_cast %49 : vector<16x16x4xbf16> to vector<256x4xbf16>
    %c2_41 = arith.constant 2 : index
    %c2_42 = arith.constant 2 : index
    %c0_43 = arith.constant 0 : index
    %c0_44 = arith.constant 0 : index
    %51 = vector.load %arg3[%c2_41, %c2_42, %c0_43, %c0_44] : memref<3x3x4x128xbf16, #tpu.memory_space<vmem>>, vector<1x1x4x128xbf16>
    %52 = vector.shape_cast %51 : vector<1x1x4x128xbf16> to vector<4x128xbf16>
    %cst_45 = arith.constant dense<0.000000e+00> : vector<256x128xf32>
    %53 = tpu.matmul %50, %52, %cst_45 {dimension_numbers = #tpu.dot_dimension_numbers<[1], [0], [0], [1], [0, 0, 1, 1], [], []>} : vector<256x4xbf16>, vector<4x128xbf16>, vector<256x128xf32> -> vector<256x128xf32>
    %54 = arith.addf %48, %53 : vector<256x128xf32>
    %c0_46 = arith.constant 0 : index
    %c0_47 = arith.constant 0 : index
    %55 = vector.load %arg4[%c0_46, %c0_47] : memref<2x128xf32, #tpu.memory_space<vmem>>, vector<1x128xf32>
    %56 = vector.broadcast %55 : vector<1x128xf32> to vector<256x128xf32>
    %57 = arith.mulf %54, %56 : vector<256x128xf32>
    %c1_48 = arith.constant 1 : index
    %c0_49 = arith.constant 0 : index
    %58 = vector.load %arg4[%c1_48, %c0_49] : memref<2x128xf32, #tpu.memory_space<vmem>>, vector<1x128xf32>
    %59 = vector.broadcast %58 : vector<1x128xf32> to vector<256x128xf32>
    %60 = arith.addf %57, %59 : vector<256x128xf32>
    %cst_50 = arith.constant 0.000000e+00 : f32
    %61 = vector.broadcast %cst_50 : f32 to vector<256x128xf32>
    %62 = arith.maximumf %60, %61 : vector<256x128xf32>
    %63 = vector.shape_cast %62 : vector<256x128xf32> to vector<1x16x16x128xf32>
    %c0_51 = arith.constant 0 : index
    %c0_52 = arith.constant 0 : index
    %c0_53 = arith.constant 0 : index
    %c0_54 = arith.constant 0 : index
    %64 = vector.load %arg5[%c0_51, %c0_52, %c0_53, %c0_54] : memref<1x16x16x128xf32, #tpu.memory_space<vmem>>, vector<1x16x16x128xf32>
    tpu.vector_store %arg5[%c0_51, %c0_52, %c0_53, %c0_54], %63 {strides = array<i32>} : memref<1x16x16x128xf32, #tpu.memory_space<vmem>>, vector<1x16x16x128xf32>,
    return
  }
  func.func @transform_0(%arg0: i32, %arg1: i32) -> (i32, i32, i32, i32, i32) {
    %c0_i32 = arith.constant 0 : i32
    %c0_i32_0 = arith.constant 0 : i32
    %c0_i32_1 = arith.constant 0 : i32
    %c0_i32_2 = arith.constant 0 : i32
    return %arg0, %arg1, %c0_i32, %c0_i32_0, %c0_i32_1 : i32, i32, i32, i32, i32
  }
  func.func @transform_1(%arg0: i32, %arg1: i32) -> (i32, i32, i32, i32) {
    %c0_i32 = arith.constant 0 : i32
    %c0_i32_0 = arith.constant 0 : i32
    %c0_i32_1 = arith.constant 0 : i32
    %c0_i32_2 = arith.constant 0 : i32
    %c0_i32_3 = arith.constant 0 : i32
    return %c0_i32, %c0_i32_0, %c0_i32_1, %c0_i32_2 : i32, i32, i32, i32
  }
  func.func @transform_2(%arg0: i32, %arg1: i32) -> (i32, i32) {
    %c0_i32 = arith.constant 0 : i32
    %c0_i32_0 = arith.constant 0 : i32
    %c0_i32_1 = arith.constant 0 : i32
    return %c0_i32, %c0_i32_0 : i32, i32
  }
  func.func @transform_3(%arg0: i32, %arg1: i32) -> (i32, i32, i32, i32) {
    %c0_i32 = arith.constant 0 : i32
    %c0_i32_0 = arith.constant 0 : i32
    %c0_i32_1 = arith.constant 0 : i32
    return %arg0, %arg1, %c0_i32, %c0_i32_0 : i32, i32, i32, i32
  }
}

</mosaic_0001>

<bundles_post_ra>
// kernel: cnn_block_forward.3
= control target key start
LH: loop header
LB: loop body
LE: loop exit
PB: predicated region body
PF: predicated region fallthrough
CT: control target
= control target key end

     0   :  { %s4215_s12 = smov 0   ;;  %s4217_s13 = smov 0   ;;  %s5327_s0 = inlined_call_operand.vmem [shape: bf16[2,1,18,18,4], index: 0, kind: input, shape index: {}]   ;;  %s5328_s1 = inlined_call_operand.vmem [shape: bf16[3,3,4,128], index: 1, kind: input, shape index: {}]   ;;  %s5329_s2 = inlined_call_operand.vmem [shape: f32[2,128], index: 2, kind: input, shape index: {}]   ;;  %s5330_s3 = inlined_call_operand.vmem [shape: f32[2,16,16,128], index: 3, kind: output, shape index: {}]  }
   0x1   :  { %s4219_s14 = smov 0  }
   0x2 LB: > { %s25_s15 = sadd.s32 1, %s4189_s13  ;;  %p3164_p0 = scmp.ge.s32.totalorder %s4193_s14, 1  ;;  %s4193_s14 = sphi %s4219_s14, %s13_s14   ;;  %s4189_s13 = sphi %s4217_s13, %s5409_s13   ;;  %s4185_s12 = sphi %s4215_s12, %s5408_s12  }
   0x3   : > { %p27_p1 = scmp.ge.s32.totalorder %s25_s15, 2  ;;  %p157_p2 = scmp.lt.s32.totalorder %s4193_s14, 3 }
   0x5   : > { %s5411_s15 = smov (%p27_p1, %s25_s15), 0  ;;  %p158_p3 = pnand %p3164_p0, %p157_p2 }
   0x7   : > { %161 = sbr.rel (%p158_p3) target bundleno = 556 (0x22c), region = 32 }
   0xe   : > { %v3168_v0 = vld [vmem:[%s5328_s1 + $0x2] sm:$0x3]  ;;  %vm752_vm0 = vcmask 1041408   ;;  %v3300_v1 = vld [vmem:[%s5328_s1 + $0x8] sm:$0x3]  ;;  %p190_p4 = scmp.lt.s32.totalorder %s4185_s12, 1 }
   0xf   : > { %4114 = vmatprep.subr.msk.bf16.mxu1 %vm752_vm0, %v3168_v0  ;;  %4118 = vmatprep.subr.msk.bf16.mxu0 %vm752_vm0, %v3300_v1  ;;  %v754_v2 = vsel %vm752_vm0, %v3168_v0, 0  ;;  %v4243_v3 = vsel %vm752_vm0, %v3300_v1, 0  ;;  %v265_v4 = vld [vmem:[%s5328_s1] sm:$0x3]  ;;  %v3319_v5 = vld [vmem:[%s5328_s1 + $0xa] sm:$0x3] }
  0x10   : > { %5362 = vst [vmem:[#allocation2_spill] sm:$0xff] %v4243_v3  ;;  %3551 = vmatpush3.bf16.msra.mxu1 %v754_v2  ;;  %3687 = vmatpush3.bf16.msra.mxu0 %v4243_v3  ;;  %s5413_s12 = smov (!%p190_p4, %s4185_s12), 1  ;;  %vm266_vm1 = vsmask.f32 3328  ;;  %vm267_vm2 = vsmask.f32 7440 }
  0x11   : > { %4115 = vmatprep.subr.msk.bf16.mxu1 %vm752_vm0, %v265_v4  ;;  %4120 = vmatprep.subr.msk.bf16.mxu0 %vm752_vm0, %v3319_v5  ;;  %s4124_s24 = smul.u32 216, %s5413_s12  ;;  %v4263_v6 = vsel %vm752_vm0, %v265_v4, 0  ;;  %v4266_v7 = vsel %vm752_vm0, %v3319_v5, 0  ;;  %v4271_v8 = vld [vmem:[%s5328_s1 + $0xc] sm:$0x3]  ;;  %vm703_vm3 = vcmask 31744   ;;  %vm4307_vm4 = vmor %vm266_vm1, %vm267_vm2 }
  0x12   : > { %v4295_v20 = vsel %vm752_vm0, %v4271_v8, 0  ;;  %vm1225_vm5 = vcmask 1042432   ;;  %vm1226_vm6 = vcmask 1046532   ;;  %s3396_s21 = sshll.u32 %s5413_s12, 8 }
  0x13   : > { %s4260_s27 = scalar_lea.vmem %s5327_s0, %s4124_s24  ;;  %vm4488_vm7 = vmor %vm1225_vm5, %vm1226_vm6  ;;  %s5218_s24 = scalar_lea.vmem %s5330_s3, %s3396_s21 }
  0x14   : > { %v4274_v9 = vld [vmem:[%s4260_s27] sm:$0xf]  ;;  %v4277_v10 = vld [vmem:[%s4260_s27 + $0x4] sm:$0xf]  ;;  %v213_v11 = vld [vmem:[%s4260_s27 + $0x8] sm:$0x1] }
  0x15   : > { %v270_v12 = vshrl.u32 %v4274_v9, 16  ;;  %v273_v13 = vshll.u32 %v4274_v9, 16  ;;  %v279_v14 = vshll.u32 %v4277_v10, 16  ;;  %v283_v15 = vshrl.u32 %v4277_v10, 16  ;;  %v4285_v16 = vld [vmem:[%s4260_s27 + $0xc] sm:$0xf] }
  0x16   : > { %v289_v17 = vshll.u32 %v213_v11, 16  ;;  %v4288_v18 = vld [vmem:[%s4260_s27 + $0x10] sm:$0xf]  ;;  %v4291_v19 = vld [vmem:[%s4260_s27 + $0x14] sm:$0x1]  ;;  %v294_v26 = vshrl.u32 %v4285_v16, 16 }
  0x17   : > { %v272_v21 = vrot.slane %v270_v12, 4  ;;  %v275_v22 = vrot.slane %v273_v13, 5  ;;  %v281_v23 = vrot.slane %v279_v14, 5  ;;  %v285_v24 = vrot.slane %v283_v15, 4  ;;  %v4303_v33 = vld [vmem:[%s4260_s27 + $0x18] sm:$0xf] }
  0x18   : > { %v291_v25 = vrot.slane %v289_v17, 5  ;;  %v297_v27 = vshll.u32 %v4285_v16, 16  ;;  %v303_v28 = vshll.u32 %v4288_v18, 16  ;;  %v307_v31 = vshrl.u32 %v4288_v18, 16  ;;  %v4316_v39 = vld [vmem:[%s4260_s27 + $0x1c] sm:$0xf] }
  0x19   : > { %v276_v29 = vor.u32 %v275_v22, %v272_v21  ;;  %v286_v30 = vor.u32 %v285_v24, %v281_v23  ;;  %v313_v32 = vshll.u32 %v4291_v19, 16  ;;  %v296_v35 = vrot.slane %v294_v26, 4  ;;  %v4320_v46 = vld [vmem:[%s4260_s27 + $0x20] sm:$0x1]  ;;  %v4330_v57 = vld [vmem:[%s4260_s27 + $0x24] sm:$0xf] }
  0x1a   : > { %v299_v36 = vrot.slane %v297_v27, 5  ;;  %v305_v37 = vrot.slane %v303_v28, 5  ;;  %v4313_v38 = vcombine.low %v4285_v16, %v4288_v18  ;;  %v309_v42 = vrot.slane %v307_v31, 4  ;;  %v4335_v62 = vld [vmem:[%s4260_s27 + $0x28] sm:$0xf] }
  0x1b   : > { %v277_v40 = vrot.slane %v276_v29, 4  ;;  %v287_v41 = vrot.slane %v286_v30, 4  ;;  %v315_v43 = vrot.slane %v313_v32, 5  ;;  %v1240_v45 = vrot.slane %v4291_v19, 5  ;;  %v4343_v4 = vld [vmem:[%s4260_s27 + $0x2c] sm:$0x1] }
  0x1c   : > { %v300_v44 = vor.u32 %v299_v36, %v296_v35  ;;  %v318_v47 = vshrl.u32 %v4303_v33, 16  ;;  %v321_v48 = vshll.u32 %v4303_v33, 16  ;;  %v310_v51 = vor.u32 %v309_v42, %v305_v37  ;;  %v4349_v14 = vld [vmem:[%s4260_s27 + $0x30] sm:$0xf]  ;;  %v4361_v28 = vld [vmem:[%s4260_s27 + $0x34] sm:$0xf] }
  0x1d   : > { %v282_v49 = vsel %vm4307_vm4, %v277_v40, %v281_v23  ;;  %v292_v50 = vsel %vm4307_vm4, %v287_v41, %v291_v25  ;;  %v327_v52 = vshll.u32 %v4316_v39, 16  ;;  %v331_v60 = vshrl.u32 %v4316_v39, 16  ;;  %v4356_v23 = vld [vmem:[%s5328_s1 + $0x4] sm:$0x3]  ;;  %v4368_v32 = vld [vmem:[%s4260_s27 + $0x38] sm:$0x1] }
  0x1e   : > { %v3169_v53 = vcombine.low %v282_v49, %v292_v50  ;;  %v301_v54 = vrot.slane %v300_v44, 4  ;;  %v320_v55 = vrot.slane %v318_v47, 4  ;;  %v323_v56 = vrot.slane %v321_v48, 5  ;;  %v4376_v48 = vld [vmem:[%s4260_s27 + $0x3c] sm:$0xf] }
  0x1f   : > { %v311_v58 = vrot.slane %v310_v51, 4  ;;  %v329_v59 = vrot.slane %v327_v52, 5  ;;  %v337_v61 = vshll.u32 %v4320_v46, 16  ;;  %v1244_v1 = vrot.slane %v4316_v39, 5  ;;  %v4384_v52 = vld [vmem:[%s4260_s27 + $0x40] sm:$0xf] }
  0x20   : > { %3552 = vmatprep.mubr.msk.bf16.mxu1 %vm703_vm3, %v3169_v53  ;;  %v306_v63 = vsel %vm4307_vm4, %v301_v54, %v305_v37  ;;  %v324_v0 = vor.u32 %v323_v56, %v320_v55  ;;  %v1247_v2 = vrot.slane %v4320_v46, 5  ;;  %v333_v11 = vrot.slane %v331_v60, 4 }
  0x21   : > { %v316_v5 = vsel %vm4307_vm4, %v311_v58, %v315_v43  ;;  %v339_v12 = vrot.slane %v337_v61, 5  ;;  %v342_v13 = vshrl.u32 %v4330_v57, 16  ;;  %v345_v21 = vshll.u32 %v4330_v57, 16 }
  0x22   : > { %v3170_v15 = vcombine.low %v306_v63, %v316_v5  ;;  %v325_v17 = vrot.slane %v324_v0, 4  ;;  %v351_v22 = vshll.u32 %v4335_v62, 16  ;;  %v334_v24 = vor.u32 %v333_v11, %v329_v59  ;;  %v4396_v5 = vld [vmem:[%s4260_s27 + $0x44] sm:$0x1] }
  0x23   : > { %v344_v25 = vrot.slane %v342_v13, 4  ;;  %v355_v26 = vshrl.u32 %v4335_v62, 16  ;;  %v361_v27 = vshll.u32 %v4343_v4, 16  ;;  %v347_v30 = vrot.slane %v345_v21, 5  ;;  %v4401_v13 = vld [vmem:[%s4260_s27 + $0x48] sm:$0xf] }
  0x24   : > { %3688 = vmatprep.mubr.msk.bf16.mxu0 %vm703_vm3, %v3170_v15  ;;  %3553 = vmatmul.mubr.msk.bf16.vlgmr.msra.gmra.mrb[0].mxu1 %vm703_vm3, %v3170_v15  ;;  %v330_v29 = vsel %vm4307_vm4, %v325_v17, %v329_v59  ;;  %v353_v31 = vrot.slane %v351_v22, 5  ;;  %v366_v35 = vshrl.u32 %v4349_v14, 16  ;;  %v335_v36 = vrot.slane %v334_v24, 4  ;;  %v4408_v24 = vld [vmem:[%s4260_s27 + $0x4c] sm:$0xf] }
  0x25   : > { %3585 = vmatpush3.bf16.msra.mxu1 %v4263_v6  ;;  %v357_v37 = vrot.slane %v355_v26, 4  ;;  %v363_v40 = vrot.slane %v361_v27, 5  ;;  %v369_v41 = vshll.u32 %v4349_v14, 16  ;;  %v348_v42 = vor.u32 %v347_v30, %v344_v25 }
  0x26   : > { %v368_v43 = vrot.slane %v366_v35, 4  ;;  %v375_v44 = vshll.u32 %v4361_v28, 16  ;;  %v379_v47 = vshrl.u32 %v4361_v28, 16  ;;  %4116 = vmatprep.subr.msk.bf16.mxu1 %vm752_vm0, %v4356_v23  ;;  %v340_v49 = vsel %vm4307_vm4, %v335_v36, %v339_v12 }
  0x27   : > { %v358_v6 = vor.u32 %v357_v37, %v353_v31  ;;  %v371_v50 = vrot.slane %v369_v41, 5  ;;  %v385_v51 = vshll.u32 %v4368_v32, 16  ;;  %v4386_v53 = vcombine.low %v330_v29, %v340_v49 }
  0x28   : > { %v349_v54 = vrot.slane %v348_v42, 4  ;;  %v377_v55 = vrot.slane %v375_v44, 5  ;;  %v381_v56 = vrot.slane %v379_v47, 4  ;;  %v390_v61 = vshrl.u32 %v4376_v48, 16  ;;  %v4430_v42 = vld [vmem:[%s4260_s27 + $0x54] sm:$0xf] }
  0x29   : > { %5365 = vst [vmem:[#allocation3_spill] sm:$0xff] %v4386_v53  ;;  %v359_v58 = vrot.slane %v358_v6, 4  ;;  %v372_v59 = vor.u32 %v371_v50, %v368_v43  ;;  %v387_v60 = vrot.slane %v385_v51, 5  ;;  %3689 = vmatmul.mubr.msk.bf16.vlgmr.msra.gmra.mrb[0].mxu0 %vm703_vm3, %v4386_v53  ;;  %3556 = vmatprep.mubr.msk.bf16.mxu1 %vm703_vm3, %v4386_v53  ;;  %v393_v11 = vshll.u32 %v4376_v48, 16  ;;  %5367 = vst [vmem:[#allocation5_spill] sm:$0xff] %v4430_v42 }
  0x2a   : > { %v354_v63 = vsel %vm4307_vm4, %v349_v54, %v353_v31  ;;  %v382_v0 = vor.u32 %v381_v56, %v377_v55  ;;  %v399_v12 = vshll.u32 %v4384_v52, 16  ;;  %3721 = vmatpush3.bf16.msra.mxu0 %v4266_v7  ;;  %v392_v21 = vrot.slane %v390_v61, 4  ;;  %v4435_v6 = vld [vmem:[%s4260_s27 + $0x58] sm:$0xf] }
  0x2b   : > { %v364_v15 = vsel %vm4307_vm4, %v359_v58, %v363_v40  ;;  %v373_v17 = vrot.slane %v372_v59, 4  ;;  %v403_v22 = vshrl.u32 %v4384_v52, 16  ;;  %v395_v27 = vrot.slane %v393_v11, 5  ;;  %4121 = vmatprep.subr.msk.bf16.mxu0 %vm752_vm0, %v4271_v8  ;;  %v4425_v8 = vld [vmem:[%s4260_s27 + $0x50] sm:$0x1] }
  0x2c   : > { %v4410_v25 = vcombine.low %v354_v63, %v364_v15  ;;  %v383_v26 = vrot.slane %v382_v0, 4  ;;  %v401_v29 = vrot.slane %v399_v12, 5  ;;  %v409_v31 = vshll.u32 %v4396_v5, 16  ;;  %v4448_v11 = vld [vmem:[%s4260_s27 + $0x5c] sm:$0x1] }
  0x2d   : > { %v378_v7 = vsel %vm4307_vm4, %v373_v17, %v377_v55  ;;  %v405_v30 = vrot.slane %v403_v22, 4  ;;  %v414_v35 = vshrl.u32 %v4401_v13, 16  ;;  %v396_v37 = vor.u32 %v395_v27, %v392_v21  ;;  %v4452_v15 = vld [vmem:[%s4260_s27 + $0x60] sm:$0xf]  ;;  %v4457_v27 = vld [vmem:[%s4260_s27 + $0x64] sm:$0xf] }
  0x2e   : > { %5366 = vst [vmem:[#allocation4_spill] sm:$0xff] %v4410_v25  ;;  %3692 = vmatprep.mubr.msk.bf16.mxu0 %vm703_vm3, %v4410_v25  ;;  %3557 = vmatmul.mubr.msk.bf16.gmra.mrb[4].mxu1 %vm703_vm3, %v4410_v25  ;;  %v388_v36 = vsel %vm4307_vm4, %v383_v26, %v387_v60  ;;  %v417_v40 = vshll.u32 %v4401_v13, 16  ;;  %v423_v41 = vshll.u32 %v4408_v24, 16  ;;  %v411_v47 = vrot.slane %v409_v31, 5  ;;  %v4669_v25 = vld [vmem:[%s4260_s27 + $0xa8] sm:$0xf] }
  0x2f   : > { %v4432_v43 = vcombine.low %v378_v7, %v388_v36  ;;  %v406_v44 = vor.u32 %v405_v30, %v401_v29  ;;  %v416_v49 = vrot.slane %v414_v35, 4  ;;  %v397_v50 = vrot.slane %v396_v37, 4 }
  0x30   : > { %v419_v51 = vrot.slane %v417_v40, 5  ;;  %v425_v54 = vrot.slane %v423_v41, 5  ;;  %v427_v55 = vshrl.u32 %v4408_v24, 16  ;;  %v433_v58 = vshll.u32 %v4425_v8, 16 }
  0x31   : > { %5368 = vst [vmem:[#allocation6_spill] sm:$0xff] %v4432_v43  ;;  %3560 = vmatprep.mubr.msk.bf16.mxu1 %vm703_vm3, %v4432_v43  ;;  %v407_v56 = vrot.slane %v406_v44, 4  ;;  %v438_v59 = vshrl.u32 %v4430_v42, 16  ;;  %v441_v60 = vshll.u32 %v4430_v42, 16  ;;  %3693 = vmatmul.mubr.msk.bf16.gmra.mrb[4].mxu0 %vm703_vm3, %v4432_v43  ;;  %v402_v61 = vsel %vm4307_vm4, %v397_v50, %v401_v29 }
  0x32   : > { %v420_v63 = vor.u32 %v419_v51, %v416_v49  ;;  %v429_v0 = vrot.slane %v427_v55, 4  ;;  %v447_v12 = vshll.u32 %v4435_v6, 16  ;;  %v435_v21 = vrot.slane %v433_v58, 5 }
  0x33   : > { %v412_v17 = vsel %vm4307_vm4, %v407_v56, %v411_v47  ;;  %v440_v22 = vrot.slane %v438_v59, 4  ;;  %v443_v26 = vrot.slane %v441_v60, 5  ;;  %v451_v36 = vshrl.u32 %v4435_v6, 16  ;;  %v4471_v47 = vld [vmem:[%s4260_s27 + $0x68] sm:$0x1] }
  0x34   : > { %v4459_v7 = vcombine.low %v402_v61, %v412_v17  ;;  %v421_v29 = vrot.slane %v420_v63, 4  ;;  %v430_v30 = vor.u32 %v429_v0, %v425_v54  ;;  %v449_v31 = vrot.slane %v447_v12, 5 }
  0x35   : > { %v444_v35 = vor.u32 %v443_v26, %v440_v22  ;;  %v457_v37 = vshll.u32 %v4448_v11, 16  ;;  %v462_v40 = vshrl.u32 %v4452_v15, 16  ;;  %v465_v49 = vshll.u32 %v4452_v15, 16 }
  0x36   : > { %5369 = vst [vmem:[#allocation7_spill] sm:$0xff] %v4459_v7  ;;  %3696 = vmatprep.mubr.msk.bf16.mxu0 %vm703_vm3, %v4459_v7  ;;  %3561 = vmatmul.mubr.msk.bf16.gmra.mrb[8].mxu1 %vm703_vm3, %v4459_v7  ;;  %v426_v41 = vsel %vm4307_vm4, %v421_v29, %v425_v54  ;;  %v431_v44 = vrot.slane %v430_v30, 4  ;;  %v471_v50 = vshll.u32 %v4457_v27, 16  ;;  %v453_v55 = vrot.slane %v451_v36, 4  ;;  %v4479_v54 = vld [vmem:[%s4260_s27 + $0x6c] sm:$0xf] }
  0x37   : > { %v445_v51 = vrot.slane %v444_v35, 4  ;;  %v459_v56 = vrot.slane %v457_v37, 5  ;;  %v464_v58 = vrot.slane %v462_v40, 4  ;;  %v467_v60 = vrot.slane %v465_v49, 5  ;;  %v4495_v36 = vld [vmem:[%s4260_s27 + $0x70] sm:$0xf] }
  0x38   : > { %v436_v59 = vsel %vm4307_vm4, %v431_v44, %v435_v21  ;;  %v473_v61 = vrot.slane %v471_v50, 5  ;;  %v475_v63 = vshrl.u32 %v4457_v27, 16  ;;  %v454_v17 = vor.u32 %v453_v55, %v449_v31  ;;  %v4646_v7 = vld [vmem:[%s4260_s27 + $0xa0] sm:$0xf] }
  0x39   : > { %v4481_v0 = vcombine.low %v426_v41, %v436_v59  ;;  %v450_v12 = vsel %vm4307_vm4, %v445_v51, %v449_v31  ;;  %v481_v22 = vshll.u32 %v4471_v47, 16  ;;  %v468_v21 = vor.u32 %v467_v60, %v464_v58  ;;  %v4508_v51 = vld [vmem:[%s4260_s27 + $0x74] sm:$0x1] }
  0x3a   : > { %v477_v29 = vrot.slane %v475_v63, 4  ;;  %v3234_v30 = vrot.slane %v4285_v16, 9  ;;  %v1237_v35 = vrot.slane %v4288_v18, 5  ;;  %v455_v31 = vrot.slane %v454_v17, 4 }
  0x3b   : > { %5370 = vst [vmem:[#allocation8_spill] sm:$0xff] %v4481_v0  ;;  %3697 = vmatmul.mubr.msk.bf16.gmra.mrb[8].mxu0 %vm703_vm3, %v4481_v0  ;;  %3564 = vmatprep.mubr.msk.bf16.mxu1 %vm703_vm3, %v4481_v0  ;;  %v483_v37 = vrot.slane %v481_v22, 5  ;;  %v486_v40 = vshrl.u32 %v4479_v54, 16  ;;  %v489_v41 = vshll.u32 %v4479_v54, 16  ;;  %v469_v44 = vrot.slane %v468_v21, 4 }
  0x3c   : > { %v478_v49 = vor.u32 %v477_v29, %v473_v61  ;;  %v1238_v16 = vsel %vm4488_vm7, %v3234_v30, %v1237_v35  ;;  %v1239_v18 = vrot.slane %v1237_v35, 4  ;;  %v460_v50 = vsel %vm4307_vm4, %v455_v31, %v459_v56  ;;  %v4520_v56 = vld [vmem:[%s4260_s27 + $0x78] sm:$0xf]  ;;  %v4536_v31 = vld [vmem:[%s4260_s27 + $0x7c] sm:$0xf] }
  0x3d   : > { %v488_v55 = vrot.slane %v486_v40, 4  ;;  %v491_v58 = vrot.slane %v489_v41, 5  ;;  %v495_v59 = vshll.u32 %v4495_v36, 16  ;;  %v4511_v60 = vcombine.low %v450_v12, %v460_v50 }
  0x3e   : > { %v474_v63 = vsel %vm4307_vm4, %v469_v44, %v473_v61  ;;  %v479_v17 = vrot.slane %v478_v49, 4  ;;  %v1241_v22 = vsel %vm4488_vm7, %v1239_v18, %v1240_v45  ;;  %v499_v35 = vshrl.u32 %v4495_v36, 16  ;;  %v4541_v49 = vld [vmem:[%s4260_s27 + $0x80] sm:$0x1] }
  0x3f   : > { %5373 = vst [vmem:[#allocation9_spill] sm:$0xff] %v4511_v60  ;;  %v4522_v21 = vcombine.low %v1238_v16, %v1241_v22  ;;  %v492_v29 = vor.u32 %v491_v58, %v488_v55  ;;  %v497_v30 = vrot.slane %v495_v59, 5  ;;  %3700 = vmatprep.mubr.msk.bf16.mxu0 %vm703_vm3, %v4511_v60  ;;  %3565 = vmatmul.mubr.msk.bf16.gmra.mrb[12].mxu1 %vm703_vm3, %v4511_v60  ;;  %v505_v45 = vshll.u32 %v4508_v51, 16  ;;  %v4639_v60 = vld [vmem:[%s4260_s27 + $0x9c] sm:$0xf] }
  0x40   : > { %v484_v19 = vsel %vm4307_vm4, %v479_v17, %v483_v37  ;;  %v3235_v61 = vrot.slane %v4303_v33, 9  ;;  %v1246_v12 = vrot.slane %v1244_v1, 4  ;;  %v501_v44 = vrot.slane %v499_v35, 4 }
  0x41   : > { %5374 = vst [vmem:[#allocation10_spill] sm:$0xff] %v4522_v21  ;;  %v4538_v40 = vcombine.low %v474_v63, %v484_v19  ;;  %v493_v41 = vrot.slane %v492_v29, 4  ;;  %v510_v16 = vshrl.u32 %v4520_v56, 16  ;;  %v507_v18 = vrot.slane %v505_v45, 5  ;;  %v4567_v29 = vld [vmem:[%s4260_s27 + $0x84] sm:$0xf] }
  0x42   : > { %v1245_v37 = vsel %vm4488_vm7, %v3235_v61, %v1244_v1  ;;  %v1248_v50 = vsel %vm4488_vm7, %v1246_v12, %v1247_v2  ;;  %v513_v55 = vshll.u32 %v4520_v56, 16  ;;  %v502_v59 = vor.u32 %v501_v44, %v497_v30 }
  0x43   : > { %5375 = vst [vmem:[#allocation11_spill] sm:$0xff] %v4538_v40  ;;  %3701 = vmatmul.mubr.msk.bf16.gmra.mrb[12].mxu0 %vm703_vm3, %v4538_v40  ;;  %3568 = vmatprep.mubr.msk.bf16.mxu1 %vm703_vm3, %v4538_v40  ;;  %v498_v58 = vsel %vm4307_vm4, %v493_v41, %v497_v30  ;;  %v4559_v63 = vcombine.low %v1245_v37, %v1248_v50  ;;  %v512_v1 = vrot.slane %v510_v16, 4  ;;  %v519_v2 = vshll.u32 %v4536_v31, 16  ;;  %v4573_v16 = vld [vmem:[%s4260_s27 + $0x88] sm:$0xf] }
  0x44   : > { %3722 = vmatprep.mubr.msk.bf16.mxu0 %vm703_vm3, %v4522_v21  ;;  %v515_v46 = vrot.slane %v513_v55, 5  ;;  %v523_v17 = vshrl.u32 %v4536_v31, 16  ;;  %v529_v22 = vshll.u32 %v4541_v49, 16  ;;  %v503_v35 = vrot.slane %v502_v59, 4 }
  0x45   : > { %5376 = vst [vmem:[#allocation12_spill] sm:$0xff] %v4559_v63  ;;  %v3236_v30 = vrot.slane %v4330_v57, 9  ;;  %v1251_v19 = vrot.slane %v4335_v62, 5  ;;  %v1254_v45 = vrot.slane %v4343_v4, 5  ;;  %v521_v12 = vrot.slane %v519_v2, 5 }
  0x46   : > { %v516_v61 = vor.u32 %v515_v46, %v512_v1  ;;  %v525_v41 = vrot.slane %v523_v17, 4  ;;  %v531_v44 = vrot.slane %v529_v22, 5  ;;  %v508_v37 = vsel %vm4307_vm4, %v503_v35, %v507_v18  ;;  %v4583_v1 = vld [vmem:[%s4260_s27 + $0x8c] sm:$0x1] }
  0x47   : > { %v1252_v50 = vsel %vm4488_vm7, %v3236_v30, %v1251_v19  ;;  %v1253_v55 = vrot.slane %v1251_v19, 4  ;;  %v534_v59 = vshrl.u32 %v4567_v29, 16  ;;  %v4580_v3 = vcombine.low %v498_v58, %v508_v37 }
  0x48   : > { %v517_v40 = vrot.slane %v516_v61, 4  ;;  %v526_v4 = vor.u32 %v525_v41, %v521_v12  ;;  %v537_v46 = vshll.u32 %v4567_v29, 16  ;;  %v543_v18 = vshll.u32 %v4573_v16, 16  ;;  %v4597_v61 = vld [vmem:[%s4260_s27 + $0x90] sm:$0xf] }
  0x49   : > { %5377 = vst [vmem:[#allocation13_spill] sm:$0xff] %v4580_v3  ;;  %v1255_v2 = vsel %vm4488_vm7, %v1253_v55, %v1254_v45  ;;  %v536_v17 = vrot.slane %v534_v59, 4  ;;  %v547_v22 = vshrl.u32 %v4573_v16, 16  ;;  %3569 = vmatmul.mubr.msk.bf16.gmra.mrb[16].mxu1 %vm703_vm3, %v4580_v3  ;;  %v4602_v45 = vld [vmem:[%s5328_s1 + $0xe] sm:$0x3]  ;;  %v1258_v59 = vrot.slane %v4361_v28, 5 }
  0x4a   : > { %v522_v58 = vsel %vm4307_vm4, %v517_v40, %v521_v12  ;;  %v527_v35 = vrot.slane %v526_v4, 4  ;;  %v4594_v30 = vcombine.low %v1252_v50, %v1255_v2  ;;  %v539_v19 = vrot.slane %v537_v46, 5  ;;  %5379 = vst [vmem:[#allocation15_spill] sm:$0xff] %v4602_v45  ;;  %v4616_v46 = vld [vmem:[%s4260_s27 + $0x94] sm:$0xf] }
  0x4b   : > { %3723 = vmatmul.mubr.msk.bf16.vlgmr.msra.gmra.mrb[0].mxu0 %vm703_vm3, %v4559_v63  ;;  %v545_v41 = vrot.slane %v543_v18, 5  ;;  %v549_v37 = vrot.slane %v547_v22, 4  ;;  %v553_v40 = vshll.u32 %v4583_v1, 16  ;;  %v3237_v12 = vrot.slane %v4349_v14, 9  ;;  %v4621_v3 = vld [vmem:[%s4260_s27 + $0x98] sm:$0x1] }
  0x4c   : > { %5378 = vst [vmem:[#allocation14_spill] sm:$0xff] %v4594_v30  ;;  %3755 = vmatpush3.bf16.msra.mxu0 %v4295_v20  ;;  %v532_v50 = vsel %vm4307_vm4, %v527_v35, %v531_v44  ;;  %3726 = vmatprep.mubr.msk.bf16.mxu0 %vm703_vm3, %v4594_v30  ;;  %v540_v55 = vor.u32 %v539_v19, %v536_v17  ;;  %v1261_v4 = vrot.slane %v4368_v32, 5  ;;  %v558_v20 = vshrl.u32 %v4597_v61, 16 }
  0x4d   : > { %v4618_v2 = vcombine.low %v522_v58, %v532_v50  ;;  %v550_v18 = vor.u32 %v549_v37, %v545_v41  ;;  %v555_v22 = vrot.slane %v553_v40, 5  ;;  %4122 = vmatprep.subr.msk.bf16.mxu0 %vm752_vm0, %v4602_v45  ;;  %v1259_v17 = vsel %vm4488_vm7, %v3237_v12, %v1258_v59 }
  0x4e   : > { %v541_v44 = vrot.slane %v540_v55, 4  ;;  %v1260_v35 = vrot.slane %v1258_v59, 4  ;;  %v561_v32 = vshll.u32 %v4597_v61, 16  ;;  %v560_v19 = vrot.slane %v558_v20, 4 }
  0x4f   : > { %5380 = vst [vmem:[#allocation16_spill] sm:$0xff] %v4618_v2  ;;  %3572 = vmatprep.mubr.msk.bf16.mxu1 %vm703_vm3, %v4618_v2  ;;  %v551_v58 = vrot.slane %v550_v18, 4  ;;  %v567_v37 = vshll.u32 %v4616_v46, 16  ;;  %v571_v40 = vshrl.u32 %v4616_v46, 16  ;;  %v577_v59 = vshll.u32 %v4621_v3, 16 }
  0x50   : > { %v546_v50 = vsel %vm4307_vm4, %v541_v44, %v545_v41  ;;  %v1262_v55 = vsel %vm4488_vm7, %v1260_v35, %v1261_v4  ;;  %v563_v12 = vrot.slane %v561_v32, 5  ;;  %v3238_v4 = vrot.slane %v4376_v48, 9 }
  0x51   : > { %v556_v2 = vsel %vm4307_vm4, %v551_v58, %v555_v22  ;;  %v4643_v18 = vcombine.low %v1259_v17, %v1262_v55  ;;  %v569_v20 = vrot.slane %v567_v37, 5  ;;  %v573_v0 = vrot.slane %v571_v40, 4  ;;  %v4659_v58 = vld [vmem:[%s4260_s27 + $0xa4] sm:$0x1] }
  0x52   : > { %v4648_v43 = vcombine.low %v546_v50, %v556_v2  ;;  %v564_v41 = vor.u32 %v563_v12, %v560_v19  ;;  %v579_v44 = vrot.slane %v577_v59, 5  ;;  %v1265_v32 = vrot.slane %v4384_v52, 5 }
  0x53   : > { %5381 = vst [vmem:[#allocation17_spill] sm:$0xff] %v4643_v18  ;;  %3727 = vmatmul.mubr.msk.bf16.gmra.mrb[4].mxu0 %vm703_vm3, %v4643_v18  ;;  %v574_v35 = vor.u32 %v573_v0, %v569_v20  ;;  %v1268_v22 = vrot.slane %v4396_v5, 5  ;;  %v582_v17 = vshrl.u32 %v4639_v60, 16  ;;  %v585_v19 = vshll.u32 %v4639_v60, 16 }
  0x54   : > { %5382 = vst [vmem:[#allocation18_spill] sm:$0xff] %v4648_v43  ;;  %3573 = vmatmul.mubr.msk.bf16.gmra.mrb[20].mxu1 %vm703_vm3, %v4648_v43  ;;  %v565_v2 = vrot.slane %v564_v41, 4  ;;  %v591_v37 = vshll.u32 %v4646_v7, 16  ;;  %v595_v0 = vshrl.u32 %v4646_v7, 16  ;;  %v1266_v5 = vsel %vm4488_vm7, %v3238_v4, %v1265_v32 }
  0x55   : > { %v575_v40 = vrot.slane %v574_v35, 4  ;;  %v1267_v50 = vrot.slane %v1265_v32, 4  ;;  %v584_v55 = vrot.slane %v582_v17, 4  ;;  %v587_v59 = vrot.slane %v585_v19, 5  ;;  %v4678_v32 = vld [vmem:[%s4260_s27 + $0xac] sm:$0xf] }
  0x56   : > { %v570_v12 = vsel %vm4307_vm4, %v565_v2, %v569_v20  ;;  %v593_v41 = vrot.slane %v591_v37, 5  ;;  %v597_v43 = vrot.slane %v595_v0, 4  ;;  %v601_v35 = vshll.u32 %v4659_v58, 16 }
  0x57   : > { %v580_v53 = vsel %vm4307_vm4, %v575_v40, %v579_v44  ;;  %v1269_v18 = vsel %vm4488_vm7, %v1267_v50, %v1268_v22  ;;  %v3239_v4 = vrot.slane %v4401_v13, 9  ;;  %v588_v2 = vor.u32 %v587_v59, %v584_v55 }
  0x58   : > { %v4680_v17 = vcombine.low %v570_v12, %v580_v53  ;;  %v4682_v20 = vcombine.low %v1266_v5, %v1269_v18  ;;  %v598_v19 = vor.u32 %v597_v43, %v593_v41  ;;  %v603_v37 = vrot.slane %v601_v35, 5  ;;  %v4692_v18 = vld [vmem:[%s4260_s27 + $0xb0] sm:$0x1] }
  0x59   : > { %v1272_v0 = vrot.slane %v4408_v24, 5  ;;  %v1275_v44 = vrot.slane %v4425_v8, 5  ;;  %v606_v22 = vshrl.u32 %v4669_v25, 16  ;;  %v589_v53 = vrot.slane %v588_v2, 4 }
  0x5a   : > { %5383 = vst [vmem:[#allocation19_spill] sm:$0xff] %v4680_v17  ;;  %5384 = vst [vmem:[#allocation20_spill] sm:$0xff] %v4682_v20  ;;  %3576 = vmatprep.mubr.msk.bf16.mxu1 %vm703_vm3, %v4680_v17  ;;  %3730 = vmatprep.mubr.msk.bf16.mxu0 %vm703_vm3, %v4682_v20  ;;  %v599_v40 = vrot.slane %v598_v19, 4  ;;  %v609_v43 = vshll.u32 %v4669_v25, 16  ;;  %v615_v5 = vshll.u32 %v4678_v32, 16  ;;  %v619_v12 = vshrl.u32 %v4678_v32, 16 }
  0x5b   : > { %v1273_v8 = vsel %vm4488_vm7, %v3239_v4, %v1272_v0  ;;  %v1274_v50 = vrot.slane %v1272_v0, 4  ;;  %v608_v55 = vrot.slane %v606_v22, 4  ;;  %v594_v59 = vsel %vm4307_vm4, %v589_v53, %v593_v41  ;;  %v4704_v17 = vld [vmem:[%s4260_s27 + $0xb4] sm:$0xf]  ;;  %v4716_v53 = vld [vmem:[%s4260_s27 + $0xb8] sm:$0xf] }
  0x5c   : > { %v604_v35 = vsel %vm4307_vm4, %v599_v40, %v603_v37  ;;  %v611_v2 = vrot.slane %v609_v43, 5  ;;  %v617_v19 = vrot.slane %v615_v5, 5  ;;  %v621_v0 = vrot.slane %v619_v12, 4 }
  0x5d   : > { %v4706_v20 = vcombine.low %v594_v59, %v604_v35  ;;  %v1276_v4 = vsel %vm4488_vm7, %v1274_v50, %v1275_v44  ;;  %v625_v22 = vshll.u32 %v4692_v18, 16  ;;  %v3240_v41 = vrot.slane %v4430_v42, 9  ;;  %v4722_v44 = vld [vmem:[%s4260_s27 + $0xbc] sm:$0x1] }
  0x5e   : > { %v4711_v30 = vcombine.low %v1273_v8, %v1276_v4  ;;  %v612_v63 = vor.u32 %v611_v2, %v608_v55  ;;  %v1279_v37 = vrot.slane %v4435_v6, 5  ;;  %v622_v40 = vor.u32 %v621_v0, %v617_v19 }
  0x5f   : > { %5385 = vst [vmem:[#allocation21_spill] sm:$0xff] %v4706_v20  ;;  %3577 = vmatmul.mubr.msk.bf16.gmra.mrb[24].mxu1 %vm703_vm3, %v4706_v20  ;;  %v627_v43 = vrot.slane %v625_v22, 5  ;;  %v1282_v5 = vrot.slane %v4448_v11, 5  ;;  %v630_v50 = vshrl.u32 %v4704_v17, 16  ;;  %v633_v59 = vshll.u32 %v4704_v17, 16 }
  0x60   : > { %5386 = vst [vmem:[#allocation22_spill] sm:$0xff] %v4711_v30  ;;  %3731 = vmatmul.mubr.msk.bf16.gmra.mrb[8].mxu0 %vm703_vm3, %v4711_v30  ;;  %v613_v8 = vrot.slane %v612_v63, 4  ;;  %v1280_v55 = vsel %vm4488_vm7, %v3240_v41, %v1279_v37  ;;  %v1281_v12 = vrot.slane %v1279_v37, 4  ;;  %v623_v35 = vrot.slane %v622_v40, 4 }
  0x61   : > { %v632_v2 = vrot.slane %v630_v50, 4  ;;  %v639_v4 = vshll.u32 %v4716_v53, 16  ;;  %v643_v11 = vshrl.u32 %v4716_v53, 16  ;;  %v635_v20 = vrot.slane %v633_v59, 5 }
  0x62   : > { %v618_v0 = vsel %vm4307_vm4, %v613_v8, %v617_v19  ;;  %v1283_v22 = vsel %vm4488_vm7, %v1281_v12, %v1282_v5  ;;  %v649_v63 = vshll.u32 %v4722_v44, 16  ;;  %v628_v41 = vsel %vm4307_vm4, %v623_v35, %v627_v43 }
  0x63   : > { %v4739_v37 = vcombine.low %v1280_v55, %v1283_v22  ;;  %v641_v40 = vrot.slane %v639_v4, 5  ;;  %v645_v50 = vrot.slane %v643_v11, 4  ;;  %v4741_v30 = vcombine.low %v618_v0, %v628_v41 }
  0x64   : > { %v636_v21 = vor.u32 %v635_v20, %v632_v2  ;;  %v651_v45 = vrot.slane %v649_v63, 5  ;;  %v3241_v42 = vrot.slane %v4452_v15, 9  ;;  %v1286_v5 = vrot.slane %v4457_v27, 5 }
  0x65   : > { %3734 = vmatprep.mubr.msk.bf16.mxu0 %vm703_vm3, %v4739_v37  ;;  %v646_v19 = vor.u32 %v645_v50, %v641_v40  ;;  %v1289_v8 = vrot.slane %v4471_v47, 5  ;;  %v3242_v43 = vrot.slane %v4479_v54, 9  ;;  %3580 = vmatprep.mubr.msk.bf16.mxu1 %vm703_vm3, %v4741_v30  ;;  %v3201_v20 = vcombine.low %v4274_v9, %v4277_v10 }
  0x66   : > { %v637_v55 = vrot.slane %v636_v21, 4  ;;  %v1293_v12 = vrot.slane %v4495_v36, 5  ;;  %v1296_v59 = vrot.slane %v4508_v51, 5  ;;  %v1287_v2 = vsel %vm4488_vm7, %v3241_v42, %v1286_v5 }
  0x67   : > { %v647_v35 = vrot.slane %v646_v19, 4  ;;  %v1288_v4 = vrot.slane %v1286_v5, 4  ;;  %v1300_v47 = vrot.slane %v4536_v31, 5  ;;  %v3243_v9 = vrot.slane %v4520_v56, 9 }
  0x68   : > { %v642_v11 = vsel %vm4307_vm4, %v637_v55, %v641_v40  ;;  %v1294_v21 = vsel %vm4488_vm7, %v3242_v43, %v1293_v12  ;;  %v1295_v0 = vrot.slane %v1293_v12, 4  ;;  %v1303_v42 = vrot.slane %v4541_v49, 5 }
  0x69   : > { %v652_v10 = vsel %vm4307_vm4, %v647_v35, %v651_v45  ;;  %v1290_v51 = vsel %vm4488_vm7, %v1288_v4, %v1289_v8  ;;  %v1302_v22 = vrot.slane %v1300_v47, 4  ;;  %v3244_v19 = vrot.slane %v4567_v29, 9 }
  0x6a   : > { %v4768_v63 = vcombine.low %v642_v11, %v652_v10  ;;  %v4770_v41 = vcombine.low %v1287_v2, %v1290_v51  ;;  %v1297_v40 = vsel %vm4488_vm7, %v1295_v0, %v1296_v59  ;;  %v1307_v5 = vrot.slane %v4573_v16, 5 }
  0x6b   : > { %v4774_v50 = vcombine.low %v1294_v21, %v1297_v40  ;;  %v1310_v49 = vrot.slane %v4583_v1, 5  ;;  %v1301_v45 = vsel %vm4488_vm7, %v3243_v9, %v1300_v47  ;;  %v1304_v8 = vsel %vm4488_vm7, %v1302_v22, %v1303_v42 }
  0x6c   : > { %3581 = vmatmul.mubr.msk.bf16.gmra.mrb[28].mxu1 %vm703_vm3, %v4768_v63  ;;  %3735 = vmatmul.mubr.msk.bf16.gmra.mrb[12].mxu0 %vm703_vm3, %v4770_v41  ;;  %v1309_v43 = vrot.slane %v1307_v5, 4  ;;  %v1314_v55 = vrot.slane %v4616_v46, 5  ;;  %v1321_v12 = vrot.slane %v4646_v7, 5  ;;  %v1308_v59 = vsel %vm4488_vm7, %v3244_v19, %v1307_v5 }
  0x6d   : > { %3586 = vmatprep.mubr.msk.bf16.mxu1 %vm703_vm3, %v3201_v20  ;;  %3738 = vmatprep.mubr.msk.bf16.mxu0 %vm703_vm3, %v4774_v50  ;;  %v4796_v20 = vcombine.low %v1301_v45, %v1304_v8  ;;  %v3245_v35 = vrot.slane %v4597_v61, 9  ;;  %v1317_v4 = vrot.slane %v4621_v3, 5  ;;  %v4802_v47 = vcombine.low %v4303_v33, %v4316_v39  ;;  %v4814_v3 = vld [vmem:[%s5328_s1 + $0x6] sm:$0x3] }
  0x6e   : > { %v1311_v1 = vsel %vm4488_vm7, %v1309_v43, %v1310_v49  ;;  %v1316_v2 = vrot.slane %v1314_v55, 4  ;;  %v3246_v11 = vrot.slane %v4639_v60, 9  ;;  %v1439_v21 = vsel %vm752_vm0, %v4356_v23, 0 }
  0x6f   : > { %v4807_v0 = vcombine.low %v1308_v59, %v1311_v1  ;;  %v1323_v9 = vrot.slane %v1321_v12, 4  ;;  %v1324_v10 = vrot.slane %v4659_v58, 5  ;;  %v1328_v51 = vrot.slane %v4678_v32, 5 }
  0x70   : > { %v1315_v33 = vsel %vm4488_vm7, %v3245_v35, %v1314_v55  ;;  %v1318_v39 = vsel %vm4488_vm7, %v1316_v2, %v1317_v4  ;;  %v4828_v23 = vcombine.low %v4330_v57, %v4335_v62  ;;  %v1322_v58 = vsel %vm4488_vm7, %v3246_v11, %v1321_v12 }
  0x71   : > { %v4834_v22 = vcombine.low %v4452_v15, %v4457_v27  ;;  %v1325_v42 = vsel %vm4488_vm7, %v1323_v9, %v1324_v10  ;;  %v3247_v40 = vrot.slane %v4669_v25, 9  ;;  %v1335_v19 = vrot.slane %v4716_v53, 5 }
  0x72   : > { %v4844_v57 = vcombine.low %v4479_v54, %v4495_v36  ;;  %v4848_v62 = vcombine.low %v1315_v33, %v1318_v39  ;;  %v1330_v15 = vrot.slane %v1328_v51, 4  ;;  %v1331_v27 = vrot.slane %v4692_v18, 5  ;;  %v261_v18 = vld [vmem:[%s4260_s27 + $0xc8] sm:$0x1] }
  0x73   : > { %v4853_v5 = vcombine.low %v4520_v56, %v4536_v31  ;;  %v4857_v49 = vcombine.low %v4567_v29, %v4573_v16  ;;  %v4861_v54 = vcombine.low %v4597_v61, %v4616_v46  ;;  %v4865_v36 = vcombine.low %v4639_v60, %v4646_v7  ;;  %v4884_v61 = vld [vmem:[%s4260_s27 + $0xc4] sm:$0xf] }
  0x74   : > { %3587 = vmatmul.mubr.msk.bf16.vlgmr.msra.gmra.mrb[0].mxu1 %vm703_vm3, %v4313_v38  ;;  %3739 = vmatmul.mubr.msk.bf16.gmra.mrb[16].mxu0 %vm703_vm3, %v4796_v20  ;;  %v4869_v45 = vcombine.low %v4669_v25, %v4678_v32  ;;  %v4873_v56 = vcombine.low %v4349_v14, %v4361_v28  ;;  %v4875_v31 = vcombine.low %v1322_v58, %v1325_v42  ;;  %v3248_v16 = vrot.slane %v4704_v17, 9  ;;  %v5387_v42 = vld [vmem:[#allocation5_spill] sm:$0xff] }
  0x75   : > { %3619 = vmatpush3.bf16.msra.mxu1 %v1439_v21  ;;  %3590 = vmatprep.mubr.msk.bf16.mxu1 %vm703_vm3, %v4802_v47  ;;  %v4879_v29 = vcombine.low %v4704_v17, %v4716_v53  ;;  %v1337_v7 = vrot.slane %v1335_v19, 4  ;;  %v1338_v60 = vrot.slane %v4722_v44, 5  ;;  %v1329_v14 = vsel %vm4488_vm7, %v3247_v40, %v1328_v51  ;;  %v4904_v17 = vld [vmem:[%s4260_s27 + $0xc0] sm:$0xf] }
  0x76   : > { %3742 = vmatprep.mubr.msk.bf16.mxu0 %vm703_vm3, %v4807_v0  ;;  %4117 = vmatprep.subr.msk.bf16.mxu1 %vm752_vm0, %v4814_v3  ;;  %v1332_v28 = vsel %vm4488_vm7, %v1330_v15, %v1331_v27  ;;  %v2071_v25 = vrot.slane %v4884_v61, 5  ;;  %v1336_v46 = vsel %vm4488_vm7, %v3248_v16, %v1335_v19  ;;  %v4909_v53 = vcombine.low %v4376_v48, %v4384_v52 }
  0x77   : > { %v1339_v32 = vsel %vm4488_vm7, %v1337_v7, %v1338_v60  ;;  %v4911_v44 = vcombine.low %v1329_v14, %v1332_v28  ;;  %v4915_v8 = vcombine.low %v4401_v13, %v4408_v24  ;;  %v1841_v43 = vshrl.u32 %v4904_v17, 16  ;;  %v3374_v60 = vld [vmem:[%s5328_s1 + $0x10] sm:$0x3]  ;;  %v4167_v14 = vld [vmem:[%s4260_s27 + $0x4] sm:$0xf] }
  0x78   : > { %v1844_v55 = vshll.u32 %v4904_v17, 16  ;;  %v1850_v12 = vshll.u32 %v4884_v61, 16  ;;  %v1854_v59 = vshrl.u32 %v4884_v61, 16  ;;  %v4921_v1 = vcombine.low %v1336_v46, %v1339_v32  ;;  %v4169_v32 = vld [vmem:[%s4260_s27] sm:$0xf] }
  0x79   : > { %v3318_v35 = vrot.slane %v4904_v17, 9  ;;  %v2073_v48 = vrot.slane %v2071_v25, 4  ;;  %v2074_v52 = vrot.slane %v261_v18, 5  ;;  %v1843_v2 = vrot.slane %v1841_v43, 4 }
  0x7a   : > { %v1846_v4 = vrot.slane %v1844_v55, 5  ;;  %v1852_v11 = vrot.slane %v1850_v12, 5  ;;  %v1856_v21 = vrot.slane %v1854_v59, 4  ;;  %v1860_v9 = vshll.u32 %v261_v18, 16 }
  0x7b   : > { %v2072_v10 = vsel %vm4488_vm7, %v3318_v35, %v2071_v25  ;;  %v2075_v51 = vsel %vm4488_vm7, %v2073_v48, %v2074_v52  ;;  %v4938_v40 = vcombine.low %v5387_v42, %v4435_v6  ;;  %v5388_v6 = vld [vmem:[#allocation15_spill] sm:$0xff]  ;;  %v1230_v28 = vrot.slane %v4167_v14, 5  ;;  %v5389_v48 = vld [vmem:[#allocation10_spill] sm:$0xff]  ;;  %v5390_v52 = vld [vmem:[#allocation12_spill] sm:$0xff] }
  0x7c   : > { %3591 = vmatmul.mubr.msk.bf16.gmra.mrb[4].mxu1 %vm703_vm3, %v4828_v23  ;;  %3743 = vmatmul.mubr.msk.bf16.gmra.mrb[20].mxu0 %vm703_vm3, %v4848_v62  ;;  %v1847_v13 = vor.u32 %v1846_v4, %v1843_v2  ;;  %v1857_v24 = vor.u32 %v1856_v21, %v1852_v11  ;;  %v1862_v58 = vrot.slane %v1860_v9, 5  ;;  %v4940_v19 = vcombine.low %v2072_v10, %v2075_v51  ;;  %v4168_v25 = vld [vmem:[%s4260_s27 + $0x8] sm:$0x1]  ;;  %v5392_v4 = vld [vmem:[#allocation17_spill] sm:$0xff]  ;;  %v5393_v21 = vld [vmem:[#allocation20_spill] sm:$0xff] }
  0x7d   : > { %3594 = vmatprep.mubr.msk.bf16.mxu1 %vm703_vm3, %v4873_v56  ;;  %3746 = vmatprep.mubr.msk.bf16.mxu0 %vm703_vm3, %v4875_v31  ;;  %v2519_v7 = vsel %vm752_vm0, %v5388_v6, 0  ;;  %v1233_v46 = vrot.slane %v4168_v25, 5  ;;  %v3233_v18 = vrot.slane %v4169_v32, 9  ;;  %v1232_v43 = vrot.slane %v1230_v28, 4  ;;  %v4170_v2 = vld [vmem:[%s5328_s1 + $0x8] sm:$0x3] }
  0x7e   : > { %v1848_v33 = vrot.slane %v1847_v13, 4  ;;  %v1858_v39 = vrot.slane %v1857_v24, 4  ;;  %v1645_v35 = vsel %vm752_vm0, %v4814_v3, 0  ;;  %v5391_v3 = vld [vmem:[#allocation14_spill] sm:$0xff]  ;;  %v5035_v24 = vld [vmem:[%s4260_s27 + $0xcc] sm:$0xf] }
  0x7f   : > { %v1231_v55 = vsel %vm4488_vm7, %v3233_v18, %v1230_v28  ;;  %v1234_v12 = vsel %vm4488_vm7, %v1232_v43, %v1233_v46  ;;  %v5394_v13 = vld [vmem:[#allocation22_spill] sm:$0xff]  ;;  %v5038_v9 = vld [vmem:[%s4260_s27 + $0xd0] sm:$0xf]  ;;  %v2731_v10 = vsel %vm752_vm0, %v3374_v60, 0  ;;  %v5400_v42 = vld [vmem:[#allocation9_spill] sm:$0xff]  ;;  %v2490_v14 = vshll.u32 %v5035_v24, 16 }
  0x80   : > { %v1853_v15 = vsel %vm4307_vm4, %v1848_v33, %v1852_v11  ;;  %v1863_v27 = vsel %vm4307_vm4, %v1858_v39, %v1862_v58  ;;  %v3250_v59 = vcombine.low %v1231_v55, %v1234_v12  ;;  %v5024_v11 = vcombine.low %v4904_v17, %v4884_v61  ;;  %v5395_v17 = vld [vmem:[#allocation3_spill] sm:$0xff]  ;;  %v5396_v51 = vld [vmem:[#allocation4_spill] sm:$0xff]  ;;  %v5397_v33 = vld [vmem:[#allocation6_spill] sm:$0xff] }
  0x81   : > { %v4946_v16 = vcombine.low %v1853_v15, %v1863_v27  ;;  %v3338_v61 = vcombine.low %v5035_v24, %v5038_v9  ;;  %v5398_v39 = vld [vmem:[#allocation7_spill] sm:$0xff]  ;;  %v5399_v58 = vld [vmem:[#allocation8_spill] sm:$0xff]  ;;  %v5402_v27 = vld [vmem:[#allocation13_spill] sm:$0xff]  ;;  %v2500_v28 = vshrl.u32 %v5038_v9, 16  ;;  %v2492_v32 = vrot.slane %v2490_v14, 5 }
  0x82   : > { %v5401_v15 = vld [vmem:[#allocation11_spill] sm:$0xff]  ;;  %v5403_v6 = vld [vmem:[#allocation16_spill] sm:$0xff]  ;;  %v5405_v25 = vld [vmem:[#allocation2_spill] sm:$0xff]  ;;  %v2717_v34 = vrot.slane %v5038_v9, 5 }
  0x83   : > { %v5406_v46 = vld [vmem:[#allocation19_spill] sm:$0xff]  ;;  %v2502_v43 = vrot.slane %v2500_v28, 4  ;;  %v264_v55 = vld [vmem:[%s4260_s27 + $0xd4] sm:$0x1]  ;;  %v5407_v12 = vld [vmem:[#allocation21_spill] sm:$0xff] }
  0x84   : > { %3595 = vmatmul.mubr.msk.bf16.gmra.mrb[8].mxu1 %vm703_vm3, %v4909_v53  ;;  %3747 = vmatmul.mubr.msk.bf16.gmra.mrb[24].mxu0 %vm703_vm3, %v4911_v44 }
  0x85   : > { %3598 = vmatprep.mubr.msk.bf16.mxu1 %vm703_vm3, %v4915_v8  ;;  %3750 = vmatprep.mubr.msk.bf16.mxu0 %vm703_vm3, %v4921_v1 }
  0x8c   : > { %3599 = vmatmul.mubr.msk.bf16.gmra.mrb[12].mxu1 %vm703_vm3, %v4938_v40  ;;  %3751 = vmatmul.mubr.msk.bf16.gmra.mrb[28].mxu0 %vm703_vm3, %v4940_v19 }
  0x8d   : > { %3602 = vmatprep.mubr.msk.bf16.mxu1 %vm703_vm3, %v4834_v22  ;;  %3756 = vmatprep.mubr.msk.bf16.mxu0 %vm703_vm3, %v4802_v47 }
  0x94   : > { %3603 = vmatmul.mubr.msk.bf16.gmra.mrb[16].mxu1 %vm703_vm3, %v4844_v57  ;;  %3757 = vmatmul.mubr.msk.bf16.vlgmr.msra.gmra.mrb[0].mxu0 %vm703_vm3, %v4828_v23 }
  0x95   : > { %3789 = vmatpush3.bf16.msra.mxu0 %v2519_v7  ;;  %3606 = vmatprep.mubr.msk.bf16.mxu1 %vm703_vm3, %v4853_v5  ;;  %v5404_v7 = vld [vmem:[#allocation18_spill] sm:$0xff] }
  0x96   : > { %3760 = vmatprep.mubr.msk.bf16.mxu0 %vm703_vm3, %v4873_v56  ;;  %4123 = vmatprep.subr.msk.bf16.mxu0 %vm752_vm0, %v3374_v60  ;;  %v2487_v60 = vshrl.u32 %v5035_v24, 16 }
  0x9c   : > { %3607 = vmatmul.mubr.msk.bf16.gmra.mrb[20].mxu1 %vm703_vm3, %v4857_v49  ;;  %3761 = vmatmul.mubr.msk.bf16.gmra.mrb[4].mxu0 %vm703_vm3, %v4909_v53 }
  0x9d   : > { %3610 = vmatprep.mubr.msk.bf16.mxu1 %vm703_vm3, %v4861_v54  ;;  %3764 = vmatprep.mubr.msk.bf16.mxu0 %vm703_vm3, %v4915_v8 }
  0xa4   : > { %3611 = vmatmul.mubr.msk.bf16.gmra.mrb[24].mxu1 %vm703_vm3, %v4865_v36  ;;  %3765 = vmatmul.mubr.msk.bf16.gmra.mrb[8].mxu0 %vm703_vm3, %v4938_v40 }
  0xa5   : > { %3614 = vmatprep.mubr.msk.bf16.mxu1 %vm703_vm3, %v4869_v45  ;;  %3768 = vmatprep.mubr.msk.bf16.mxu0 %vm703_vm3, %v4834_v22 }
  0xac   : > { %3615 = vmatmul.mubr.msk.bf16.gmra.mrb[28].mxu1 %vm703_vm3, %v4879_v29  ;;  %3769 = vmatmul.mubr.msk.bf16.gmra.mrb[12].mxu0 %vm703_vm3, %v4844_v57 }
  0xad   : > { %3620 = vmatprep.mubr.msk.bf16.mxu1 %vm703_vm3, %v3250_v59  ;;  %3772 = vmatprep.mubr.msk.bf16.mxu0 %vm703_vm3, %v4853_v5 }
  0xb4   : > { %3621 = vmatmul.mubr.msk.bf16.vlgmr.msra.gmra.mrb[0].mxu1 %vm703_vm3, %v5389_v48  ;;  %3773 = vmatmul.mubr.msk.bf16.gmra.mrb[16].mxu0 %vm703_vm3, %v4857_v49 }
  0xb5   : > { %3653 = vmatpush3.bf16.msra.mxu1 %v1645_v35  ;;  %3624 = vmatprep.mubr.msk.bf16.mxu1 %vm703_vm3, %v5390_v52  ;;  %v2506_v35 = vshll.u32 %v264_v55, 16 }
  0xb6   : > { %3776 = vmatprep.mubr.msk.bf16.mxu0 %vm703_vm3, %v4861_v54  ;;  %4119 = vmatprep.subr.msk.bf16.mxu1 %vm752_vm0, %v4170_v2 }
  0xbc   : > { %3625 = vmatmul.mubr.msk.bf16.gmra.mrb[4].mxu1 %vm703_vm3, %v5391_v3  ;;  %3777 = vmatmul.mubr.msk.bf16.gmra.mrb[20].mxu0 %vm703_vm3, %v4865_v36 }
  0xbd   : > { %3628 = vmatprep.mubr.msk.bf16.mxu1 %vm703_vm3, %v5392_v4  ;;  %3780 = vmatprep.mubr.msk.bf16.mxu0 %vm703_vm3, %v4869_v45 }
  0xc4   : > { %3629 = vmatmul.mubr.msk.bf16.gmra.mrb[8].mxu1 %vm703_vm3, %v5393_v21  ;;  %3781 = vmatmul.mubr.msk.bf16.gmra.mrb[24].mxu0 %vm703_vm3, %v4879_v29 }
  0xc5   : > { %3632 = vmatprep.mubr.msk.bf16.mxu1 %vm703_vm3, %v5394_v13  ;;  %3784 = vmatprep.mubr.msk.bf16.mxu0 %vm703_vm3, %v5024_v11 }
  0xcc   : > { %3633 = vmatmul.mubr.msk.bf16.gmra.mrb[12].mxu1 %vm703_vm3, %v4739_v37  ;;  %3785 = vmatmul.mubr.msk.bf16.gmra.mrb[28].mxu0 %vm703_vm3, %v3338_v61  ;;  %v2508_v61 = vrot.slane %v2506_v35, 5 }
  0xcd   : > { %3636 = vmatprep.mubr.msk.bf16.mxu1 %vm703_vm3, %v4770_v41  ;;  %3790 = vmatprep.mubr.msk.bf16.mxu0 %vm703_vm3, %v5395_v17 }
  0xd4   : > { %3637 = vmatmul.mubr.msk.bf16.gmra.mrb[16].mxu1 %vm703_vm3, %v4774_v50  ;;  %3791 = vmatmul.mubr.msk.bf16.vlgmr.msra.gmra.mrb[0].mxu0 %vm703_vm3, %v5396_v51 }
  0xd5   : > { %3823 = vmatpush3.bf16.msra.mxu0 %v2731_v10  ;;  %3640 = vmatprep.mubr.msk.bf16.mxu1 %vm703_vm3, %v4796_v20 }
  0xd6   : > { %3794 = vmatprep.mubr.msk.bf16.mxu0 %vm703_vm3, %v5397_v33 }
  0xdc   : > { %3641 = vmatmul.mubr.msk.bf16.gmra.mrb[20].mxu1 %vm703_vm3, %v4807_v0  ;;  %3795 = vmatmul.mubr.msk.bf16.gmra.mrb[4].mxu0 %vm703_vm3, %v5398_v39 }
  0xdd   : > { %3644 = vmatprep.mubr.msk.bf16.mxu1 %vm703_vm3, %v4848_v62  ;;  %3798 = vmatprep.mubr.msk.bf16.mxu0 %vm703_vm3, %v5399_v58 }
  0xe4   : > { %3645 = vmatmul.mubr.msk.bf16.gmra.mrb[24].mxu1 %vm703_vm3, %v4875_v31  ;;  %3799 = vmatmul.mubr.msk.bf16.gmra.mrb[8].mxu0 %vm703_vm3, %v5400_v42 }
  0xe5   : > { %3648 = vmatprep.mubr.msk.bf16.mxu1 %vm703_vm3, %v4911_v44  ;;  %3802 = vmatprep.mubr.msk.bf16.mxu0 %vm703_vm3, %v5401_v15 }
  0xec   : > { %3649 = vmatmul.mubr.msk.bf16.gmra.mrb[28].mxu1 %vm703_vm3, %v4921_v1  ;;  %3803 = vmatmul.mubr.msk.bf16.gmra.mrb[12].mxu0 %vm703_vm3, %v5402_v27 }
  0xed   : > { %3654 = vmatprep.mubr.msk.bf16.mxu1 %vm703_vm3, %v4313_v38  ;;  %3806 = vmatprep.mubr.msk.bf16.mxu0 %vm703_vm3, %v5403_v6  ;;  %v2496_v38 = vshll.u32 %v5038_v9, 16 }
  0xef   : > { %v2498_v18 = vrot.slane %v2496_v38, 5 }
  0xf1   : > { %v2503_v59 = vor.u32 %v2502_v43, %v2498_v18 }
  0xf3   : > { %v2504_v2 = vrot.slane %v2503_v59, 4 }
  0xf4   : > { %3655 = vmatmul.mubr.msk.bf16.vlgmr.msra.gmra.mrb[0].mxu1 %vm703_vm3, %v4802_v47  ;;  %3807 = vmatmul.mubr.msk.bf16.gmra.mrb[16].mxu0 %vm703_vm3, %v5404_v7  ;;  %v2489_v47 = vrot.slane %v2487_v60, 4 }
  0xf5   : > { %3857 = vmatpush3.bf16.msra.mxu1 %v5405_v25  ;;  %3658 = vmatprep.mubr.msk.bf16.mxu1 %vm703_vm3, %v4828_v23 }
  0xf6   : > { %3810 = vmatprep.mubr.msk.bf16.mxu0 %vm703_vm3, %v5406_v46  ;;  %v2493_v23 = vor.u32 %v2492_v32, %v2489_v47 }
  0xf8   : > { %v2494_v48 = vrot.slane %v2493_v23, 4 }
  0xfc   : > { %3659 = vmatmul.mubr.msk.bf16.gmra.mrb[4].mxu1 %vm703_vm3, %v4873_v56  ;;  %3811 = vmatmul.mubr.msk.bf16.gmra.mrb[20].mxu0 %vm703_vm3, %v5407_v12  ;;  %v2499_v56 = vsel %vm4307_vm4, %v2494_v48, %v2498_v18 }
  0xfd   : > { %3662 = vmatprep.mubr.msk.bf16.mxu1 %vm703_vm3, %v4909_v53  ;;  %3814 = vmatprep.mubr.msk.bf16.mxu0 %vm703_vm3, %v4741_v30  ;;  %v2509_v53 = vsel %vm4307_vm4, %v2504_v2, %v2508_v61 }
  0xfe   : > { %v3356_v17 = vcombine.low %v2499_v56, %v2509_v53 }
 0x104   : > { %3663 = vmatmul.mubr.msk.bf16.gmra.mrb[8].mxu1 %vm703_vm3, %v4915_v8  ;;  %3815 = vmatmul.mubr.msk.bf16.gmra.mrb[24].mxu0 %vm703_vm3, %v4768_v63 }
 0x105   : > { %3666 = vmatprep.mubr.msk.bf16.mxu1 %vm703_vm3, %v4938_v40  ;;  %3818 = vmatprep.mubr.msk.bf16.mxu0 %vm703_vm3, %v4946_v16 }
 0x10c   : > { %3667 = vmatmul.mubr.msk.bf16.gmra.mrb[12].mxu1 %vm703_vm3, %v4834_v22  ;;  %3819 = vmatmul.mubr.msk.bf16.gmra.mrb[28].mxu0 %vm703_vm3, %v3356_v17 }
 0x10d   : > { %3670 = vmatprep.mubr.msk.bf16.mxu1 %vm703_vm3, %v4844_v57  ;;  %3824 = vmatprep.mubr.msk.bf16.mxu0 %vm703_vm3, %v5390_v52 }
 0x114   : > { %3671 = vmatmul.mubr.msk.bf16.gmra.mrb[16].mxu1 %vm703_vm3, %v4853_v5  ;;  %3825 = vmatmul.mubr.msk.bf16.vlgmr.msra.gmra.mrb[0].mxu0 %vm703_vm3, %v5391_v3 }
 0x115   : > { %3674 = vmatprep.mubr.msk.bf16.mxu1 %vm703_vm3, %v4857_v49  ;;  %3828 = vmatprep.mubr.msk.bf16.mxu0 %vm703_vm3, %v5392_v4  ;;  %v5208_v4 = vld [vmem:[%s5329_s2 + $0x1] ss:$0 sm:$0xff] }
 0x11c   : > { %3675 = vmatmul.mubr.msk.bf16.gmra.mrb[20].mxu1 %vm703_vm3, %v4861_v54  ;;  %3829 = vmatmul.mubr.msk.bf16.gmra.mrb[4].mxu0 %vm703_vm3, %v5393_v21 }
 0x11d   : > { %3678 = vmatprep.mubr.msk.bf16.mxu1 %vm703_vm3, %v4865_v36  ;;  %3832 = vmatprep.mubr.msk.bf16.mxu0 %vm703_vm3, %v5394_v13 }
 0x124   : > { %3679 = vmatmul.mubr.msk.bf16.gmra.mrb[24].mxu1 %vm703_vm3, %v4869_v45  ;;  %3833 = vmatmul.mubr.msk.bf16.gmra.mrb[8].mxu0 %vm703_vm3, %v4739_v37  ;;  %v3373_v37 = vrot.slane %v5035_v24, 9 }
 0x125   : > { %3682 = vmatprep.mubr.msk.bf16.mxu1 %vm703_vm3, %v4879_v29  ;;  %3836 = vmatprep.mubr.msk.bf16.mxu0 %vm703_vm3, %v4770_v41  ;;  %v2719_v41 = vrot.slane %v2717_v34, 4 }
 0x12c   : > { %3683 = vmatmul.mubr.msk.bf16.gmra.mrb[28].mxu1 %vm703_vm3, %v5024_v11  ;;  %3837 = vmatmul.mubr.msk.bf16.gmra.mrb[12].mxu0 %vm703_vm3, %v4774_v50  ;;  %v2720_v50 = vrot.slane %v264_v55, 5 }
 0x12d   : > { %3704 = vmatprep.mubr.msk.bf16.mxu1 %vm703_vm3, %v5402_v27  ;;  %3840 = vmatprep.mubr.msk.bf16.mxu0 %vm703_vm3, %v4796_v20  ;;  %v2718_v20 = vsel %vm4488_vm7, %v3373_v37, %v2717_v34 }
 0x134   : > { %3705 = vmatmul.mubr.msk.bf16.vlgmr.msra.gmra.mrb[16].mxu1 %vm703_vm3, %v5403_v6  ;;  %3841 = vmatmul.mubr.msk.bf16.gmra.mrb[16].mxu0 %vm703_vm3, %v4807_v0  ;;  %v2721_v0 = vsel %vm4488_vm7, %v2719_v41, %v2720_v50 }
 0x135   : > { %3708 = vmatprep.mubr.msk.bf16.mxu1 %vm703_vm3, %v5404_v7  ;;  %3844 = vmatprep.mubr.msk.bf16.mxu0 %vm703_vm3, %v4848_v62  ;;  %v3375_v22 = vcombine.low %v2718_v20, %v2721_v0 }
 0x13c   : > { %3709 = vmatmul.mubr.msk.bf16.gmra.mrb[20].mxu1 %vm703_vm3, %v5406_v46  ;;  %3845 = vmatmul.mubr.msk.bf16.gmra.mrb[20].mxu0 %vm703_vm3, %v4875_v31 }
 0x13d   : > { %3712 = vmatprep.mubr.msk.bf16.mxu1 %vm703_vm3, %v5407_v12  ;;  %3848 = vmatprep.mubr.msk.bf16.mxu0 %vm703_vm3, %v4911_v44 }
 0x144   : > { %3713 = vmatmul.mubr.msk.bf16.gmra.mrb[24].mxu1 %vm703_vm3, %v4741_v30  ;;  %3849 = vmatmul.mubr.msk.bf16.gmra.mrb[24].mxu0 %vm703_vm3, %v4921_v1 }
 0x145   : > { %3716 = vmatprep.mubr.msk.bf16.mxu1 %vm703_vm3, %v4768_v63  ;;  %3852 = vmatprep.mubr.msk.bf16.mxu0 %vm703_vm3, %v4940_v19 }
 0x14c   : > { %3717 = vmatmul.mubr.msk.bf16.gmra.mrb[28].mxu1 %vm703_vm3, %v4946_v16  ;;  %3853 = vmatmul.mubr.msk.bf16.gmra.mrb[28].mxu0 %vm703_vm3, %v3375_v22  ;;  %v5203_v16 = vld [vmem:[%s5329_s2] ss:$0 sm:$0xff] }
 0x1c7   : > { %v3656_v30 = vpop.f32.mrb[0].mxu1 }
 0x1c8   : > { %v1681_v57 = vpop.f32.mrb[1].mxu1 }
 0x1c9   : > { %v3657_v62 = vpop.f32.mrb[2].mxu1 }
 0x1ca   : > { %v1684_v5 = vpop.f32.mrb[3].mxu1 }
 0x1cf   : > { %v3660_v63 = vpop.f32.mrb[4].mxu1 }
 0x1d0   : > { %v1697_v49 = vpop.f32.mrb[5].mxu1 }
 0x1d1   : > { %v3661_v54 = vpop.f32.mrb[6].mxu1 }
 0x1d2   : > { %v1700_v36 = vpop.f32.mrb[7].mxu1 }
 0x1d7   : > { %v3664_v45 = vpop.f32.mrb[8].mxu1 }
 0x1d8   : > { %v1713_v31 = vpop.f32.mrb[9].mxu1 }
 0x1d9   : > { %v5188_v29 = vpop.f32.mrb[10].mxu1 }
 0x1da   : > { %v5190_v26 = vpop.f32.mrb[11].mxu1 }
 0x1df   : > { %v5192_v44 = vpop.f32.mrb[12].mxu1 }
 0x1e0   : > { %v5194_v8 = vpop.f32.mrb[13].mxu1 }
 0x1e1   : > { %v5196_v1 = vpop.f32.mrb[14].mxu1 }
 0x1e2   : > { %v5198_v40 = vpop.f32.mrb[15].mxu1 }
 0x1e7   : > { %v3826_v19 = vpop.f32.mrb[0].mxu0 }
 0x1e8   : > { %v3858_v52 = vadd.f32 %v3826_v19, %v3656_v30  ;;  %v2767_v3 = vpop.f32.mrb[1].mxu0 }
 0x1e9   : > { %v3859_v11 = vadd.f32 %v2767_v3, %v1681_v57  ;;  %v3827_v21 = vpop.f32.mrb[2].mxu0 }
 0x1ea   : > { %v2933_v13 = vmul.f32 %v3858_v52, %v5203_v16  ;;  %v3860_v24 = vadd.f32 %v3827_v21, %v3657_v62  ;;  %v2770_v9 = vpop.f32.mrb[3].mxu0 }
 0x1eb   : > { %v2931_v10 = vmul.f32 %v3859_v11, %v5203_v16  ;;  %v3861_v51 = vadd.f32 %v2770_v9, %v1684_v5 }
 0x1ec   : > { %v2970_v33 = vadd.f32 %v5208_v4, %v2933_v13  ;;  %v2934_v39 = vmul.f32 %v3860_v24, %v5203_v16 }
 0x1ed   : > { %v2968_v58 = vadd.f32 %v5208_v4, %v2931_v10  ;;  %v2932_v42 = vmul.f32 %v3861_v51, %v5203_v16 }
 0x1ee   : > { %v3002_v15 = vmax.f32 %v2970_v33, 0.0  ;;  %v2971_v27 = vadd.f32 %v5208_v4, %v2934_v39 }
 0x1ef   : > { %v3000_v6 = vmax.f32 %v2968_v58, 0.0  ;;  %v2969_v7 = vadd.f32 %v5208_v4, %v2932_v42  ;;  %v3830_v60 = vpop.f32.mrb[4].mxu0 }
 0x1f0   : > { %3034 = vst [vmem:[%s5218_s24 + $0x10] sm:$0xff] %v3002_v15  ;;  %v3003_v14 = vmax.f32 %v2971_v27, 0.0  ;;  %v3862_v28 = vadd.f32 %v3830_v60, %v3660_v63  ;;  %v2783_v25 = vpop.f32.mrb[5].mxu0 }
 0x1f1   : > { %3032 = vst [vmem:[%s5218_s24] sm:$0xff] %v3000_v6  ;;  %v3001_v38 = vmax.f32 %v2969_v7, 0.0  ;;  %v3863_v46 = vadd.f32 %v2783_v25, %v1697_v49  ;;  %v3831_v47 = vpop.f32.mrb[6].mxu0 }
 0x1f2   : > { %3035 = vst [vmem:[%s5218_s24 + $0x18] sm:$0xff] %v3003_v14  ;;  %v2937_v32 = vmul.f32 %v3862_v28, %v5203_v16  ;;  %v3864_v18 = vadd.f32 %v3831_v47, %v3661_v54  ;;  %v2786_v43 = vpop.f32.mrb[7].mxu0 }
 0x1f3   : > { %3033 = vst [vmem:[%s5218_s24 + $0x8] sm:$0xff] %v3001_v38  ;;  %v2935_v55 = vmul.f32 %v3863_v46, %v5203_v16  ;;  %v3865_v12 = vadd.f32 %v2786_v43, %v1700_v36 }
 0x1f4   : > { %v2974_v23 = vadd.f32 %v5208_v4, %v2937_v32  ;;  %v2938_v59 = vmul.f32 %v3864_v18, %v5203_v16 }
 0x1f5   : > { %v2972_v35 = vadd.f32 %v5208_v4, %v2935_v55  ;;  %v2936_v48 = vmul.f32 %v3865_v12, %v5203_v16 }
 0x1f6   : > { %v3006_v2 = vmax.f32 %v2974_v23, 0.0  ;;  %v2975_v61 = vadd.f32 %v5208_v4, %v2938_v59 }
 0x1f7   : > { %v3004_v56 = vmax.f32 %v2972_v35, 0.0  ;;  %v2973_v53 = vadd.f32 %v5208_v4, %v2936_v48  ;;  %v3834_v17 = vpop.f32.mrb[8].mxu0 }
 0x1f8   : > { %3038 = vst [vmem:[%s5218_s24 + $0x30] sm:$0xff] %v3006_v2  ;;  %v3007_v34 = vmax.f32 %v2975_v61, 0.0  ;;  %v3866_v37 = vadd.f32 %v3834_v17, %v3664_v45  ;;  %v2799_v41 = vpop.f32.mrb[9].mxu0 }
 0x1f9   : > { %3036 = vst [vmem:[%s5218_s24 + $0x20] sm:$0xff] %v3004_v56  ;;  %v3005_v50 = vmax.f32 %v2973_v53, 0.0  ;;  %v3867_v20 = vadd.f32 %v2799_v41, %v1713_v31  ;;  %v3835_v0 = vpop.f32.mrb[10].mxu0 }
 0x1fa   : > { %3039 = vst [vmem:[%s5218_s24 + $0x38] sm:$0xff] %v3007_v34  ;;  %v2941_v22 = vmul.f32 %v3866_v37, %v5203_v16  ;;  %v3868_v30 = vadd.f32 %v3835_v0, %v5188_v29  ;;  %v2802_v57 = vpop.f32.mrb[11].mxu0 }
 0x1fb   : > { %3037 = vst [vmem:[%s5218_s24 + $0x28] sm:$0xff] %v3005_v50  ;;  %v2939_v62 = vmul.f32 %v3867_v20, %v5203_v16  ;;  %v3869_v5 = vadd.f32 %v2802_v57, %v5190_v26 }
 0x1fc   : > { %v2978_v63 = vadd.f32 %v5208_v4, %v2941_v22  ;;  %v2942_v49 = vmul.f32 %v3868_v30, %v5203_v16 }
 0x1fd   : > { %v2976_v54 = vadd.f32 %v5208_v4, %v2939_v62  ;;  %v2940_v36 = vmul.f32 %v3869_v5, %v5203_v16 }
 0x1fe   : > { %v3010_v45 = vmax.f32 %v2978_v63, 0.0  ;;  %v2979_v31 = vadd.f32 %v5208_v4, %v2942_v49 }
 0x1ff   : > { %v3008_v29 = vmax.f32 %v2976_v54, 0.0  ;;  %v2977_v19 = vadd.f32 %v5208_v4, %v2940_v36  ;;  %v3838_v52 = vpop.f32.mrb[12].mxu0 }
 0x200   : > { %3042 = vst [vmem:[%s5218_s24 + $0x50] sm:$0xff] %v3010_v45  ;;  %v3011_v3 = vmax.f32 %v2979_v31, 0.0  ;;  %v3870_v26 = vadd.f32 %v3838_v52, %v5192_v44  ;;  %v2815_v11 = vpop.f32.mrb[13].mxu0 }
 0x201   : > { %3040 = vst [vmem:[%s5218_s24 + $0x40] sm:$0xff] %v3008_v29  ;;  %v3009_v21 = vmax.f32 %v2977_v19, 0.0  ;;  %v3871_v13 = vadd.f32 %v2815_v11, %v5194_v8  ;;  %v3839_v24 = vpop.f32.mrb[14].mxu0 }
 0x202   : > { %3043 = vst [vmem:[%s5218_s24 + $0x58] sm:$0xff] %v3011_v3  ;;  %v2945_v9 = vmul.f32 %v3870_v26, %v5203_v16  ;;  %v3872_v10 = vadd.f32 %v3839_v24, %v5196_v1  ;;  %v2818_v51 = vpop.f32.mrb[15].mxu0 }
 0x203   : > { %3041 = vst [vmem:[%s5218_s24 + $0x48] sm:$0xff] %v3009_v21  ;;  %v2943_v33 = vmul.f32 %v3871_v13, %v5203_v16  ;;  %v3873_v39 = vadd.f32 %v2818_v51, %v5198_v40 }
 0x204   : > { %v2982_v44 = vadd.f32 %v5208_v4, %v2945_v9  ;;  %v2946_v58 = vmul.f32 %v3872_v10, %v5203_v16 }
 0x205   : > { %v2980_v8 = vadd.f32 %v5208_v4, %v2943_v33  ;;  %v2944_v42 = vmul.f32 %v3873_v39, %v5203_v16 }
 0x206   : > { %v3014_v15 = vmax.f32 %v2982_v44, 0.0  ;;  %v2983_v27 = vadd.f32 %v5208_v4, %v2946_v58 }
 0x207   : > { %v3012_v1 = vmax.f32 %v2980_v8, 0.0  ;;  %v2981_v6 = vadd.f32 %v5208_v4, %v2944_v42  ;;  %v3706_v7 = vpop.f32.mrb[16].mxu1  ;;  %v3842_v60 = vpop.f32.mrb[16].mxu0 }
 0x208   : > { %3046 = vst [vmem:[%s5218_s24 + $0x70] sm:$0xff] %v3014_v15  ;;  %v3015_v40 = vmax.f32 %v2983_v27, 0.0  ;;  %v3874_v14 = vadd.f32 %v3842_v60, %v3706_v7  ;;  %v1973_v28 = vpop.f32.mrb[17].mxu1  ;;  %v2831_v25 = vpop.f32.mrb[17].mxu0 }
 0x209   : > { %3044 = vst [vmem:[%s5218_s24 + $0x60] sm:$0xff] %v3012_v1  ;;  %v3013_v38 = vmax.f32 %v2981_v6, 0.0  ;;  %v3875_v46 = vadd.f32 %v2831_v25, %v1973_v28  ;;  %v3707_v47 = vpop.f32.mrb[18].mxu1  ;;  %v3843_v32 = vpop.f32.mrb[18].mxu0 }
 0x20a   : > { %3047 = vst [vmem:[%s5218_s24 + $0x78] sm:$0xff] %v3015_v40  ;;  %v2949_v18 = vmul.f32 %v3874_v14, %v5203_v16  ;;  %v3876_v43 = vadd.f32 %v3843_v32, %v3707_v47  ;;  %v1976_v55 = vpop.f32.mrb[19].mxu1  ;;  %v2834_v12 = vpop.f32.mrb[19].mxu0 }
 0x20b   : > { %3045 = vst [vmem:[%s5218_s24 + $0x68] sm:$0xff] %v3013_v38  ;;  %v2947_v23 = vmul.f32 %v3875_v46, %v5203_v16  ;;  %v3877_v59 = vadd.f32 %v2834_v12, %v1976_v55 }
 0x20c   : > { %v2986_v35 = vadd.f32 %v5208_v4, %v2949_v18  ;;  %v2950_v48 = vmul.f32 %v3876_v43, %v5203_v16 }
 0x20d   : > { %v2984_v2 = vadd.f32 %v5208_v4, %v2947_v23  ;;  %v2948_v61 = vmul.f32 %v3877_v59, %v5203_v16 }
 0x20e   : > { %v3018_v56 = vmax.f32 %v2986_v35, 0.0  ;;  %v2987_v53 = vadd.f32 %v5208_v4, %v2950_v48 }
 0x20f   : > { %v3016_v17 = vmax.f32 %v2984_v2, 0.0  ;;  %v2985_v34 = vadd.f32 %v5208_v4, %v2948_v61  ;;  %v3710_v37 = vpop.f32.mrb[20].mxu1  ;;  %v3846_v41 = vpop.f32.mrb[20].mxu0 }
 0x210   : > { %3050 = vst [vmem:[%s5218_s24 + $0x90] sm:$0xff] %v3018_v56  ;;  %v3019_v50 = vmax.f32 %v2987_v53, 0.0  ;;  %v3878_v20 = vadd.f32 %v3846_v41, %v3710_v37  ;;  %v1989_v0 = vpop.f32.mrb[21].mxu1  ;;  %v2847_v22 = vpop.f32.mrb[21].mxu0 }
 0x211   : > { %3048 = vst [vmem:[%s5218_s24 + $0x80] sm:$0xff] %v3016_v17  ;;  %v3017_v30 = vmax.f32 %v2985_v34, 0.0  ;;  %v3879_v57 = vadd.f32 %v2847_v22, %v1989_v0  ;;  %v3711_v62 = vpop.f32.mrb[22].mxu1  ;;  %v3847_v5 = vpop.f32.mrb[22].mxu0 }
 0x212   : > { %3051 = vst [vmem:[%s5218_s24 + $0x98] sm:$0xff] %v3019_v50  ;;  %v2953_v63 = vmul.f32 %v3878_v20, %v5203_v16  ;;  %v3880_v49 = vadd.f32 %v3847_v5, %v3711_v62  ;;  %v1992_v54 = vpop.f32.mrb[23].mxu1  ;;  %v2850_v36 = vpop.f32.mrb[23].mxu0 }
 0x213   : > { %3049 = vst [vmem:[%s5218_s24 + $0x88] sm:$0xff] %v3017_v30  ;;  %v2951_v45 = vmul.f32 %v3879_v57, %v5203_v16  ;;  %v3881_v31 = vadd.f32 %v2850_v36, %v1992_v54 }
 0x214   : > { %v2990_v29 = vadd.f32 %v5208_v4, %v2953_v63  ;;  %v2954_v19 = vmul.f32 %v3880_v49, %v5203_v16 }
 0x215   : > { %v2988_v52 = vadd.f32 %v5208_v4, %v2951_v45  ;;  %v2952_v3 = vmul.f32 %v3881_v31, %v5203_v16 }
 0x216   : > { %v3022_v26 = vmax.f32 %v2990_v29, 0.0  ;;  %v2991_v11 = vadd.f32 %v5208_v4, %v2954_v19 }
 0x217   : > { %v3020_v21 = vmax.f32 %v2988_v52, 0.0  ;;  %v2989_v13 = vadd.f32 %v5208_v4, %v2952_v3  ;;  %v3714_v24 = vpop.f32.mrb[24].mxu1  ;;  %v3850_v9 = vpop.f32.mrb[24].mxu0 }
 0x218   : > { %3054 = vst [vmem:[%s5218_s24 + $0xb0] sm:$0xff] %v3022_v26  ;;  %v3023_v10 = vmax.f32 %v2991_v11, 0.0  ;;  %v3882_v51 = vadd.f32 %v3850_v9, %v3714_v24  ;;  %v2005_v33 = vpop.f32.mrb[25].mxu1  ;;  %v2863_v39 = vpop.f32.mrb[25].mxu0 }
 0x219   : > { %3052 = vst [vmem:[%s5218_s24 + $0xa0] sm:$0xff] %v3020_v21  ;;  %v3021_v44 = vmax.f32 %v2989_v13, 0.0  ;;  %v3883_v58 = vadd.f32 %v2863_v39, %v2005_v33  ;;  %v3715_v8 = vpop.f32.mrb[26].mxu1  ;;  %v3851_v42 = vpop.f32.mrb[26].mxu0 }
 0x21a   : > { %3055 = vst [vmem:[%s5218_s24 + $0xb8] sm:$0xff] %v3023_v10  ;;  %v2957_v15 = vmul.f32 %v3882_v51, %v5203_v16  ;;  %v3884_v27 = vadd.f32 %v3851_v42, %v3715_v8  ;;  %v2008_v1 = vpop.f32.mrb[27].mxu1  ;;  %v2866_v6 = vpop.f32.mrb[27].mxu0 }
 0x21b   : > { %3053 = vst [vmem:[%s5218_s24 + $0xa8] sm:$0xff] %v3021_v44  ;;  %v2955_v7 = vmul.f32 %v3883_v58, %v5203_v16  ;;  %v3885_v60 = vadd.f32 %v2866_v6, %v2008_v1 }
 0x21c   : > { %v2994_v40 = vadd.f32 %v5208_v4, %v2957_v15  ;;  %v2958_v14 = vmul.f32 %v3884_v27, %v5203_v16 }
 0x21d   : > { %v2992_v28 = vadd.f32 %v5208_v4, %v2955_v7  ;;  %v2956_v25 = vmul.f32 %v3885_v60, %v5203_v16 }
 0x21e   : > { %v3026_v38 = vmax.f32 %v2994_v40, 0.0  ;;  %v2995_v46 = vadd.f32 %v5208_v4, %v2958_v14 }
 0x21f   : > { %v3024_v47 = vmax.f32 %v2992_v28, 0.0  ;;  %v2993_v32 = vadd.f32 %v5208_v4, %v2956_v25  ;;  %v3718_v18 = vpop.f32.mrb[28].mxu1  ;;  %v3854_v43 = vpop.f32.mrb[28].mxu0 }
 0x220   : > { %3058 = vst [vmem:[%s5218_s24 + $0xd0] sm:$0xff] %v3026_v38  ;;  %v3027_v55 = vmax.f32 %v2995_v46, 0.0  ;;  %v3886_v12 = vadd.f32 %v3854_v43, %v3718_v18  ;;  %v2021_v23 = vpop.f32.mrb[29].mxu1  ;;  %v2879_v59 = vpop.f32.mrb[29].mxu0 }
 0x221   : > { %3056 = vst [vmem:[%s5218_s24 + $0xc0] sm:$0xff] %v3024_v47  ;;  %v3025_v35 = vmax.f32 %v2993_v32, 0.0  ;;  %v3887_v48 = vadd.f32 %v2879_v59, %v2021_v23  ;;  %v3719_v2 = vpop.f32.mrb[30].mxu1  ;;  %v3855_v61 = vpop.f32.mrb[30].mxu0 }
 0x222   : > { %3059 = vst [vmem:[%s5218_s24 + $0xd8] sm:$0xff] %v3027_v55  ;;  %v2961_v56 = vmul.f32 %v3886_v12, %v5203_v16  ;;  %v3888_v53 = vadd.f32 %v3855_v61, %v3719_v2  ;;  %v2024_v17 = vpop.f32.mrb[31].mxu1  ;;  %v2882_v34 = vpop.f32.mrb[31].mxu0 }
 0x223   : > { %3057 = vst [vmem:[%s5218_s24 + $0xc8] sm:$0xff] %v3025_v35  ;;  %v2959_v37 = vmul.f32 %v3887_v48, %v5203_v16  ;;  %v3889_v41 = vadd.f32 %v2882_v34, %v2024_v17 }
 0x224   : > { %v2998_v50 = vadd.f32 %v5208_v4, %v2961_v56  ;;  %v2962_v20 = vmul.f32 %v3888_v53, %v5203_v16 }
 0x225   : > { %v2996_v0 = vadd.f32 %v5208_v4, %v2959_v37  ;;  %v2960_v22 = vmul.f32 %v3889_v41, %v5203_v16 }
 0x226   : > { %v3030_v30 = vmax.f32 %v2998_v50, 0.0  ;;  %v2999_v57 = vadd.f32 %v5208_v4, %v2962_v20 }
 0x227   : > { %v3028_v62 = vmax.f32 %v2996_v0, 0.0  ;;  %v2997_v5 = vadd.f32 %v5208_v4, %v2960_v22 }
 0x228   : > { %3062 = vst [vmem:[%s5218_s24 + $0xf0] sm:$0xff] %v3030_v30  ;;  %v3031_v63 = vmax.f32 %v2999_v57, 0.0 }
 0x229   : > { %3060 = vst [vmem:[%s5218_s24 + $0xe0] sm:$0xff] %v3028_v62  ;;  %v3029_v49 = vmax.f32 %v2997_v5, 0.0 }
 0x22a   : > { %3063 = vst [vmem:[%s5218_s24 + $0xf8] sm:$0xff] %v3031_v63 }
 0x22b   : > { %3061 = vst [vmem:[%s5218_s24 + $0xe8] sm:$0xff] %v3029_v49 }
 0x22c PF: > { %s13_s14 = sadd.s32 1, %s4193_s14   ;;  %s5408_s12 = smov %s4189_s13 }
 0x22d   : > { %p10_p5 = scmp.ge.s32.totalorder %s13_s14, 4   ;;  %s5409_s13 = smov %s5411_s15 }
 0x22f   :  { %12 = sbr.rel (!%p10_p5) target bundleno = 2 (0x2), region = 70 }

// kernel: cnn_block_forward.2
= control target key start
LH: loop header
LB: loop body
LE: loop exit
PB: predicated region body
PF: predicated region fallthrough
CT: control target
= control target key end

     0   :  { %s4127_s9 = smov 0   ;;  %s4129_s10 = smov 0   ;;  %s5119_s0 = inlined_call_operand.vmem [shape: bf16[2,1,18,18,4], index: 0, kind: input, shape index: {}]   ;;  %s5120_s1 = inlined_call_operand.vmem [shape: bf16[3,3,4,128], index: 1, kind: input, shape index: {}]   ;;  %s5121_s2 = inlined_call_operand.vmem [shape: f32[2,1,2,128], index: 2, kind: output, shape index: {}]  }
   0x1   :  { %s4131_s11 = smov 0  }
   0x2 LB: > { %s24_s12 = sadd.s32 1, %s4106_s10  ;;  %p3085_p0 = scmp.ge.s32.totalorder %s4110_s11, 1  ;;  %s4110_s11 = sphi %s4131_s11, %s12_s11   ;;  %s4106_s10 = sphi %s4129_s10, %s5200_s10   ;;  %s4102_s9 = sphi %s4127_s9, %s5199_s9  }
   0x3   : > { %p26_p1 = scmp.ge.s32.totalorder %s24_s12, 2  ;;  %p132_p2 = scmp.lt.s32.totalorder %s4110_s11, 3 }
   0x5   : > { %s5202_s12 = smov (%p26_p1, %s24_s12), 0  ;;  %p133_p3 = pnand %p3085_p0, %p132_p2 }
   0x7   : > { %136 = sbr.rel (%p133_p3) target bundleno = 571 (0x23b), region = 28 }
   0xe   : > { %v3088_v0 = vld [vmem:[%s5120_s1 + $0x2] sm:$0x3]  ;;  %vm718_vm0 = vcmask 1041408   ;;  %v3220_v1 = vld [vmem:[%s5120_s1 + $0x8] sm:$0x3]  ;;  %p160_p4 = scmp.lt.s32.totalorder %s4102_s9, 1 }
   0xf   : > { %4031 = vmatprep.subr.msk.bf16.mxu1 %vm718_vm0, %v3088_v0  ;;  %4035 = vmatprep.subr.msk.bf16.mxu0 %vm718_vm0, %v3220_v1  ;;  %v720_v2 = vsel %vm718_vm0, %v3088_v0, 0  ;;  %v4155_v3 = vsel %vm718_vm0, %v3220_v1, 0  ;;  %v231_v4 = vld [vmem:[%s5120_s1] sm:$0x3]  ;;  %v3239_v5 = vld [vmem:[%s5120_s1 + $0xa] sm:$0x3] }
  0x10   : > { %5153 = vst [vmem:[#allocation2_spill] sm:$0xff] %v4155_v3  ;;  %3468 = vmatpush3.bf16.msra.mxu1 %v720_v2  ;;  %3604 = vmatpush3.bf16.msra.mxu0 %v4155_v3  ;;  %s5204_s9 = smov (!%p160_p4, %s4102_s9), 1  ;;  %vm232_vm1 = vsmask.f32 3328  ;;  %vm233_vm2 = vsmask.f32 7440 }
  0x11   : > { %4032 = vmatprep.subr.msk.bf16.mxu1 %vm718_vm0, %v231_v4  ;;  %4037 = vmatprep.subr.msk.bf16.mxu0 %vm718_vm0, %v3239_v5  ;;  %s4041_s21 = smul.u32 216, %s5204_s9  ;;  %v4175_v6 = vsel %vm718_vm0, %v231_v4, 0  ;;  %v4178_v7 = vsel %vm718_vm0, %v3239_v5, 0  ;;  %v4183_v8 = vld [vmem:[%s5120_s1 + $0xc] sm:$0x3]  ;;  %vm669_vm3 = vcmask 31744   ;;  %vm4219_vm4 = vmor %vm232_vm1, %vm233_vm2 }
  0x12   : > { %v4207_v20 = vsel %vm718_vm0, %v4183_v8, 0  ;;  %vm1191_vm5 = vcmask 1042432   ;;  %vm1192_vm6 = vcmask 1046532   ;;  %s3087_s13 = sshll.u32 %s5204_s9, 1  ;;  %vm2998_vm8 = vcmask 1040384  }
  0x13   : > { %s4172_s24 = scalar_lea.vmem %s5119_s0, %s4041_s21  ;;  %vm4400_vm7 = vmor %vm1191_vm5, %vm1192_vm6  ;;  %s175_s16 = scalar_lea.vmem %s5121_s2, %s3087_s13 }
  0x14   : > { %v4186_v9 = vld [vmem:[%s4172_s24] sm:$0xf]  ;;  %v4189_v10 = vld [vmem:[%s4172_s24 + $0x4] sm:$0xf]  ;;  %v179_v11 = vld [vmem:[%s4172_s24 + $0x8] sm:$0x1] }
  0x15   : > { %v236_v12 = vshrl.u32 %v4186_v9, 16  ;;  %v239_v13 = vshll.u32 %v4186_v9, 16  ;;  %v245_v14 = vshll.u32 %v4189_v10, 16  ;;  %v249_v15 = vshrl.u32 %v4189_v10, 16  ;;  %v4197_v16 = vld [vmem:[%s4172_s24 + $0xc] sm:$0xf] }
  0x16   : > { %v255_v17 = vshll.u32 %v179_v11, 16  ;;  %v4200_v18 = vld [vmem:[%s4172_s24 + $0x10] sm:$0xf]  ;;  %v4203_v19 = vld [vmem:[%s4172_s24 + $0x14] sm:$0x1]  ;;  %v260_v26 = vshrl.u32 %v4197_v16, 16 }
  0x17   : > { %v238_v21 = vrot.slane %v236_v12, 4  ;;  %v241_v22 = vrot.slane %v239_v13, 5  ;;  %v247_v23 = vrot.slane %v245_v14, 5  ;;  %v251_v24 = vrot.slane %v249_v15, 4  ;;  %v4215_v33 = vld [vmem:[%s4172_s24 + $0x18] sm:$0xf] }
  0x18   : > { %v257_v25 = vrot.slane %v255_v17, 5  ;;  %v263_v27 = vshll.u32 %v4197_v16, 16  ;;  %v269_v28 = vshll.u32 %v4200_v18, 16  ;;  %v273_v31 = vshrl.u32 %v4200_v18, 16  ;;  %v4228_v39 = vld [vmem:[%s4172_s24 + $0x1c] sm:$0xf] }
  0x19   : > { %v242_v29 = vor.u32 %v241_v22, %v238_v21  ;;  %v252_v30 = vor.u32 %v251_v24, %v247_v23  ;;  %v279_v32 = vshll.u32 %v4203_v19, 16  ;;  %v262_v35 = vrot.slane %v260_v26, 4  ;;  %v4232_v46 = vld [vmem:[%s4172_s24 + $0x20] sm:$0x1]  ;;  %v4242_v57 = vld [vmem:[%s4172_s24 + $0x24] sm:$0xf] }
  0x1a   : > { %v265_v36 = vrot.slane %v263_v27, 5  ;;  %v271_v37 = vrot.slane %v269_v28, 5  ;;  %v4225_v38 = vcombine.low %v4197_v16, %v4200_v18  ;;  %v275_v42 = vrot.slane %v273_v31, 4  ;;  %v4247_v62 = vld [vmem:[%s4172_s24 + $0x28] sm:$0xf] }
  0x1b   : > { %v243_v40 = vrot.slane %v242_v29, 4  ;;  %v253_v41 = vrot.slane %v252_v30, 4  ;;  %v281_v43 = vrot.slane %v279_v32, 5  ;;  %v1206_v45 = vrot.slane %v4203_v19, 5  ;;  %v4255_v4 = vld [vmem:[%s4172_s24 + $0x2c] sm:$0x1] }
  0x1c   : > { %v266_v44 = vor.u32 %v265_v36, %v262_v35  ;;  %v284_v47 = vshrl.u32 %v4215_v33, 16  ;;  %v287_v48 = vshll.u32 %v4215_v33, 16  ;;  %v276_v51 = vor.u32 %v275_v42, %v271_v37  ;;  %v4261_v14 = vld [vmem:[%s4172_s24 + $0x30] sm:$0xf]  ;;  %v4273_v28 = vld [vmem:[%s4172_s24 + $0x34] sm:$0xf] }
  0x1d   : > { %v248_v49 = vsel %vm4219_vm4, %v243_v40, %v247_v23  ;;  %v258_v50 = vsel %vm4219_vm4, %v253_v41, %v257_v25  ;;  %v293_v52 = vshll.u32 %v4228_v39, 16  ;;  %v297_v60 = vshrl.u32 %v4228_v39, 16  ;;  %v4268_v23 = vld [vmem:[%s5120_s1 + $0x4] sm:$0x3]  ;;  %v4280_v32 = vld [vmem:[%s4172_s24 + $0x38] sm:$0x1] }
  0x1e   : > { %v3089_v53 = vcombine.low %v248_v49, %v258_v50  ;;  %v267_v54 = vrot.slane %v266_v44, 4  ;;  %v286_v55 = vrot.slane %v284_v47, 4  ;;  %v289_v56 = vrot.slane %v287_v48, 5  ;;  %v4288_v48 = vld [vmem:[%s4172_s24 + $0x3c] sm:$0xf] }
  0x1f   : > { %v277_v58 = vrot.slane %v276_v51, 4  ;;  %v295_v59 = vrot.slane %v293_v52, 5  ;;  %v303_v61 = vshll.u32 %v4232_v46, 16  ;;  %v1210_v1 = vrot.slane %v4228_v39, 5  ;;  %v4296_v52 = vld [vmem:[%s4172_s24 + $0x40] sm:$0xf] }
  0x20   : > { %3469 = vmatprep.mubr.msk.bf16.mxu1 %vm669_vm3, %v3089_v53  ;;  %v272_v63 = vsel %vm4219_vm4, %v267_v54, %v271_v37  ;;  %v290_v0 = vor.u32 %v289_v56, %v286_v55  ;;  %v1213_v2 = vrot.slane %v4232_v46, 5  ;;  %v299_v11 = vrot.slane %v297_v60, 4 }
  0x21   : > { %v282_v5 = vsel %vm4219_vm4, %v277_v58, %v281_v43  ;;  %v305_v12 = vrot.slane %v303_v61, 5  ;;  %v308_v13 = vshrl.u32 %v4242_v57, 16  ;;  %v311_v21 = vshll.u32 %v4242_v57, 16 }
  0x22   : > { %v3090_v15 = vcombine.low %v272_v63, %v282_v5  ;;  %v291_v17 = vrot.slane %v290_v0, 4  ;;  %v317_v22 = vshll.u32 %v4247_v62, 16  ;;  %v300_v24 = vor.u32 %v299_v11, %v295_v59  ;;  %v4308_v5 = vld [vmem:[%s4172_s24 + $0x44] sm:$0x1] }
  0x23   : > { %v310_v25 = vrot.slane %v308_v13, 4  ;;  %v321_v26 = vshrl.u32 %v4247_v62, 16  ;;  %v327_v27 = vshll.u32 %v4255_v4, 16  ;;  %v313_v30 = vrot.slane %v311_v21, 5  ;;  %v4313_v13 = vld [vmem:[%s4172_s24 + $0x48] sm:$0xf] }
  0x24   : > { %3605 = vmatprep.mubr.msk.bf16.mxu0 %vm669_vm3, %v3090_v15  ;;  %3470 = vmatmul.mubr.msk.bf16.vlgmr.msra.gmra.mrb[0].mxu1 %vm669_vm3, %v3090_v15  ;;  %v296_v29 = vsel %vm4219_vm4, %v291_v17, %v295_v59  ;;  %v319_v31 = vrot.slane %v317_v22, 5  ;;  %v332_v35 = vshrl.u32 %v4261_v14, 16  ;;  %v301_v36 = vrot.slane %v300_v24, 4  ;;  %v4320_v24 = vld [vmem:[%s4172_s24 + $0x4c] sm:$0xf] }
  0x25   : > { %3502 = vmatpush3.bf16.msra.mxu1 %v4175_v6  ;;  %v323_v37 = vrot.slane %v321_v26, 4  ;;  %v329_v40 = vrot.slane %v327_v27, 5  ;;  %v335_v41 = vshll.u32 %v4261_v14, 16  ;;  %v314_v42 = vor.u32 %v313_v30, %v310_v25 }
  0x26   : > { %v334_v43 = vrot.slane %v332_v35, 4  ;;  %v341_v44 = vshll.u32 %v4273_v28, 16  ;;  %v345_v47 = vshrl.u32 %v4273_v28, 16  ;;  %4033 = vmatprep.subr.msk.bf16.mxu1 %vm718_vm0, %v4268_v23  ;;  %v306_v49 = vsel %vm4219_vm4, %v301_v36, %v305_v12 }
  0x27   : > { %v324_v6 = vor.u32 %v323_v37, %v319_v31  ;;  %v337_v50 = vrot.slane %v335_v41, 5  ;;  %v351_v51 = vshll.u32 %v4280_v32, 16  ;;  %v4298_v53 = vcombine.low %v296_v29, %v306_v49 }
  0x28   : > { %v315_v54 = vrot.slane %v314_v42, 4  ;;  %v343_v55 = vrot.slane %v341_v44, 5  ;;  %v347_v56 = vrot.slane %v345_v47, 4  ;;  %v356_v61 = vshrl.u32 %v4288_v48, 16  ;;  %v4342_v42 = vld [vmem:[%s4172_s24 + $0x54] sm:$0xf] }
  0x29   : > { %5156 = vst [vmem:[#allocation3_spill] sm:$0xff] %v4298_v53  ;;  %v325_v58 = vrot.slane %v324_v6, 4  ;;  %v338_v59 = vor.u32 %v337_v50, %v334_v43  ;;  %v353_v60 = vrot.slane %v351_v51, 5  ;;  %3606 = vmatmul.mubr.msk.bf16.vlgmr.msra.gmra.mrb[0].mxu0 %vm669_vm3, %v4298_v53  ;;  %3473 = vmatprep.mubr.msk.bf16.mxu1 %vm669_vm3, %v4298_v53  ;;  %v359_v11 = vshll.u32 %v4288_v48, 16  ;;  %5158 = vst [vmem:[#allocation5_spill] sm:$0xff] %v4342_v42 }
  0x2a   : > { %v320_v63 = vsel %vm4219_vm4, %v315_v54, %v319_v31  ;;  %v348_v0 = vor.u32 %v347_v56, %v343_v55  ;;  %v365_v12 = vshll.u32 %v4296_v52, 16  ;;  %3638 = vmatpush3.bf16.msra.mxu0 %v4178_v7  ;;  %v358_v21 = vrot.slane %v356_v61, 4  ;;  %v4347_v6 = vld [vmem:[%s4172_s24 + $0x58] sm:$0xf] }
  0x2b   : > { %v330_v15 = vsel %vm4219_vm4, %v325_v58, %v329_v40  ;;  %v339_v17 = vrot.slane %v338_v59, 4  ;;  %v369_v22 = vshrl.u32 %v4296_v52, 16  ;;  %v361_v27 = vrot.slane %v359_v11, 5  ;;  %4038 = vmatprep.subr.msk.bf16.mxu0 %vm718_vm0, %v4183_v8  ;;  %v4337_v8 = vld [vmem:[%s4172_s24 + $0x50] sm:$0x1] }
  0x2c   : > { %v4322_v25 = vcombine.low %v320_v63, %v330_v15  ;;  %v349_v26 = vrot.slane %v348_v0, 4  ;;  %v367_v29 = vrot.slane %v365_v12, 5  ;;  %v375_v31 = vshll.u32 %v4308_v5, 16  ;;  %v4360_v11 = vld [vmem:[%s4172_s24 + $0x5c] sm:$0x1] }
  0x2d   : > { %v344_v7 = vsel %vm4219_vm4, %v339_v17, %v343_v55  ;;  %v371_v30 = vrot.slane %v369_v22, 4  ;;  %v380_v35 = vshrl.u32 %v4313_v13, 16  ;;  %v362_v37 = vor.u32 %v361_v27, %v358_v21  ;;  %v4364_v15 = vld [vmem:[%s4172_s24 + $0x60] sm:$0xf]  ;;  %v4369_v27 = vld [vmem:[%s4172_s24 + $0x64] sm:$0xf] }
  0x2e   : > { %5157 = vst [vmem:[#allocation4_spill] sm:$0xff] %v4322_v25  ;;  %3609 = vmatprep.mubr.msk.bf16.mxu0 %vm669_vm3, %v4322_v25  ;;  %3474 = vmatmul.mubr.msk.bf16.gmra.mrb[4].mxu1 %vm669_vm3, %v4322_v25  ;;  %v354_v36 = vsel %vm4219_vm4, %v349_v26, %v353_v60  ;;  %v383_v40 = vshll.u32 %v4313_v13, 16  ;;  %v389_v41 = vshll.u32 %v4320_v24, 16  ;;  %v377_v47 = vrot.slane %v375_v31, 5  ;;  %v4581_v25 = vld [vmem:[%s4172_s24 + $0xa8] sm:$0xf] }
  0x2f   : > { %v4344_v43 = vcombine.low %v344_v7, %v354_v36  ;;  %v372_v44 = vor.u32 %v371_v30, %v367_v29  ;;  %v382_v49 = vrot.slane %v380_v35, 4  ;;  %v363_v50 = vrot.slane %v362_v37, 4 }
  0x30   : > { %v385_v51 = vrot.slane %v383_v40, 5  ;;  %v391_v54 = vrot.slane %v389_v41, 5  ;;  %v393_v55 = vshrl.u32 %v4320_v24, 16  ;;  %v399_v58 = vshll.u32 %v4337_v8, 16 }
  0x31   : > { %5159 = vst [vmem:[#allocation6_spill] sm:$0xff] %v4344_v43  ;;  %3477 = vmatprep.mubr.msk.bf16.mxu1 %vm669_vm3, %v4344_v43  ;;  %v373_v56 = vrot.slane %v372_v44, 4  ;;  %v404_v59 = vshrl.u32 %v4342_v42, 16  ;;  %v407_v60 = vshll.u32 %v4342_v42, 16  ;;  %3610 = vmatmul.mubr.msk.bf16.gmra.mrb[4].mxu0 %vm669_vm3, %v4344_v43  ;;  %v368_v61 = vsel %vm4219_vm4, %v363_v50, %v367_v29 }
  0x32   : > { %v386_v63 = vor.u32 %v385_v51, %v382_v49  ;;  %v395_v0 = vrot.slane %v393_v55, 4  ;;  %v413_v12 = vshll.u32 %v4347_v6, 16  ;;  %v401_v21 = vrot.slane %v399_v58, 5 }
  0x33   : > { %v378_v17 = vsel %vm4219_vm4, %v373_v56, %v377_v47  ;;  %v406_v22 = vrot.slane %v404_v59, 4  ;;  %v409_v26 = vrot.slane %v407_v60, 5  ;;  %v417_v36 = vshrl.u32 %v4347_v6, 16  ;;  %v4383_v47 = vld [vmem:[%s4172_s24 + $0x68] sm:$0x1] }
  0x34   : > { %v4371_v7 = vcombine.low %v368_v61, %v378_v17  ;;  %v387_v29 = vrot.slane %v386_v63, 4  ;;  %v396_v30 = vor.u32 %v395_v0, %v391_v54  ;;  %v415_v31 = vrot.slane %v413_v12, 5 }
  0x35   : > { %v410_v35 = vor.u32 %v409_v26, %v406_v22  ;;  %v423_v37 = vshll.u32 %v4360_v11, 16  ;;  %v428_v40 = vshrl.u32 %v4364_v15, 16  ;;  %v431_v49 = vshll.u32 %v4364_v15, 16 }
  0x36   : > { %5160 = vst [vmem:[#allocation7_spill] sm:$0xff] %v4371_v7  ;;  %3613 = vmatprep.mubr.msk.bf16.mxu0 %vm669_vm3, %v4371_v7  ;;  %3478 = vmatmul.mubr.msk.bf16.gmra.mrb[8].mxu1 %vm669_vm3, %v4371_v7  ;;  %v392_v41 = vsel %vm4219_vm4, %v387_v29, %v391_v54  ;;  %v397_v44 = vrot.slane %v396_v30, 4  ;;  %v437_v50 = vshll.u32 %v4369_v27, 16  ;;  %v419_v55 = vrot.slane %v417_v36, 4  ;;  %v4391_v54 = vld [vmem:[%s4172_s24 + $0x6c] sm:$0xf] }
  0x37   : > { %v411_v51 = vrot.slane %v410_v35, 4  ;;  %v425_v56 = vrot.slane %v423_v37, 5  ;;  %v430_v58 = vrot.slane %v428_v40, 4  ;;  %v433_v60 = vrot.slane %v431_v49, 5  ;;  %v4407_v36 = vld [vmem:[%s4172_s24 + $0x70] sm:$0xf] }
  0x38   : > { %v402_v59 = vsel %vm4219_vm4, %v397_v44, %v401_v21  ;;  %v439_v61 = vrot.slane %v437_v50, 5  ;;  %v441_v63 = vshrl.u32 %v4369_v27, 16  ;;  %v420_v17 = vor.u32 %v419_v55, %v415_v31  ;;  %v4558_v7 = vld [vmem:[%s4172_s24 + $0xa0] sm:$0xf] }
  0x39   : > { %v4393_v0 = vcombine.low %v392_v41, %v402_v59  ;;  %v416_v12 = vsel %vm4219_vm4, %v411_v51, %v415_v31  ;;  %v447_v22 = vshll.u32 %v4383_v47, 16  ;;  %v434_v21 = vor.u32 %v433_v60, %v430_v58  ;;  %v4420_v51 = vld [vmem:[%s4172_s24 + $0x74] sm:$0x1] }
  0x3a   : > { %v443_v29 = vrot.slane %v441_v63, 4  ;;  %v3154_v30 = vrot.slane %v4197_v16, 9  ;;  %v1203_v35 = vrot.slane %v4200_v18, 5  ;;  %v421_v31 = vrot.slane %v420_v17, 4 }
  0x3b   : > { %5161 = vst [vmem:[#allocation8_spill] sm:$0xff] %v4393_v0  ;;  %3614 = vmatmul.mubr.msk.bf16.gmra.mrb[8].mxu0 %vm669_vm3, %v4393_v0  ;;  %3481 = vmatprep.mubr.msk.bf16.mxu1 %vm669_vm3, %v4393_v0  ;;  %v449_v37 = vrot.slane %v447_v22, 5  ;;  %v452_v40 = vshrl.u32 %v4391_v54, 16  ;;  %v455_v41 = vshll.u32 %v4391_v54, 16  ;;  %v435_v44 = vrot.slane %v434_v21, 4 }
  0x3c   : > { %v444_v49 = vor.u32 %v443_v29, %v439_v61  ;;  %v1204_v16 = vsel %vm4400_vm7, %v3154_v30, %v1203_v35  ;;  %v1205_v18 = vrot.slane %v1203_v35, 4  ;;  %v426_v50 = vsel %vm4219_vm4, %v421_v31, %v425_v56  ;;  %v4432_v56 = vld [vmem:[%s4172_s24 + $0x78] sm:$0xf]  ;;  %v4448_v31 = vld [vmem:[%s4172_s24 + $0x7c] sm:$0xf] }
  0x3d   : > { %v454_v55 = vrot.slane %v452_v40, 4  ;;  %v457_v58 = vrot.slane %v455_v41, 5  ;;  %v461_v59 = vshll.u32 %v4407_v36, 16  ;;  %v4423_v60 = vcombine.low %v416_v12, %v426_v50 }
  0x3e   : > { %v440_v63 = vsel %vm4219_vm4, %v435_v44, %v439_v61  ;;  %v445_v17 = vrot.slane %v444_v49, 4  ;;  %v1207_v22 = vsel %vm4400_vm7, %v1205_v18, %v1206_v45  ;;  %v465_v35 = vshrl.u32 %v4407_v36, 16  ;;  %v4453_v49 = vld [vmem:[%s4172_s24 + $0x80] sm:$0x1] }
  0x3f   : > { %5164 = vst [vmem:[#allocation9_spill] sm:$0xff] %v4423_v60  ;;  %v4434_v21 = vcombine.low %v1204_v16, %v1207_v22  ;;  %v458_v29 = vor.u32 %v457_v58, %v454_v55  ;;  %v463_v30 = vrot.slane %v461_v59, 5  ;;  %3617 = vmatprep.mubr.msk.bf16.mxu0 %vm669_vm3, %v4423_v60  ;;  %3482 = vmatmul.mubr.msk.bf16.gmra.mrb[12].mxu1 %vm669_vm3, %v4423_v60  ;;  %v471_v45 = vshll.u32 %v4420_v51, 16  ;;  %v4551_v60 = vld [vmem:[%s4172_s24 + $0x9c] sm:$0xf] }
  0x40   : > { %v450_v19 = vsel %vm4219_vm4, %v445_v17, %v449_v37  ;;  %v3155_v61 = vrot.slane %v4215_v33, 9  ;;  %v1212_v12 = vrot.slane %v1210_v1, 4  ;;  %v467_v44 = vrot.slane %v465_v35, 4 }
  0x41   : > { %5165 = vst [vmem:[#allocation10_spill] sm:$0xff] %v4434_v21  ;;  %v4450_v40 = vcombine.low %v440_v63, %v450_v19  ;;  %v459_v41 = vrot.slane %v458_v29, 4  ;;  %v476_v16 = vshrl.u32 %v4432_v56, 16  ;;  %v473_v18 = vrot.slane %v471_v45, 5  ;;  %v4479_v29 = vld [vmem:[%s4172_s24 + $0x84] sm:$0xf] }
  0x42   : > { %v1211_v37 = vsel %vm4400_vm7, %v3155_v61, %v1210_v1  ;;  %v1214_v50 = vsel %vm4400_vm7, %v1212_v12, %v1213_v2  ;;  %v479_v55 = vshll.u32 %v4432_v56, 16  ;;  %v468_v59 = vor.u32 %v467_v44, %v463_v30 }
  0x43   : > { %5166 = vst [vmem:[#allocation11_spill] sm:$0xff] %v4450_v40  ;;  %3618 = vmatmul.mubr.msk.bf16.gmra.mrb[12].mxu0 %vm669_vm3, %v4450_v40  ;;  %3485 = vmatprep.mubr.msk.bf16.mxu1 %vm669_vm3, %v4450_v40  ;;  %v464_v58 = vsel %vm4219_vm4, %v459_v41, %v463_v30  ;;  %v4471_v63 = vcombine.low %v1211_v37, %v1214_v50  ;;  %v478_v1 = vrot.slane %v476_v16, 4  ;;  %v485_v2 = vshll.u32 %v4448_v31, 16  ;;  %v4485_v16 = vld [vmem:[%s4172_s24 + $0x88] sm:$0xf] }
  0x44   : > { %3639 = vmatprep.mubr.msk.bf16.mxu0 %vm669_vm3, %v4434_v21  ;;  %v481_v46 = vrot.slane %v479_v55, 5  ;;  %v489_v17 = vshrl.u32 %v4448_v31, 16  ;;  %v495_v22 = vshll.u32 %v4453_v49, 16  ;;  %v469_v35 = vrot.slane %v468_v59, 4 }
  0x45   : > { %5167 = vst [vmem:[#allocation12_spill] sm:$0xff] %v4471_v63  ;;  %v3156_v30 = vrot.slane %v4242_v57, 9  ;;  %v1217_v19 = vrot.slane %v4247_v62, 5  ;;  %v1220_v45 = vrot.slane %v4255_v4, 5  ;;  %v487_v12 = vrot.slane %v485_v2, 5 }
  0x46   : > { %v482_v61 = vor.u32 %v481_v46, %v478_v1  ;;  %v491_v41 = vrot.slane %v489_v17, 4  ;;  %v497_v44 = vrot.slane %v495_v22, 5  ;;  %v474_v37 = vsel %vm4219_vm4, %v469_v35, %v473_v18  ;;  %v4495_v1 = vld [vmem:[%s4172_s24 + $0x8c] sm:$0x1] }
  0x47   : > { %v1218_v50 = vsel %vm4400_vm7, %v3156_v30, %v1217_v19  ;;  %v1219_v55 = vrot.slane %v1217_v19, 4  ;;  %v500_v59 = vshrl.u32 %v4479_v29, 16  ;;  %v4492_v3 = vcombine.low %v464_v58, %v474_v37 }
  0x48   : > { %v483_v40 = vrot.slane %v482_v61, 4  ;;  %v492_v4 = vor.u32 %v491_v41, %v487_v12  ;;  %v503_v46 = vshll.u32 %v4479_v29, 16  ;;  %v509_v18 = vshll.u32 %v4485_v16, 16  ;;  %v4509_v61 = vld [vmem:[%s4172_s24 + $0x90] sm:$0xf] }
  0x49   : > { %5168 = vst [vmem:[#allocation13_spill] sm:$0xff] %v4492_v3  ;;  %v1221_v2 = vsel %vm4400_vm7, %v1219_v55, %v1220_v45  ;;  %v502_v17 = vrot.slane %v500_v59, 4  ;;  %v513_v22 = vshrl.u32 %v4485_v16, 16  ;;  %3486 = vmatmul.mubr.msk.bf16.gmra.mrb[16].mxu1 %vm669_vm3, %v4492_v3  ;;  %v4514_v45 = vld [vmem:[%s5120_s1 + $0xe] sm:$0x3]  ;;  %v1224_v59 = vrot.slane %v4273_v28, 5 }
  0x4a   : > { %v488_v58 = vsel %vm4219_vm4, %v483_v40, %v487_v12  ;;  %v493_v35 = vrot.slane %v492_v4, 4  ;;  %v4506_v30 = vcombine.low %v1218_v50, %v1221_v2  ;;  %v505_v19 = vrot.slane %v503_v46, 5  ;;  %5170 = vst [vmem:[#allocation15_spill] sm:$0xff] %v4514_v45  ;;  %v4528_v46 = vld [vmem:[%s4172_s24 + $0x94] sm:$0xf] }
  0x4b   : > { %3640 = vmatmul.mubr.msk.bf16.vlgmr.msra.gmra.mrb[0].mxu0 %vm669_vm3, %v4471_v63  ;;  %v511_v41 = vrot.slane %v509_v18, 5  ;;  %v515_v37 = vrot.slane %v513_v22, 4  ;;  %v519_v40 = vshll.u32 %v4495_v1, 16  ;;  %v3157_v12 = vrot.slane %v4261_v14, 9  ;;  %v4533_v3 = vld [vmem:[%s4172_s24 + $0x98] sm:$0x1] }
  0x4c   : > { %5169 = vst [vmem:[#allocation14_spill] sm:$0xff] %v4506_v30  ;;  %3672 = vmatpush3.bf16.msra.mxu0 %v4207_v20  ;;  %v498_v50 = vsel %vm4219_vm4, %v493_v35, %v497_v44  ;;  %3643 = vmatprep.mubr.msk.bf16.mxu0 %vm669_vm3, %v4506_v30  ;;  %v506_v55 = vor.u32 %v505_v19, %v502_v17  ;;  %v1227_v4 = vrot.slane %v4280_v32, 5  ;;  %v524_v20 = vshrl.u32 %v4509_v61, 16 }
  0x4d   : > { %v4530_v2 = vcombine.low %v488_v58, %v498_v50  ;;  %v516_v18 = vor.u32 %v515_v37, %v511_v41  ;;  %v521_v22 = vrot.slane %v519_v40, 5  ;;  %4039 = vmatprep.subr.msk.bf16.mxu0 %vm718_vm0, %v4514_v45  ;;  %v1225_v17 = vsel %vm4400_vm7, %v3157_v12, %v1224_v59 }
  0x4e   : > { %v507_v44 = vrot.slane %v506_v55, 4  ;;  %v1226_v35 = vrot.slane %v1224_v59, 4  ;;  %v527_v32 = vshll.u32 %v4509_v61, 16  ;;  %v526_v19 = vrot.slane %v524_v20, 4 }
  0x4f   : > { %5171 = vst [vmem:[#allocation16_spill] sm:$0xff] %v4530_v2  ;;  %3489 = vmatprep.mubr.msk.bf16.mxu1 %vm669_vm3, %v4530_v2  ;;  %v517_v58 = vrot.slane %v516_v18, 4  ;;  %v533_v37 = vshll.u32 %v4528_v46, 16  ;;  %v537_v40 = vshrl.u32 %v4528_v46, 16  ;;  %v543_v59 = vshll.u32 %v4533_v3, 16 }
  0x50   : > { %v512_v50 = vsel %vm4219_vm4, %v507_v44, %v511_v41  ;;  %v1228_v55 = vsel %vm4400_vm7, %v1226_v35, %v1227_v4  ;;  %v529_v12 = vrot.slane %v527_v32, 5  ;;  %v3158_v4 = vrot.slane %v4288_v48, 9 }
  0x51   : > { %v522_v2 = vsel %vm4219_vm4, %v517_v58, %v521_v22  ;;  %v4555_v18 = vcombine.low %v1225_v17, %v1228_v55  ;;  %v535_v20 = vrot.slane %v533_v37, 5  ;;  %v539_v0 = vrot.slane %v537_v40, 4  ;;  %v4571_v58 = vld [vmem:[%s4172_s24 + $0xa4] sm:$0x1] }
  0x52   : > { %v4560_v43 = vcombine.low %v512_v50, %v522_v2  ;;  %v530_v41 = vor.u32 %v529_v12, %v526_v19  ;;  %v545_v44 = vrot.slane %v543_v59, 5  ;;  %v1231_v32 = vrot.slane %v4296_v52, 5 }
  0x53   : > { %5172 = vst [vmem:[#allocation17_spill] sm:$0xff] %v4555_v18  ;;  %3644 = vmatmul.mubr.msk.bf16.gmra.mrb[4].mxu0 %vm669_vm3, %v4555_v18  ;;  %v540_v35 = vor.u32 %v539_v0, %v535_v20  ;;  %v1234_v22 = vrot.slane %v4308_v5, 5  ;;  %v548_v17 = vshrl.u32 %v4551_v60, 16  ;;  %v551_v19 = vshll.u32 %v4551_v60, 16 }
  0x54   : > { %5173 = vst [vmem:[#allocation18_spill] sm:$0xff] %v4560_v43  ;;  %3490 = vmatmul.mubr.msk.bf16.gmra.mrb[20].mxu1 %vm669_vm3, %v4560_v43  ;;  %v531_v2 = vrot.slane %v530_v41, 4  ;;  %v557_v37 = vshll.u32 %v4558_v7, 16  ;;  %v561_v0 = vshrl.u32 %v4558_v7, 16  ;;  %v1232_v5 = vsel %vm4400_vm7, %v3158_v4, %v1231_v32 }
  0x55   : > { %v541_v40 = vrot.slane %v540_v35, 4  ;;  %v1233_v50 = vrot.slane %v1231_v32, 4  ;;  %v550_v55 = vrot.slane %v548_v17, 4  ;;  %v553_v59 = vrot.slane %v551_v19, 5  ;;  %v4590_v32 = vld [vmem:[%s4172_s24 + $0xac] sm:$0xf] }
  0x56   : > { %v536_v12 = vsel %vm4219_vm4, %v531_v2, %v535_v20  ;;  %v559_v41 = vrot.slane %v557_v37, 5  ;;  %v563_v43 = vrot.slane %v561_v0, 4  ;;  %v567_v35 = vshll.u32 %v4571_v58, 16 }
  0x57   : > { %v546_v53 = vsel %vm4219_vm4, %v541_v40, %v545_v44  ;;  %v1235_v18 = vsel %vm4400_vm7, %v1233_v50, %v1234_v22  ;;  %v3159_v4 = vrot.slane %v4313_v13, 9  ;;  %v554_v2 = vor.u32 %v553_v59, %v550_v55 }
  0x58   : > { %v4592_v17 = vcombine.low %v536_v12, %v546_v53  ;;  %v4594_v20 = vcombine.low %v1232_v5, %v1235_v18  ;;  %v564_v19 = vor.u32 %v563_v43, %v559_v41  ;;  %v569_v37 = vrot.slane %v567_v35, 5  ;;  %v4604_v18 = vld [vmem:[%s4172_s24 + $0xb0] sm:$0x1] }
  0x59   : > { %v1238_v0 = vrot.slane %v4320_v24, 5  ;;  %v1241_v44 = vrot.slane %v4337_v8, 5  ;;  %v572_v22 = vshrl.u32 %v4581_v25, 16  ;;  %v555_v53 = vrot.slane %v554_v2, 4 }
  0x5a   : > { %5174 = vst [vmem:[#allocation19_spill] sm:$0xff] %v4592_v17  ;;  %5175 = vst [vmem:[#allocation20_spill] sm:$0xff] %v4594_v20  ;;  %3493 = vmatprep.mubr.msk.bf16.mxu1 %vm669_vm3, %v4592_v17  ;;  %3647 = vmatprep.mubr.msk.bf16.mxu0 %vm669_vm3, %v4594_v20  ;;  %v565_v40 = vrot.slane %v564_v19, 4  ;;  %v575_v43 = vshll.u32 %v4581_v25, 16  ;;  %v581_v5 = vshll.u32 %v4590_v32, 16  ;;  %v585_v12 = vshrl.u32 %v4590_v32, 16 }
  0x5b   : > { %v1239_v8 = vsel %vm4400_vm7, %v3159_v4, %v1238_v0  ;;  %v1240_v50 = vrot.slane %v1238_v0, 4  ;;  %v574_v55 = vrot.slane %v572_v22, 4  ;;  %v560_v59 = vsel %vm4219_vm4, %v555_v53, %v559_v41  ;;  %v4616_v17 = vld [vmem:[%s4172_s24 + $0xb4] sm:$0xf]  ;;  %v4628_v53 = vld [vmem:[%s4172_s24 + $0xb8] sm:$0xf] }
  0x5c   : > { %v570_v35 = vsel %vm4219_vm4, %v565_v40, %v569_v37  ;;  %v577_v2 = vrot.slane %v575_v43, 5  ;;  %v583_v19 = vrot.slane %v581_v5, 5  ;;  %v587_v0 = vrot.slane %v585_v12, 4 }
  0x5d   : > { %v4618_v20 = vcombine.low %v560_v59, %v570_v35  ;;  %v1242_v4 = vsel %vm4400_vm7, %v1240_v50, %v1241_v44  ;;  %v591_v22 = vshll.u32 %v4604_v18, 16  ;;  %v3160_v41 = vrot.slane %v4342_v42, 9  ;;  %v4634_v44 = vld [vmem:[%s4172_s24 + $0xbc] sm:$0x1] }
  0x5e   : > { %v4623_v30 = vcombine.low %v1239_v8, %v1242_v4  ;;  %v578_v63 = vor.u32 %v577_v2, %v574_v55  ;;  %v1245_v37 = vrot.slane %v4347_v6, 5  ;;  %v588_v40 = vor.u32 %v587_v0, %v583_v19 }
  0x5f   : > { %5176 = vst [vmem:[#allocation21_spill] sm:$0xff] %v4618_v20  ;;  %3494 = vmatmul.mubr.msk.bf16.gmra.mrb[24].mxu1 %vm669_vm3, %v4618_v20  ;;  %v593_v43 = vrot.slane %v591_v22, 5  ;;  %v1248_v5 = vrot.slane %v4360_v11, 5  ;;  %v596_v50 = vshrl.u32 %v4616_v17, 16  ;;  %v599_v59 = vshll.u32 %v4616_v17, 16 }
  0x60   : > { %5177 = vst [vmem:[#allocation22_spill] sm:$0xff] %v4623_v30  ;;  %3648 = vmatmul.mubr.msk.bf16.gmra.mrb[8].mxu0 %vm669_vm3, %v4623_v30  ;;  %v579_v8 = vrot.slane %v578_v63, 4  ;;  %v1246_v55 = vsel %vm4400_vm7, %v3160_v41, %v1245_v37  ;;  %v1247_v12 = vrot.slane %v1245_v37, 4  ;;  %v589_v35 = vrot.slane %v588_v40, 4 }
  0x61   : > { %v598_v2 = vrot.slane %v596_v50, 4  ;;  %v605_v4 = vshll.u32 %v4628_v53, 16  ;;  %v609_v11 = vshrl.u32 %v4628_v53, 16  ;;  %v601_v20 = vrot.slane %v599_v59, 5 }
  0x62   : > { %v584_v0 = vsel %vm4219_vm4, %v579_v8, %v583_v19  ;;  %v1249_v22 = vsel %vm4400_vm7, %v1247_v12, %v1248_v5  ;;  %v615_v63 = vshll.u32 %v4634_v44, 16  ;;  %v594_v41 = vsel %vm4219_vm4, %v589_v35, %v593_v43 }
  0x63   : > { %v4651_v37 = vcombine.low %v1246_v55, %v1249_v22  ;;  %v607_v40 = vrot.slane %v605_v4, 5  ;;  %v611_v50 = vrot.slane %v609_v11, 4  ;;  %v4653_v30 = vcombine.low %v584_v0, %v594_v41 }
  0x64   : > { %v602_v21 = vor.u32 %v601_v20, %v598_v2  ;;  %v617_v45 = vrot.slane %v615_v63, 5  ;;  %v3161_v42 = vrot.slane %v4364_v15, 9  ;;  %v1252_v5 = vrot.slane %v4369_v27, 5 }
  0x65   : > { %3651 = vmatprep.mubr.msk.bf16.mxu0 %vm669_vm3, %v4651_v37  ;;  %v612_v19 = vor.u32 %v611_v50, %v607_v40  ;;  %v1255_v8 = vrot.slane %v4383_v47, 5  ;;  %v3162_v43 = vrot.slane %v4391_v54, 9  ;;  %3497 = vmatprep.mubr.msk.bf16.mxu1 %vm669_vm3, %v4653_v30  ;;  %v3121_v20 = vcombine.low %v4186_v9, %v4189_v10 }
  0x66   : > { %v603_v55 = vrot.slane %v602_v21, 4  ;;  %v1259_v12 = vrot.slane %v4407_v36, 5  ;;  %v1262_v59 = vrot.slane %v4420_v51, 5  ;;  %v1253_v2 = vsel %vm4400_vm7, %v3161_v42, %v1252_v5 }
  0x67   : > { %v613_v35 = vrot.slane %v612_v19, 4  ;;  %v1254_v4 = vrot.slane %v1252_v5, 4  ;;  %v1266_v47 = vrot.slane %v4448_v31, 5  ;;  %v3163_v9 = vrot.slane %v4432_v56, 9 }
  0x68   : > { %v608_v11 = vsel %vm4219_vm4, %v603_v55, %v607_v40  ;;  %v1260_v21 = vsel %vm4400_vm7, %v3162_v43, %v1259_v12  ;;  %v1261_v0 = vrot.slane %v1259_v12, 4  ;;  %v1269_v42 = vrot.slane %v4453_v49, 5 }
  0x69   : > { %v618_v10 = vsel %vm4219_vm4, %v613_v35, %v617_v45  ;;  %v1256_v51 = vsel %vm4400_vm7, %v1254_v4, %v1255_v8  ;;  %v1268_v22 = vrot.slane %v1266_v47, 4  ;;  %v3164_v19 = vrot.slane %v4479_v29, 9 }
  0x6a   : > { %v4680_v63 = vcombine.low %v608_v11, %v618_v10  ;;  %v4682_v41 = vcombine.low %v1253_v2, %v1256_v51  ;;  %v1263_v40 = vsel %vm4400_vm7, %v1261_v0, %v1262_v59  ;;  %v1273_v5 = vrot.slane %v4485_v16, 5 }
  0x6b   : > { %v4686_v50 = vcombine.low %v1260_v21, %v1263_v40  ;;  %v1276_v49 = vrot.slane %v4495_v1, 5  ;;  %v1267_v45 = vsel %vm4400_vm7, %v3163_v9, %v1266_v47  ;;  %v1270_v8 = vsel %vm4400_vm7, %v1268_v22, %v1269_v42 }
  0x6c   : > { %3498 = vmatmul.mubr.msk.bf16.gmra.mrb[28].mxu1 %vm669_vm3, %v4680_v63  ;;  %3652 = vmatmul.mubr.msk.bf16.gmra.mrb[12].mxu0 %vm669_vm3, %v4682_v41  ;;  %v1275_v43 = vrot.slane %v1273_v5, 4  ;;  %v1280_v55 = vrot.slane %v4528_v46, 5  ;;  %v1287_v12 = vrot.slane %v4558_v7, 5  ;;  %v1274_v59 = vsel %vm4400_vm7, %v3164_v19, %v1273_v5 }
  0x6d   : > { %3503 = vmatprep.mubr.msk.bf16.mxu1 %vm669_vm3, %v3121_v20  ;;  %3655 = vmatprep.mubr.msk.bf16.mxu0 %vm669_vm3, %v4686_v50  ;;  %v4708_v20 = vcombine.low %v1267_v45, %v1270_v8  ;;  %v3165_v35 = vrot.slane %v4509_v61, 9  ;;  %v1283_v4 = vrot.slane %v4533_v3, 5  ;;  %v4714_v47 = vcombine.low %v4215_v33, %v4228_v39  ;;  %v4726_v3 = vld [vmem:[%s5120_s1 + $0x6] sm:$0x3] }
  0x6e   : > { %v1277_v1 = vsel %vm4400_vm7, %v1275_v43, %v1276_v49  ;;  %v1282_v2 = vrot.slane %v1280_v55, 4  ;;  %v3166_v11 = vrot.slane %v4551_v60, 9  ;;  %v1405_v21 = vsel %vm718_vm0, %v4268_v23, 0 }
  0x6f   : > { %v4719_v0 = vcombine.low %v1274_v59, %v1277_v1  ;;  %v1289_v9 = vrot.slane %v1287_v12, 4  ;;  %v1290_v10 = vrot.slane %v4571_v58, 5  ;;  %v1294_v51 = vrot.slane %v4590_v32, 5 }
  0x70   : > { %v1281_v33 = vsel %vm4400_vm7, %v3165_v35, %v1280_v55  ;;  %v1284_v39 = vsel %vm4400_vm7, %v1282_v2, %v1283_v4  ;;  %v4740_v23 = vcombine.low %v4242_v57, %v4247_v62  ;;  %v1288_v58 = vsel %vm4400_vm7, %v3166_v11, %v1287_v12 }
  0x71   : > { %v4746_v22 = vcombine.low %v4364_v15, %v4369_v27  ;;  %v1291_v42 = vsel %vm4400_vm7, %v1289_v9, %v1290_v10  ;;  %v3167_v40 = vrot.slane %v4581_v25, 9  ;;  %v1301_v19 = vrot.slane %v4628_v53, 5 }
  0x72   : > { %v4756_v57 = vcombine.low %v4391_v54, %v4407_v36  ;;  %v4760_v62 = vcombine.low %v1281_v33, %v1284_v39  ;;  %v1296_v15 = vrot.slane %v1294_v51, 4  ;;  %v1297_v27 = vrot.slane %v4604_v18, 5  ;;  %v227_v18 = vld [vmem:[%s4172_s24 + $0xc8] sm:$0x1] }
  0x73   : > { %v4765_v5 = vcombine.low %v4432_v56, %v4448_v31  ;;  %v4769_v49 = vcombine.low %v4479_v29, %v4485_v16  ;;  %v4773_v54 = vcombine.low %v4509_v61, %v4528_v46  ;;  %v4777_v36 = vcombine.low %v4551_v60, %v4558_v7  ;;  %v4796_v61 = vld [vmem:[%s4172_s24 + $0xc4] sm:$0xf] }
  0x74   : > { %3504 = vmatmul.mubr.msk.bf16.vlgmr.msra.gmra.mrb[0].mxu1 %vm669_vm3, %v4225_v38  ;;  %3656 = vmatmul.mubr.msk.bf16.gmra.mrb[16].mxu0 %vm669_vm3, %v4708_v20  ;;  %v4781_v45 = vcombine.low %v4581_v25, %v4590_v32  ;;  %v4785_v56 = vcombine.low %v4261_v14, %v4273_v28  ;;  %v4787_v31 = vcombine.low %v1288_v58, %v1291_v42  ;;  %v3168_v16 = vrot.slane %v4616_v17, 9  ;;  %v5178_v42 = vld [vmem:[#allocation5_spill] sm:$0xff] }
  0x75   : > { %3536 = vmatpush3.bf16.msra.mxu1 %v1405_v21  ;;  %3507 = vmatprep.mubr.msk.bf16.mxu1 %vm669_vm3, %v4714_v47  ;;  %v4791_v29 = vcombine.low %v4616_v17, %v4628_v53  ;;  %v1303_v7 = vrot.slane %v1301_v19, 4  ;;  %v1304_v60 = vrot.slane %v4634_v44, 5  ;;  %v1295_v14 = vsel %vm4400_vm7, %v3167_v40, %v1294_v51  ;;  %v4816_v17 = vld [vmem:[%s4172_s24 + $0xc0] sm:$0xf] }
  0x76   : > { %3659 = vmatprep.mubr.msk.bf16.mxu0 %vm669_vm3, %v4719_v0  ;;  %4034 = vmatprep.subr.msk.bf16.mxu1 %vm718_vm0, %v4726_v3  ;;  %v1298_v28 = vsel %vm4400_vm7, %v1296_v15, %v1297_v27  ;;  %v2037_v25 = vrot.slane %v4796_v61, 5  ;;  %v1302_v46 = vsel %vm4400_vm7, %v3168_v16, %v1301_v19  ;;  %v4821_v53 = vcombine.low %v4288_v48, %v4296_v52 }
  0x77   : > { %v1305_v32 = vsel %vm4400_vm7, %v1303_v7, %v1304_v60  ;;  %v4823_v44 = vcombine.low %v1295_v14, %v1298_v28  ;;  %v4827_v8 = vcombine.low %v4313_v13, %v4320_v24  ;;  %v1807_v43 = vshrl.u32 %v4816_v17, 16  ;;  %v3294_v60 = vld [vmem:[%s5120_s1 + $0x10] sm:$0x3]  ;;  %v4084_v14 = vld [vmem:[%s4172_s24 + $0x4] sm:$0xf] }
  0x78   : > { %v1810_v55 = vshll.u32 %v4816_v17, 16  ;;  %v1816_v12 = vshll.u32 %v4796_v61, 16  ;;  %v1820_v59 = vshrl.u32 %v4796_v61, 16  ;;  %v4833_v1 = vcombine.low %v1302_v46, %v1305_v32  ;;  %v4086_v32 = vld [vmem:[%s4172_s24] sm:$0xf] }
  0x79   : > { %v3238_v35 = vrot.slane %v4816_v17, 9  ;;  %v2039_v48 = vrot.slane %v2037_v25, 4  ;;  %v2040_v52 = vrot.slane %v227_v18, 5  ;;  %v1809_v2 = vrot.slane %v1807_v43, 4 }
  0x7a   : > { %v1812_v4 = vrot.slane %v1810_v55, 5  ;;  %v1818_v11 = vrot.slane %v1816_v12, 5  ;;  %v1822_v21 = vrot.slane %v1820_v59, 4  ;;  %v1826_v9 = vshll.u32 %v227_v18, 16 }
  0x7b   : > { %v2038_v10 = vsel %vm4400_vm7, %v3238_v35, %v2037_v25  ;;  %v2041_v51 = vsel %vm4400_vm7, %v2039_v48, %v2040_v52  ;;  %v4850_v40 = vcombine.low %v5178_v42, %v4347_v6  ;;  %v5179_v6 = vld [vmem:[#allocation15_spill] sm:$0xff]  ;;  %v1196_v28 = vrot.slane %v4084_v14, 5  ;;  %v5180_v48 = vld [vmem:[#allocation10_spill] sm:$0xff]  ;;  %v5181_v52 = vld [vmem:[#allocation12_spill] sm:$0xff] }
  0x7c   : > { %3508 = vmatmul.mubr.msk.bf16.gmra.mrb[4].mxu1 %vm669_vm3, %v4740_v23  ;;  %3660 = vmatmul.mubr.msk.bf16.gmra.mrb[20].mxu0 %vm669_vm3, %v4760_v62  ;;  %v1813_v13 = vor.u32 %v1812_v4, %v1809_v2  ;;  %v1823_v24 = vor.u32 %v1822_v21, %v1818_v11  ;;  %v1828_v58 = vrot.slane %v1826_v9, 5  ;;  %v4852_v19 = vcombine.low %v2038_v10, %v2041_v51  ;;  %v4085_v25 = vld [vmem:[%s4172_s24 + $0x8] sm:$0x1]  ;;  %v5183_v4 = vld [vmem:[#allocation17_spill] sm:$0xff]  ;;  %v5184_v21 = vld [vmem:[#allocation20_spill] sm:$0xff] }
  0x7d   : > { %3511 = vmatprep.mubr.msk.bf16.mxu1 %vm669_vm3, %v4785_v56  ;;  %3663 = vmatprep.mubr.msk.bf16.mxu0 %vm669_vm3, %v4787_v31  ;;  %v2485_v7 = vsel %vm718_vm0, %v5179_v6, 0  ;;  %v1199_v46 = vrot.slane %v4085_v25, 5  ;;  %v3153_v18 = vrot.slane %v4086_v32, 9  ;;  %v1198_v43 = vrot.slane %v1196_v28, 4  ;;  %v4087_v2 = vld [vmem:[%s5120_s1 + $0x8] sm:$0x3] }
  0x7e   : > { %v1814_v33 = vrot.slane %v1813_v13, 4  ;;  %v1824_v39 = vrot.slane %v1823_v24, 4  ;;  %v1611_v35 = vsel %vm718_vm0, %v4726_v3, 0  ;;  %v5182_v3 = vld [vmem:[#allocation14_spill] sm:$0xff]  ;;  %v4947_v24 = vld [vmem:[%s4172_s24 + $0xcc] sm:$0xf] }
  0x7f   : > { %v1197_v55 = vsel %vm4400_vm7, %v3153_v18, %v1196_v28  ;;  %v1200_v12 = vsel %vm4400_vm7, %v1198_v43, %v1199_v46  ;;  %v5185_v13 = vld [vmem:[#allocation22_spill] sm:$0xff]  ;;  %v4950_v9 = vld [vmem:[%s4172_s24 + $0xd0] sm:$0xf]  ;;  %v2697_v10 = vsel %vm718_vm0, %v3294_v60, 0  ;;  %v5191_v42 = vld [vmem:[#allocation9_spill] sm:$0xff]  ;;  %v2456_v14 = vshll.u32 %v4947_v24, 16 }
  0x80   : > { %v1819_v15 = vsel %vm4219_vm4, %v1814_v33, %v1818_v11  ;;  %v1829_v27 = vsel %vm4219_vm4, %v1824_v39, %v1828_v58  ;;  %v3170_v59 = vcombine.low %v1197_v55, %v1200_v12  ;;  %v4936_v11 = vcombine.low %v4816_v17, %v4796_v61  ;;  %v5186_v17 = vld [vmem:[#allocation3_spill] sm:$0xff]  ;;  %v5187_v51 = vld [vmem:[#allocation4_spill] sm:$0xff]  ;;  %v5188_v33 = vld [vmem:[#allocation6_spill] sm:$0xff] }
  0x81   : > { %v4858_v16 = vcombine.low %v1819_v15, %v1829_v27  ;;  %v3258_v61 = vcombine.low %v4947_v24, %v4950_v9  ;;  %v5189_v39 = vld [vmem:[#allocation7_spill] sm:$0xff]  ;;  %v5190_v58 = vld [vmem:[#allocation8_spill] sm:$0xff]  ;;  %v5193_v27 = vld [vmem:[#allocation13_spill] sm:$0xff]  ;;  %v2466_v28 = vshrl.u32 %v4950_v9, 16  ;;  %v2458_v32 = vrot.slane %v2456_v14, 5 }
  0x82   : > { %v5192_v15 = vld [vmem:[#allocation11_spill] sm:$0xff]  ;;  %v5194_v6 = vld [vmem:[#allocation16_spill] sm:$0xff]  ;;  %v5196_v25 = vld [vmem:[#allocation2_spill] sm:$0xff]  ;;  %v2683_v34 = vrot.slane %v4950_v9, 5 }
  0x83   : > { %v5197_v46 = vld [vmem:[#allocation19_spill] sm:$0xff]  ;;  %v2468_v43 = vrot.slane %v2466_v28, 4  ;;  %v230_v55 = vld [vmem:[%s4172_s24 + $0xd4] sm:$0x1]  ;;  %v5198_v12 = vld [vmem:[#allocation21_spill] sm:$0xff] }
  0x84   : > { %3512 = vmatmul.mubr.msk.bf16.gmra.mrb[8].mxu1 %vm669_vm3, %v4821_v53  ;;  %3664 = vmatmul.mubr.msk.bf16.gmra.mrb[24].mxu0 %vm669_vm3, %v4823_v44 }
  0x85   : > { %3515 = vmatprep.mubr.msk.bf16.mxu1 %vm669_vm3, %v4827_v8  ;;  %3667 = vmatprep.mubr.msk.bf16.mxu0 %vm669_vm3, %v4833_v1 }
  0x8c   : > { %3516 = vmatmul.mubr.msk.bf16.gmra.mrb[12].mxu1 %vm669_vm3, %v4850_v40  ;;  %3668 = vmatmul.mubr.msk.bf16.gmra.mrb[28].mxu0 %vm669_vm3, %v4852_v19 }
  0x8d   : > { %3519 = vmatprep.mubr.msk.bf16.mxu1 %vm669_vm3, %v4746_v22  ;;  %3673 = vmatprep.mubr.msk.bf16.mxu0 %vm669_vm3, %v4714_v47 }
  0x94   : > { %3520 = vmatmul.mubr.msk.bf16.gmra.mrb[16].mxu1 %vm669_vm3, %v4756_v57  ;;  %3674 = vmatmul.mubr.msk.bf16.vlgmr.msra.gmra.mrb[0].mxu0 %vm669_vm3, %v4740_v23 }
  0x95   : > { %3706 = vmatpush3.bf16.msra.mxu0 %v2485_v7  ;;  %3523 = vmatprep.mubr.msk.bf16.mxu1 %vm669_vm3, %v4765_v5  ;;  %v5195_v7 = vld [vmem:[#allocation18_spill] sm:$0xff] }
  0x96   : > { %3677 = vmatprep.mubr.msk.bf16.mxu0 %vm669_vm3, %v4785_v56  ;;  %4040 = vmatprep.subr.msk.bf16.mxu0 %vm718_vm0, %v3294_v60  ;;  %v2453_v60 = vshrl.u32 %v4947_v24, 16 }
  0x9c   : > { %3524 = vmatmul.mubr.msk.bf16.gmra.mrb[20].mxu1 %vm669_vm3, %v4769_v49  ;;  %3678 = vmatmul.mubr.msk.bf16.gmra.mrb[4].mxu0 %vm669_vm3, %v4821_v53 }
  0x9d   : > { %3527 = vmatprep.mubr.msk.bf16.mxu1 %vm669_vm3, %v4773_v54  ;;  %3681 = vmatprep.mubr.msk.bf16.mxu0 %vm669_vm3, %v4827_v8 }
  0xa4   : > { %3528 = vmatmul.mubr.msk.bf16.gmra.mrb[24].mxu1 %vm669_vm3, %v4777_v36  ;;  %3682 = vmatmul.mubr.msk.bf16.gmra.mrb[8].mxu0 %vm669_vm3, %v4850_v40 }
  0xa5   : > { %3531 = vmatprep.mubr.msk.bf16.mxu1 %vm669_vm3, %v4781_v45  ;;  %3685 = vmatprep.mubr.msk.bf16.mxu0 %vm669_vm3, %v4746_v22 }
  0xac   : > { %3532 = vmatmul.mubr.msk.bf16.gmra.mrb[28].mxu1 %vm669_vm3, %v4791_v29  ;;  %3686 = vmatmul.mubr.msk.bf16.gmra.mrb[12].mxu0 %vm669_vm3, %v4756_v57 }
  0xad   : > { %3537 = vmatprep.mubr.msk.bf16.mxu1 %vm669_vm3, %v3170_v59  ;;  %3689 = vmatprep.mubr.msk.bf16.mxu0 %vm669_vm3, %v4765_v5 }
  0xb4   : > { %3538 = vmatmul.mubr.msk.bf16.vlgmr.msra.gmra.mrb[0].mxu1 %vm669_vm3, %v5180_v48  ;;  %3690 = vmatmul.mubr.msk.bf16.gmra.mrb[16].mxu0 %vm669_vm3, %v4769_v49 }
  0xb5   : > { %3570 = vmatpush3.bf16.msra.mxu1 %v1611_v35  ;;  %3541 = vmatprep.mubr.msk.bf16.mxu1 %vm669_vm3, %v5181_v52  ;;  %v2472_v35 = vshll.u32 %v230_v55, 16 }
  0xb6   : > { %3693 = vmatprep.mubr.msk.bf16.mxu0 %vm669_vm3, %v4773_v54  ;;  %4036 = vmatprep.subr.msk.bf16.mxu1 %vm718_vm0, %v4087_v2 }
  0xbc   : > { %3542 = vmatmul.mubr.msk.bf16.gmra.mrb[4].mxu1 %vm669_vm3, %v5182_v3  ;;  %3694 = vmatmul.mubr.msk.bf16.gmra.mrb[20].mxu0 %vm669_vm3, %v4777_v36 }
  0xbd   : > { %3545 = vmatprep.mubr.msk.bf16.mxu1 %vm669_vm3, %v5183_v4  ;;  %3697 = vmatprep.mubr.msk.bf16.mxu0 %vm669_vm3, %v4781_v45 }
  0xc4   : > { %3546 = vmatmul.mubr.msk.bf16.gmra.mrb[8].mxu1 %vm669_vm3, %v5184_v21  ;;  %3698 = vmatmul.mubr.msk.bf16.gmra.mrb[24].mxu0 %vm669_vm3, %v4791_v29 }
  0xc5   : > { %3549 = vmatprep.mubr.msk.bf16.mxu1 %vm669_vm3, %v5185_v13  ;;  %3701 = vmatprep.mubr.msk.bf16.mxu0 %vm669_vm3, %v4936_v11 }
  0xcc   : > { %3550 = vmatmul.mubr.msk.bf16.gmra.mrb[12].mxu1 %vm669_vm3, %v4651_v37  ;;  %3702 = vmatmul.mubr.msk.bf16.gmra.mrb[28].mxu0 %vm669_vm3, %v3258_v61  ;;  %v2474_v61 = vrot.slane %v2472_v35, 5 }
  0xcd   : > { %3553 = vmatprep.mubr.msk.bf16.mxu1 %vm669_vm3, %v4682_v41  ;;  %3707 = vmatprep.mubr.msk.bf16.mxu0 %vm669_vm3, %v5186_v17 }
  0xd4   : > { %3554 = vmatmul.mubr.msk.bf16.gmra.mrb[16].mxu1 %vm669_vm3, %v4686_v50  ;;  %3708 = vmatmul.mubr.msk.bf16.vlgmr.msra.gmra.mrb[0].mxu0 %vm669_vm3, %v5187_v51 }
  0xd5   : > { %3740 = vmatpush3.bf16.msra.mxu0 %v2697_v10  ;;  %3557 = vmatprep.mubr.msk.bf16.mxu1 %vm669_vm3, %v4708_v20 }
  0xd6   : > { %3711 = vmatprep.mubr.msk.bf16.mxu0 %vm669_vm3, %v5188_v33 }
  0xdc   : > { %3558 = vmatmul.mubr.msk.bf16.gmra.mrb[20].mxu1 %vm669_vm3, %v4719_v0  ;;  %3712 = vmatmul.mubr.msk.bf16.gmra.mrb[4].mxu0 %vm669_vm3, %v5189_v39 }
  0xdd   : > { %3561 = vmatprep.mubr.msk.bf16.mxu1 %vm669_vm3, %v4760_v62  ;;  %3715 = vmatprep.mubr.msk.bf16.mxu0 %vm669_vm3, %v5190_v58 }
  0xe4   : > { %3562 = vmatmul.mubr.msk.bf16.gmra.mrb[24].mxu1 %vm669_vm3, %v4787_v31  ;;  %3716 = vmatmul.mubr.msk.bf16.gmra.mrb[8].mxu0 %vm669_vm3, %v5191_v42 }
  0xe5   : > { %3565 = vmatprep.mubr.msk.bf16.mxu1 %vm669_vm3, %v4823_v44  ;;  %3719 = vmatprep.mubr.msk.bf16.mxu0 %vm669_vm3, %v5192_v15 }
  0xec   : > { %3566 = vmatmul.mubr.msk.bf16.gmra.mrb[28].mxu1 %vm669_vm3, %v4833_v1  ;;  %3720 = vmatmul.mubr.msk.bf16.gmra.mrb[12].mxu0 %vm669_vm3, %v5193_v27 }
  0xed   : > { %3571 = vmatprep.mubr.msk.bf16.mxu1 %vm669_vm3, %v4225_v38  ;;  %3723 = vmatprep.mubr.msk.bf16.mxu0 %vm669_vm3, %v5194_v6  ;;  %v2462_v38 = vshll.u32 %v4950_v9, 16 }
  0xef   : > { %v2464_v18 = vrot.slane %v2462_v38, 5 }
  0xf1   : > { %v2469_v59 = vor.u32 %v2468_v43, %v2464_v18 }
  0xf3   : > { %v2470_v2 = vrot.slane %v2469_v59, 4 }
  0xf4   : > { %3572 = vmatmul.mubr.msk.bf16.vlgmr.msra.gmra.mrb[0].mxu1 %vm669_vm3, %v4714_v47  ;;  %3724 = vmatmul.mubr.msk.bf16.gmra.mrb[16].mxu0 %vm669_vm3, %v5195_v7  ;;  %v2455_v47 = vrot.slane %v2453_v60, 4 }
  0xf5   : > { %3774 = vmatpush3.bf16.msra.mxu1 %v5196_v25  ;;  %3575 = vmatprep.mubr.msk.bf16.mxu1 %vm669_vm3, %v4740_v23 }
  0xf6   : > { %3727 = vmatprep.mubr.msk.bf16.mxu0 %vm669_vm3, %v5197_v46  ;;  %v2459_v23 = vor.u32 %v2458_v32, %v2455_v47 }
  0xf8   : > { %v2460_v48 = vrot.slane %v2459_v23, 4 }
  0xfc   : > { %3576 = vmatmul.mubr.msk.bf16.gmra.mrb[4].mxu1 %vm669_vm3, %v4785_v56  ;;  %3728 = vmatmul.mubr.msk.bf16.gmra.mrb[20].mxu0 %vm669_vm3, %v5198_v12  ;;  %v2465_v56 = vsel %vm4219_vm4, %v2460_v48, %v2464_v18 }
  0xfd   : > { %3579 = vmatprep.mubr.msk.bf16.mxu1 %vm669_vm3, %v4821_v53  ;;  %3731 = vmatprep.mubr.msk.bf16.mxu0 %vm669_vm3, %v4653_v30  ;;  %v2475_v53 = vsel %vm4219_vm4, %v2470_v2, %v2474_v61 }
  0xfe   : > { %v3276_v17 = vcombine.low %v2465_v56, %v2475_v53 }
 0x104   : > { %3580 = vmatmul.mubr.msk.bf16.gmra.mrb[8].mxu1 %vm669_vm3, %v4827_v8  ;;  %3732 = vmatmul.mubr.msk.bf16.gmra.mrb[24].mxu0 %vm669_vm3, %v4680_v63 }
 0x105   : > { %3583 = vmatprep.mubr.msk.bf16.mxu1 %vm669_vm3, %v4850_v40  ;;  %3735 = vmatprep.mubr.msk.bf16.mxu0 %vm669_vm3, %v4858_v16 }
 0x10c   : > { %3584 = vmatmul.mubr.msk.bf16.gmra.mrb[12].mxu1 %vm669_vm3, %v4746_v22  ;;  %3736 = vmatmul.mubr.msk.bf16.gmra.mrb[28].mxu0 %vm669_vm3, %v3276_v17 }
 0x10d   : > { %3587 = vmatprep.mubr.msk.bf16.mxu1 %vm669_vm3, %v4756_v57  ;;  %3741 = vmatprep.mubr.msk.bf16.mxu0 %vm669_vm3, %v5181_v52 }
 0x114   : > { %3588 = vmatmul.mubr.msk.bf16.gmra.mrb[16].mxu1 %vm669_vm3, %v4765_v5  ;;  %3742 = vmatmul.mubr.msk.bf16.vlgmr.msra.gmra.mrb[0].mxu0 %vm669_vm3, %v5182_v3 }
 0x115   : > { %3591 = vmatprep.mubr.msk.bf16.mxu1 %vm669_vm3, %v4769_v49  ;;  %3745 = vmatprep.mubr.msk.bf16.mxu0 %vm669_vm3, %v5183_v4 }
 0x11c   : > { %3592 = vmatmul.mubr.msk.bf16.gmra.mrb[20].mxu1 %vm669_vm3, %v4773_v54  ;;  %3746 = vmatmul.mubr.msk.bf16.gmra.mrb[4].mxu0 %vm669_vm3, %v5184_v21 }
 0x11d   : > { %3595 = vmatprep.mubr.msk.bf16.mxu1 %vm669_vm3, %v4777_v36  ;;  %3749 = vmatprep.mubr.msk.bf16.mxu0 %vm669_vm3, %v5185_v13 }
 0x124   : > { %3596 = vmatmul.mubr.msk.bf16.gmra.mrb[24].mxu1 %vm669_vm3, %v4781_v45  ;;  %3750 = vmatmul.mubr.msk.bf16.gmra.mrb[8].mxu0 %vm669_vm3, %v4651_v37  ;;  %v3293_v37 = vrot.slane %v4947_v24, 9 }
 0x125   : > { %3599 = vmatprep.mubr.msk.bf16.mxu1 %vm669_vm3, %v4791_v29  ;;  %3753 = vmatprep.mubr.msk.bf16.mxu0 %vm669_vm3, %v4682_v41  ;;  %v2685_v41 = vrot.slane %v2683_v34, 4 }
 0x12c   : > { %3600 = vmatmul.mubr.msk.bf16.gmra.mrb[28].mxu1 %vm669_vm3, %v4936_v11  ;;  %3754 = vmatmul.mubr.msk.bf16.gmra.mrb[12].mxu0 %vm669_vm3, %v4686_v50  ;;  %v2686_v50 = vrot.slane %v230_v55, 5 }
 0x12d   : > { %3621 = vmatprep.mubr.msk.bf16.mxu1 %vm669_vm3, %v5193_v27  ;;  %3757 = vmatprep.mubr.msk.bf16.mxu0 %vm669_vm3, %v4708_v20  ;;  %v2684_v20 = vsel %vm4400_vm7, %v3293_v37, %v2683_v34 }
 0x134   : > { %3622 = vmatmul.mubr.msk.bf16.vlgmr.msra.gmra.mrb[16].mxu1 %vm669_vm3, %v5194_v6  ;;  %3758 = vmatmul.mubr.msk.bf16.gmra.mrb[16].mxu0 %vm669_vm3, %v4719_v0  ;;  %v2687_v0 = vsel %vm4400_vm7, %v2685_v41, %v2686_v50 }
 0x135   : > { %3625 = vmatprep.mubr.msk.bf16.mxu1 %vm669_vm3, %v5195_v7  ;;  %3761 = vmatprep.mubr.msk.bf16.mxu0 %vm669_vm3, %v4760_v62  ;;  %v3295_v22 = vcombine.low %v2684_v20, %v2687_v0 }
 0x13c   : > { %3626 = vmatmul.mubr.msk.bf16.gmra.mrb[20].mxu1 %vm669_vm3, %v5197_v46  ;;  %3762 = vmatmul.mubr.msk.bf16.gmra.mrb[20].mxu0 %vm669_vm3, %v4787_v31 }
 0x13d   : > { %3629 = vmatprep.mubr.msk.bf16.mxu1 %vm669_vm3, %v5198_v12  ;;  %3765 = vmatprep.mubr.msk.bf16.mxu0 %vm669_vm3, %v4823_v44 }
 0x144   : > { %3630 = vmatmul.mubr.msk.bf16.gmra.mrb[24].mxu1 %vm669_vm3, %v4653_v30  ;;  %3766 = vmatmul.mubr.msk.bf16.gmra.mrb[24].mxu0 %vm669_vm3, %v4833_v1 }
 0x145   : > { %3633 = vmatprep.mubr.msk.bf16.mxu1 %vm669_vm3, %v4680_v63  ;;  %3769 = vmatprep.mubr.msk.bf16.mxu0 %vm669_vm3, %v4852_v19 }
 0x14c   : > { %3634 = vmatmul.mubr.msk.bf16.gmra.mrb[28].mxu1 %vm669_vm3, %v4858_v16  ;;  %3770 = vmatmul.mubr.msk.bf16.gmra.mrb[28].mxu0 %vm669_vm3, %v3295_v22 }
 0x1c7   : > { %v3573_v30 = vpop.f32.mrb[0].mxu1 }
 0x1c8   : > { %v1647_v57 = vpop.f32.mrb[1].mxu1 }
 0x1c9   : > { %v3574_v62 = vpop.f32.mrb[2].mxu1 }
 0x1ca   : > { %v1650_v5 = vpop.f32.mrb[3].mxu1 }
 0x1cf   : > { %v3577_v63 = vpop.f32.mrb[4].mxu1 }
 0x1d0   : > { %v1663_v49 = vpop.f32.mrb[5].mxu1 }
 0x1d1   : > { %v3578_v54 = vpop.f32.mrb[6].mxu1 }
 0x1d2   : > { %v1666_v36 = vpop.f32.mrb[7].mxu1 }
 0x1d7   : > { %v3581_v45 = vpop.f32.mrb[8].mxu1 }
 0x1d8   : > { %v1679_v31 = vpop.f32.mrb[9].mxu1 }
 0x1d9   : > { %v3582_v29 = vpop.f32.mrb[10].mxu1 }
 0x1da   : > { %v1682_v44 = vpop.f32.mrb[11].mxu1 }
 0x1df   : > { %v3585_v26 = vpop.f32.mrb[12].mxu1 }
 0x1e0   : > { %v1695_v8 = vpop.f32.mrb[13].mxu1 }
 0x1e1   : > { %v5100_v1 = vpop.f32.mrb[14].mxu1 }
 0x1e2   : > { %v5102_v40 = vpop.f32.mrb[15].mxu1 }
 0x1e7   : > { %v3743_v19 = vpop.f32.mrb[0].mxu0 }
 0x1e8   : > { %v3775_v16 = vadd.f32 %v3743_v19, %v3573_v30  ;;  %v2733_v52 = vpop.f32.mrb[1].mxu0 }
 0x1e9   : > { %v3776_v3 = vadd.f32 %v2733_v52, %v1647_v57  ;;  %v3744_v4 = vpop.f32.mrb[2].mxu0 }
 0x1ea   : > { %v3777_v11 = vadd.f32 %v3744_v4, %v3574_v62  ;;  %v2736_v21 = vpop.f32.mrb[3].mxu0  ;;  %v2931_v51 = vmul.f32 %v3775_v16, %v3775_v16 }
 0x1eb   : > { %v3778_v13 = vadd.f32 %v2736_v21, %v1650_v5  ;;  %v2929_v24 = vmul.f32 %v3776_v3, %v3776_v3 }
 0x1ec   : > { %v2932_v27 = vmul.f32 %v3777_v11, %v3777_v11 }
 0x1ed   : > { %v2892_v9 = vadd.f32 %v3778_v13, %v3776_v3  ;;  %v2930_v10 = vmul.f32 %v3778_v13, %v3778_v13 }
 0x1ef   : > { %v2893_v33 = vadd.f32 %v3775_v16, %v2892_v9  ;;  %v2961_v39 = vadd.f32 %v2930_v10, %v2929_v24  ;;  %v3747_v58 = vpop.f32.mrb[4].mxu0 }
 0x1f0   : > { %v3779_v42 = vadd.f32 %v3747_v58, %v3577_v63  ;;  %v2749_v15 = vpop.f32.mrb[5].mxu0 }
 0x1f1   : > { %v2962_v6 = vadd.f32 %v2961_v39, %v2931_v51  ;;  %v3780_v7 = vadd.f32 %v2749_v15, %v1663_v49  ;;  %v2894_v60 = vadd.f32 %v3777_v11, %v2893_v33  ;;  %v3748_v14 = vpop.f32.mrb[6].mxu0 }
 0x1f2   : > { %v3781_v28 = vadd.f32 %v3748_v14, %v3578_v54  ;;  %v2752_v25 = vpop.f32.mrb[7].mxu0  ;;  %v2935_v12 = vmul.f32 %v3779_v42, %v3779_v42 }
 0x1f3   : > { %v2895_v38 = vadd.f32 %v3780_v7, %v2894_v60  ;;  %v2933_v46 = vmul.f32 %v3780_v7, %v3780_v7  ;;  %v2963_v47 = vadd.f32 %v2962_v6, %v2932_v27  ;;  %v3782_v32 = vadd.f32 %v2752_v25, %v1666_v36 }
 0x1f4   : > { %v2936_v61 = vmul.f32 %v3781_v28, %v3781_v28 }
 0x1f5   : > { %v2964_v18 = vadd.f32 %v2963_v47, %v2933_v46  ;;  %v2896_v43 = vadd.f32 %v3782_v32, %v2895_v38  ;;  %v2934_v55 = vmul.f32 %v3782_v32, %v3782_v32 }
 0x1f7   : > { %v2897_v23 = vadd.f32 %v3779_v42, %v2896_v43  ;;  %v2965_v59 = vadd.f32 %v2964_v18, %v2934_v55  ;;  %v3751_v35 = vpop.f32.mrb[8].mxu0 }
 0x1f8   : > { %v3783_v48 = vadd.f32 %v3751_v35, %v3581_v45  ;;  %v2765_v2 = vpop.f32.mrb[9].mxu0 }
 0x1f9   : > { %v2966_v56 = vadd.f32 %v2965_v59, %v2935_v12  ;;  %v3784_v53 = vadd.f32 %v2765_v2, %v1679_v31  ;;  %v2898_v17 = vadd.f32 %v3781_v28, %v2897_v23  ;;  %v3752_v34 = vpop.f32.mrb[10].mxu0 }
 0x1fa   : > { %v3785_v37 = vadd.f32 %v3752_v34, %v3582_v29  ;;  %v2768_v41 = vpop.f32.mrb[11].mxu0  ;;  %v2939_v5 = vmul.f32 %v3783_v48, %v3783_v48 }
 0x1fb   : > { %v2899_v50 = vadd.f32 %v3784_v53, %v2898_v17  ;;  %v2937_v20 = vmul.f32 %v3784_v53, %v3784_v53  ;;  %v2967_v0 = vadd.f32 %v2966_v56, %v2936_v61  ;;  %v3786_v22 = vadd.f32 %v2768_v41, %v1682_v44 }
 0x1fc   : > { %v2940_v19 = vmul.f32 %v3785_v37, %v3785_v37 }
 0x1fd   : > { %v2968_v30 = vadd.f32 %v2967_v0, %v2937_v20  ;;  %v2900_v57 = vadd.f32 %v3786_v22, %v2899_v50  ;;  %v2938_v62 = vmul.f32 %v3786_v22, %v3786_v22 }
 0x1ff   : > { %v2901_v63 = vadd.f32 %v3783_v48, %v2900_v57  ;;  %v2969_v49 = vadd.f32 %v2968_v30, %v2938_v62  ;;  %v3755_v54 = vpop.f32.mrb[12].mxu0 }
 0x200   : > { %v3787_v36 = vadd.f32 %v3755_v54, %v3585_v26  ;;  %v2781_v45 = vpop.f32.mrb[13].mxu0 }
 0x201   : > { %v2970_v16 = vadd.f32 %v2969_v49, %v2939_v5  ;;  %v3788_v31 = vadd.f32 %v2781_v45, %v1695_v8  ;;  %v2902_v52 = vadd.f32 %v3785_v37, %v2901_v63  ;;  %v3756_v3 = vpop.f32.mrb[14].mxu0 }
 0x202   : > { %v3789_v29 = vadd.f32 %v3756_v3, %v5100_v1  ;;  %v2784_v4 = vpop.f32.mrb[15].mxu0  ;;  %v2943_v51 = vmul.f32 %v3787_v36, %v3787_v36 }
 0x203   : > { %v2903_v11 = vadd.f32 %v3788_v31, %v2902_v52  ;;  %v2941_v21 = vmul.f32 %v3788_v31, %v3788_v31  ;;  %v2971_v44 = vadd.f32 %v2970_v16, %v2940_v19  ;;  %v3790_v13 = vadd.f32 %v2784_v4, %v5102_v40 }
 0x204   : > { %v2944_v27 = vmul.f32 %v3789_v29, %v3789_v29 }
 0x205   : > { %v2972_v24 = vadd.f32 %v2971_v44, %v2941_v21  ;;  %v2904_v9 = vadd.f32 %v3790_v13, %v2903_v11  ;;  %v2942_v10 = vmul.f32 %v3790_v13, %v3790_v13 }
 0x207   : > { %v2905_v33 = vadd.f32 %v3787_v36, %v2904_v9  ;;  %v2973_v26 = vadd.f32 %v2972_v24, %v2942_v10  ;;  %v3623_v39 = vpop.f32.mrb[16].mxu1  ;;  %v3759_v58 = vpop.f32.mrb[16].mxu0 }
 0x208   : > { %v3791_v42 = vadd.f32 %v3759_v58, %v3623_v39  ;;  %v1939_v8 = vpop.f32.mrb[17].mxu1  ;;  %v2797_v15 = vpop.f32.mrb[17].mxu0 }
 0x209   : > { %v2974_v6 = vadd.f32 %v2973_v26, %v2943_v51  ;;  %v3792_v1 = vadd.f32 %v2797_v15, %v1939_v8  ;;  %v2906_v7 = vadd.f32 %v3789_v29, %v2905_v33  ;;  %v3624_v60 = vpop.f32.mrb[18].mxu1  ;;  %v3760_v14 = vpop.f32.mrb[18].mxu0 }
 0x20a   : > { %v3793_v28 = vadd.f32 %v3760_v14, %v3624_v60  ;;  %v1942_v25 = vpop.f32.mrb[19].mxu1  ;;  %v2800_v40 = vpop.f32.mrb[19].mxu0  ;;  %v2947_v12 = vmul.f32 %v3791_v42, %v3791_v42 }
 0x20b   : > { %v2907_v38 = vadd.f32 %v3792_v1, %v2906_v7  ;;  %v2945_v46 = vmul.f32 %v3792_v1, %v3792_v1  ;;  %v2975_v47 = vadd.f32 %v2974_v6, %v2944_v27  ;;  %v3794_v32 = vadd.f32 %v2800_v40, %v1942_v25 }
 0x20c   : > { %v2948_v53 = vmul.f32 %v3793_v28, %v3793_v28 }
 0x20d   : > { %v2976_v18 = vadd.f32 %v2975_v47, %v2945_v46  ;;  %v2908_v43 = vadd.f32 %v3794_v32, %v2907_v38  ;;  %v2946_v55 = vmul.f32 %v3794_v32, %v3794_v32 }
 0x20f   : > { %v2909_v23 = vadd.f32 %v3791_v42, %v2908_v43  ;;  %v2977_v59 = vadd.f32 %v2976_v18, %v2946_v55  ;;  %v3627_v35 = vpop.f32.mrb[20].mxu1  ;;  %v3763_v48 = vpop.f32.mrb[20].mxu0 }
 0x210   : > { %v3795_v2 = vadd.f32 %v3763_v48, %v3627_v35  ;;  %v1955_v61 = vpop.f32.mrb[21].mxu1  ;;  %v2813_v56 = vpop.f32.mrb[21].mxu0 }
 0x211   : > { %v2978_v17 = vadd.f32 %v2977_v59, %v2947_v12  ;;  %v3796_v34 = vadd.f32 %v2813_v56, %v1955_v61  ;;  %v2910_v37 = vadd.f32 %v3793_v28, %v2909_v23  ;;  %v3628_v41 = vpop.f32.mrb[22].mxu1  ;;  %v3764_v50 = vpop.f32.mrb[22].mxu0 }
 0x212   : > { %v3797_v20 = vadd.f32 %v3764_v50, %v3628_v41  ;;  %v1958_v0 = vpop.f32.mrb[23].mxu1  ;;  %v2816_v22 = vpop.f32.mrb[23].mxu0  ;;  %v2951_v36 = vmul.f32 %v3795_v2, %v3795_v2 }
 0x213   : > { %v2911_v30 = vadd.f32 %v3796_v34, %v2910_v37  ;;  %v2949_v57 = vmul.f32 %v3796_v34, %v3796_v34  ;;  %v2979_v62 = vadd.f32 %v2978_v17, %v2948_v53  ;;  %v3798_v5 = vadd.f32 %v2816_v22, %v1958_v0 }
 0x214   : > { %v2952_v4 = vmul.f32 %v3797_v20, %v3797_v20 }
 0x215   : > { %v2980_v63 = vadd.f32 %v2979_v62, %v2949_v57  ;;  %v2912_v49 = vadd.f32 %v3798_v5, %v2911_v30  ;;  %v2950_v54 = vmul.f32 %v3798_v5, %v3798_v5 }
 0x217   : > { %v2913_v45 = vadd.f32 %v3795_v2, %v2912_v49  ;;  %v2981_v19 = vadd.f32 %v2980_v63, %v2950_v54  ;;  %v3631_v16 = vpop.f32.mrb[24].mxu1  ;;  %v3767_v31 = vpop.f32.mrb[24].mxu0 }
 0x218   : > { %v3799_v52 = vadd.f32 %v3767_v31, %v3631_v16  ;;  %v1971_v3 = vpop.f32.mrb[25].mxu1  ;;  %v2829_v29 = vpop.f32.mrb[25].mxu0 }
 0x219   : > { %v2982_v11 = vadd.f32 %v2981_v19, %v2951_v36  ;;  %v3800_v21 = vadd.f32 %v2829_v29, %v1971_v3  ;;  %v2914_v44 = vadd.f32 %v3797_v20, %v2913_v45  ;;  %v3632_v13 = vpop.f32.mrb[26].mxu1  ;;  %v3768_v24 = vpop.f32.mrb[26].mxu0 }
 0x21a   : > { %v3801_v9 = vadd.f32 %v3768_v24, %v3632_v13  ;;  %v1974_v10 = vpop.f32.mrb[27].mxu1  ;;  %v2832_v51 = vpop.f32.mrb[27].mxu0  ;;  %v2955_v27 = vmul.f32 %v3799_v52, %v3799_v52 }
 0x21b   : > { %v2915_v33 = vadd.f32 %v3800_v21, %v2914_v44  ;;  %v2953_v26 = vmul.f32 %v3800_v21, %v3800_v21  ;;  %v2983_v39 = vadd.f32 %v2982_v11, %v2952_v4  ;;  %v3802_v58 = vadd.f32 %v2832_v51, %v1974_v10 }
 0x21c   : > { %v2956_v40 = vmul.f32 %v3801_v9, %v3801_v9 }
 0x21d   : > { %v2984_v42 = vadd.f32 %v2983_v39, %v2953_v26  ;;  %v2916_v8 = vadd.f32 %v3802_v58, %v2915_v33  ;;  %v2954_v15 = vmul.f32 %v3802_v58, %v3802_v58 }
 0x21f   : > { %v2917_v6 = vadd.f32 %v3799_v52, %v2916_v8  ;;  %v2985_v1 = vadd.f32 %v2984_v42, %v2954_v15  ;;  %v3635_v7 = vpop.f32.mrb[28].mxu1  ;;  %v3771_v60 = vpop.f32.mrb[28].mxu0 }
 0x220   : > { %v3803_v14 = vadd.f32 %v3771_v60, %v3635_v7  ;;  %v1987_v28 = vpop.f32.mrb[29].mxu1  ;;  %v2845_v25 = vpop.f32.mrb[29].mxu0 }
 0x221   : > { %v2986_v38 = vadd.f32 %v2985_v1, %v2955_v27  ;;  %v3804_v46 = vadd.f32 %v2845_v25, %v1987_v28  ;;  %v2918_v47 = vadd.f32 %v3801_v9, %v2917_v6  ;;  %v3636_v32 = vpop.f32.mrb[30].mxu1  ;;  %v3772_v18 = vpop.f32.mrb[30].mxu0 }
 0x222   : > { %v3805_v43 = vadd.f32 %v3772_v18, %v3636_v32  ;;  %v1990_v55 = vpop.f32.mrb[31].mxu1  ;;  %v2848_v12 = vpop.f32.mrb[31].mxu0  ;;  %v2959_v53 = vmul.f32 %v3803_v14, %v3803_v14 }
 0x223   : > { %v2919_v23 = vadd.f32 %v3804_v46, %v2918_v47  ;;  %v2957_v59 = vmul.f32 %v3804_v46, %v3804_v46  ;;  %v2987_v35 = vadd.f32 %v2986_v38, %v2956_v40  ;;  %v3806_v48 = vadd.f32 %v2848_v12, %v1990_v55 }
 0x224   : > { %v2960_v37 = vmul.f32 %v3805_v43, %v3805_v43 }
 0x225   : > { %v2988_v2 = vadd.f32 %v2987_v35, %v2957_v59  ;;  %v2920_v61 = vadd.f32 %v3806_v48, %v2919_v23  ;;  %v2958_v56 = vmul.f32 %v3806_v48, %v3806_v48 }
 0x227   : > { %v2921_v17 = vadd.f32 %v3803_v14, %v2920_v61  ;;  %v2989_v34 = vadd.f32 %v2988_v2, %v2958_v56 }
 0x229   : > { %v2922_v41 = vadd.f32 %v3805_v43, %v2921_v17  ;;  %v2990_v50 = vadd.f32 %v2989_v34, %v2959_v53 }
 0x22b   : > { %v2923_v20 = vrot.slane %v2922_v41, 4  ;;  %v2991_v0 = vadd.f32 %v2990_v50, %v2960_v37 }
 0x22d   : > { %v2924_v22 = vadd.f32 %v2923_v20, %v2922_v41  ;;  %v2992_v30 = vrot.slane %v2991_v0, 4 }
 0x22f   : > { %v2925_v57 = vrot.slane %v2924_v22, 2  ;;  %v2993_v62 = vadd.f32 %v2992_v30, %v2991_v0 }
 0x231   : > { %v2926_v5 = vadd.f32 %v2925_v57, %v2924_v22  ;;  %v2994_v63 = vrot.slane %v2993_v62, 2 }
 0x233   : > { %v2927_v49 = vrot.slane %v2926_v5, 1  ;;  %v2995_v54 = vadd.f32 %v2994_v63, %v2993_v62 }
 0x235   : > { %v2996_v36 = vrot.slane %v2995_v54, 1  ;;  %v2928_v45 = vadd.f32 %v2927_v49, %v2926_v5 }
 0x237   : > { %v2997_v19 = vadd.f32 %v2996_v36, %v2995_v54 }
 0x239   : > { %v2999_v16 = vsel %vm2998_vm8, %v2928_v45, %v2997_v19 }
 0x23a   : > { %3000 = vst [vmem:[%s175_s16] sm:$0x3] %v2999_v16 }
 0x23b PF: > { %s12_s11 = sadd.s32 1, %s4110_s11   ;;  %s5199_s9 = smov %s4106_s10 }
 0x23c   : > { %p9_p5 = scmp.ge.s32.totalorder %s12_s11, 4   ;;  %s5200_s10 = smov %s5202_s12 }
 0x23e   :  { %11 = sbr.rel (!%p9_p5) target bundleno = 2 (0x2), region = 66 }

</bundles_post_ra>
